<compile_context>
chip_gen: v7x
topology: tpu7x:2x2x1
jax: 0.10.0
libtpu: 0.0.40
codegen_flags: <defaults>
</compile_context>

<pallas_src>
import functools

import jax
import jax.numpy as jnp
import numpy as np
from jax import lax
from jax.experimental import pallas as pl
from jax.experimental.pallas import tpu as pltpu


def _round_up(x, m):
    return ((x + m - 1) // m) * m


def _pick_row_block(h):
    """Largest divisor of h (<=32) to bound the per-chunk im2col patch."""
    for rb in (32, 16, 8, 4, 2, 1):
        if rb <= h and h % rb == 0:
            return rb
    return h


def _im2col(band, rows, cols, cin):
    """band: (rows+2, cols+2, cin) -> (rows*cols, 9*cin).

    Channel ordering per pixel is (kh, kw, cin), matching an HWIO weight
    reshaped to (9*cin, cout).
    """
    taps = []
    for dh in range(3):
        for dw in range(3):
            taps.append(band[dh:dh + rows, dw:dw + cols, :])
    patch = jnp.concatenate(taps, axis=-1)          # (rows, cols, 9*cin)
    return patch.reshape(rows * cols, 9 * cin)


def _bottleneck_kernel(x_ref, w1_ref, s1_ref, b1_ref, w2_ref, s2_ref, b2_ref,
                       out_ref, xpad_ref, ypad_ref, *, add_residual, row_blk):
    """Fused Bottleneck for one batch element.

    x_ref   : (1, H, W, C1)       input tile (f32)
    w1_ref  : (9*C1, CH)          cv1 weights, im2col layout (bf16)
    s1/b1   : (1, CH)             cv1 folded-BN scale / bias (f32)
    w2_ref  : (9*CH, C2)          cv2 weights, im2col layout (bf16)
    s2/b2   : (1, C2)             cv2 folded-BN scale / bias (f32)
    out_ref : (1, H, W, C2)       output tile
    xpad_ref: (H+2, W+2, C1) bf16 VMEM scratch (x + halo)
    ypad_ref: (H+2, W+2, CH) bf16 VMEM scratch (cv1 output + halo)
    """
    H = x_ref.shape[1]
    W = x_ref.shape[2]
    C1 = x_ref.shape[3]
    CH = w1_ref.shape[1]
    C2 = w2_ref.shape[1]
    RB = row_blk

    # ---- stage 0: build halos in VMEM (no jnp.pad / HBM round trip) --------
    xpad_ref[...] = jnp.zeros_like(xpad_ref)
    xpad_ref[1:H + 1, 1:W + 1, :] = x_ref[0].astype(xpad_ref.dtype)
    ypad_ref[...] = jnp.zeros_like(ypad_ref)

    # hoisted small constants (keep them out of the row-chunk loop)
    s1 = s1_ref[...]
    b1 = b1_ref[...]

    # ---- stage 1: cv1 = 3x3 conv + BN + SiLU, kept resident in VMEM --------
    for r in range(0, H, RB):
        band = xpad_ref[r:r + RB + 2, :, :]                  # (RB+2, W+2, C1)
        patch = _im2col(band, RB, W, C1)                     # bf16
        acc = jnp.dot(patch, w1_ref[...],
                      preferred_element_type=jnp.float32)    # (RB*W, CH) f32
        y = acc * s1 + b1                                    # folded BN
        y = y * jax.nn.sigmoid(y)                            # SiLU (f32)
        ypad_ref[r + 1:r + RB + 1, 1:W + 1, :] = (
            y.reshape(RB, W, CH).astype(ypad_ref.dtype))

    s2 = s2_ref[...]
    b2 = b2_ref[...]

    # ---- stage 2: cv2 = 3x3 conv + BN + SiLU (+ residual) -> HBM -----------
    for r in range(0, H, RB):
        band = ypad_ref[r:r + RB + 2, :, :]                  # (RB+2, W+2, CH)
        patch = _im2col(band, RB, W, CH)
        acc = jnp.dot(patch, w2_ref[...],
                      preferred_element_type=jnp.float32)    # (RB*W, C2) f32
        z = acc * s2 + b2
        z = z * jax.nn.sigmoid(z)
        if add_residual:
            z = z + x_ref[0, r:r + RB, :, :].reshape(RB * W, C2)
        out_ref[0, r:r + RB, :, :] = z.reshape(RB, W, C2).astype(out_ref.dtype)


def bottleneck_forward(x, params, shortcut=True, lane=128):
    """Bottleneck forward: x (N,H,W,c1) NHWC -> (N,H,W,c2)."""
    w1, s1, b1, w2, s2, b2 = params
    N, H, W, c1 = x.shape
    c_ = w1.shape[-1]
    c2 = w2.shape[-1]
    add = bool(shortcut and c1 == c2)

    # Lane-dense channel counts (pad up to a multiple of 128).  Real YOLO
    # channel counts are usually already multiples of 32/64/128, so this is
    # a no-op there; at toy widths it trades a little extra MXU work for
    # unmasked, lane-dense loads/stores.
    C1 = _round_up(c1, lane)
    CH = _round_up(c_, lane)
    C2 = _round_up(c2, lane)
    if add:
        C1 = C2 = max(C1, C2)

    xp = x if C1 == c1 else jnp.pad(x, ((0, 0), (0, 0), (0, 0), (0, C1 - c1)))

    def pad_w(w, ci, co, Ci, Co):
        return jnp.pad(w, ((0, 0), (0, 0), (0, Ci - ci), (0, Co - co)))

    # im2col weight layout: HWIO (3,3,Ci,Co) -> (9*Ci, Co); bf16 for the MXU.
    w1p = pad_w(w1, c1, c_, C1, CH).reshape(9 * C1, CH).astype(jnp.bfloat16)
    w2p = pad_w(w2, c_, c2, CH, C2).reshape(9 * CH, C2).astype(jnp.bfloat16)
    s1p = jnp.pad(s1.astype(jnp.float32), (0, CH - c_)).reshape(1, CH)
    b1p = jnp.pad(b1.astype(jnp.float32), (0, CH - c_)).reshape(1, CH)
    s2p = jnp.pad(s2.astype(jnp.float32), (0, C2 - c2)).reshape(1, C2)
    b2p = jnp.pad(b2.astype(jnp.float32), (0, C2 - c2)).reshape(1, C2)

    row_blk = _pick_row_block(H)
    kernel = functools.partial(_bottleneck_kernel, add_residual=add,
                               row_blk=row_blk)

    out = pl.pallas_call(
        kernel,
        out_shape=jax.ShapeDtypeStruct((N, H, W, C2), x.dtype),
        grid_spec=pltpu.PrefetchScalarGridSpec(
            num_scalar_prefetch=0,
            grid=(N,),
            in_specs=[
                pl.BlockSpec((1, H, W, C1), lambda n: (n, 0, 0, 0)),
                pl.BlockSpec((9 * C1, CH), lambda n: (0, 0)),
                pl.BlockSpec((1, CH), lambda n: (0, 0)),
                pl.BlockSpec((1, CH), lambda n: (0, 0)),
                pl.BlockSpec((9 * CH, C2), lambda n: (0, 0)),
                pl.BlockSpec((1, C2), lambda n: (0, 0)),
                pl.BlockSpec((1, C2), lambda n: (0, 0)),
            ],
            out_specs=pl.BlockSpec((1, H, W, C2), lambda n: (n, 0, 0, 0)),
            scratch_shapes=[
                pltpu.VMEM((H + 2, W + 2, C1), jnp.bfloat16),   # x + halo
                pltpu.VMEM((H + 2, W + 2, CH), jnp.bfloat16),   # cv1 out + halo
            ],
        ),
        compiler_params=pltpu.CompilerParams(
            dimension_semantics=("parallel",),
            vmem_limit_bytes=32 * 1024 * 1024,
        ),
    )(xp, w1p, s1p, b1p, w2p, s2p, b2p)

    return out if C2 == c2 else out[..., :c2]


def init_params(key, c1, c2, e=0.5):
    """Deterministic synthetic params; BN folded to (scale, bias)."""
    c_ = int(c2 * e)
    ks = jax.random.split(key, 10)

    def bn_fold(kg, kb, km, kv, c, eps=1e-3):
        gamma = 1.0 + 0.1 * jax.random.normal(kg, (c,), jnp.float32)
        beta = 0.1 * jax.random.normal(kb, (c,), jnp.float32)
        mean = 0.1 * jax.random.normal(km, (c,), jnp.float32)
        var = jnp.abs(jax.random.normal(kv, (c,), jnp.float32)) + 0.5
        scale = gamma / jnp.sqrt(var + eps)
        bias = beta - mean * scale
        return scale, bias

    w1 = 0.2 * jax.random.normal(ks[0], (3, 3, c1, c_), jnp.float32)
    s1, b1 = bn_fold(ks[1], ks[2], ks[3], ks[4], c_)
    w2 = 0.2 * jax.random.normal(ks[5], (3, 3, c_, c2), jnp.float32)
    s2, b2 = bn_fold(ks[6], ks[7], ks[8], ks[9], c2)
    return (w1, s1, b1, w2, s2, b2)


def ref_forward(x, params, shortcut=True):
    """Pure-JAX f32 reference (correctness check only)."""
    w1, s1, b1, w2, s2, b2 = params

    def conv(xx, w, s, b):
        y = lax.conv_general_dilated(
            xx, w, window_strides=(1, 1), padding="SAME",
            dimension_numbers=("NHWC", "HWIO", "NHWC"))
        y = y * s.reshape(1, 1, 1, -1) + b.reshape(1, 1, 1, -1)
        return y * jax.nn.sigmoid(y)

    y = conv(conv(x, w1, s1, b1), w2, s2, b2)
    if shortcut and x.shape[-1] == w2.shape[-1]:
        y = x + y
    return y


if __name__ == "__main__":
    key = jax.random.PRNGKey(0)
    kx, kp = jax.random.split(key)

    N, H, W = 2, 16, 16
    c1 = c2 = 8                      # shortcut active since c1 == c2
    x = jax.random.normal(kx, (N, H, W, c1), jnp.float32)
    params = init_params(kp, c1, c2, e=0.5)

    out = bottleneck_forward(x, params, shortcut=True)
    out = jax.block_until_ready(out)

    ref = ref_forward(x, params, shortcut=True)
    assert out.shape == (N, H, W, c2)
    # bf16 matmul inputs (f32 accumulation + f32 post-ops) -> looser tolerance.
    assert np.allclose(np.asarray(out), np.asarray(ref), atol=3e-2, rtol=3e-2)
    print("KERNEL_OK")
</pallas_src>

<mosaic_0001>
module attributes {stable_mosaic.version = 11 : i64} {
  func.func @_bottleneck_kernel(%arg0: i32, %arg1: memref<1x16x16x128xf32, #tpu.memory_space<vmem>>, %arg2: memref<1152x128xbf16, #tpu.memory_space<vmem>>, %arg3: memref<1x128xf32, #tpu.memory_space<vmem>>, %arg4: memref<1x128xf32, #tpu.memory_space<vmem>>, %arg5: memref<1152x128xbf16, #tpu.memory_space<vmem>>, %arg6: memref<1x128xf32, #tpu.memory_space<vmem>>, %arg7: memref<1x128xf32, #tpu.memory_space<vmem>>, %arg8: memref<1x16x16x128xf32, #tpu.memory_space<vmem>>, %arg9: memref<18x18x128xbf16, #tpu.memory_space<vmem>>, %arg10: memref<18x18x128xbf16, #tpu.memory_space<vmem>>) attributes {dimension_semantics = [#tpu.dimension_semantics<parallel>], iteration_bounds = array<i64: 2>, scalar_prefetch = 0 : i64, scratch_operands = 2 : i64, tpu.core_type = #tpu.core_type<tc>, window_params = [{transform_indices = @transform_0, window_bounds = array<i64: 1, 16, 16, 128>}, {pipeline_mode = #tpu.pipeline_mode<synchronous>, transform_indices = @transform_1, window_bounds = array<i64: 1152, 128>}, {pipeline_mode = #tpu.pipeline_mode<synchronous>, transform_indices = @transform_2, window_bounds = array<i64: 1, 128>}, {pipeline_mode = #tpu.pipeline_mode<synchronous>, transform_indices = @transform_3, window_bounds = array<i64: 1, 128>}, {pipeline_mode = #tpu.pipeline_mode<synchronous>, transform_indices = @transform_4, window_bounds = array<i64: 1152, 128>}, {pipeline_mode = #tpu.pipeline_mode<synchronous>, transform_indices = @transform_5, window_bounds = array<i64: 1, 128>}, {pipeline_mode = #tpu.pipeline_mode<synchronous>, transform_indices = @transform_6, window_bounds = array<i64: 1, 128>}, {transform_indices = @transform_7, window_bounds = array<i64: 1, 16, 16, 128>}]} {
    %cst = arith.constant 0.000000e+00 : bf16
    %0 = vector.broadcast %cst : bf16 to vector<18x18x128xbf16>
    %c0 = arith.constant 0 : index
    %c0_0 = arith.constant 0 : index
    %c0_1 = arith.constant 0 : index
    %1 = vector.load %arg9[%c0, %c0_0, %c0_1] : memref<18x18x128xbf16, #tpu.memory_space<vmem>>, vector<18x18x128xbf16>
    tpu.vector_store %arg9[%c0, %c0_0, %c0_1], %0 {strides = array<i32>} : memref<18x18x128xbf16, #tpu.memory_space<vmem>>, vector<18x18x128xbf16>,
    %c0_2 = arith.constant 0 : index
    %c0_3 = arith.constant 0 : index
    %c0_4 = arith.constant 0 : index
    %c0_5 = arith.constant 0 : index
    %2 = vector.load %arg1[%c0_2, %c0_3, %c0_4, %c0_5] : memref<1x16x16x128xf32, #tpu.memory_space<vmem>>, vector<1x16x16x128xf32>
    %3 = vector.shape_cast %2 : vector<1x16x16x128xf32> to vector<16x16x128xf32>
    %4 = arith.truncf %3 : vector<16x16x128xf32> to vector<16x16x128xbf16>
    %c1 = arith.constant 1 : index
    %c1_6 = arith.constant 1 : index
    %c0_7 = arith.constant 0 : index
    %5 = vector.load %arg9[%c1, %c1_6, %c0_7] : memref<18x18x128xbf16, #tpu.memory_space<vmem>>, vector<16x16x128xbf16>
    tpu.vector_store %arg9[%c1, %c1_6, %c0_7], %4 {strides = array<i32>} : memref<18x18x128xbf16, #tpu.memory_space<vmem>>, vector<16x16x128xbf16>,
    %cst_8 = arith.constant 0.000000e+00 : bf16
    %6 = vector.broadcast %cst_8 : bf16 to vector<18x18x128xbf16>
    %c0_9 = arith.constant 0 : index
    %c0_10 = arith.constant 0 : index
    %c0_11 = arith.constant 0 : index
    %7 = vector.load %arg10[%c0_9, %c0_10, %c0_11] : memref<18x18x128xbf16, #tpu.memory_space<vmem>>, vector<18x18x128xbf16>
    tpu.vector_store %arg10[%c0_9, %c0_10, %c0_11], %6 {strides = array<i32>} : memref<18x18x128xbf16, #tpu.memory_space<vmem>>, vector<18x18x128xbf16>,
    %c0_12 = arith.constant 0 : index
    %c0_13 = arith.constant 0 : index
    %8 = vector.load %arg3[%c0_12, %c0_13] : memref<1x128xf32, #tpu.memory_space<vmem>>, vector<1x128xf32>
    %c0_14 = arith.constant 0 : index
    %c0_15 = arith.constant 0 : index
    %9 = vector.load %arg4[%c0_14, %c0_15] : memref<1x128xf32, #tpu.memory_space<vmem>>, vector<1x128xf32>
    %c0_16 = arith.constant 0 : index
    %c0_17 = arith.constant 0 : index
    %c0_18 = arith.constant 0 : index
    %10 = vector.load %arg9[%c0_16, %c0_17, %c0_18] : memref<18x18x128xbf16, #tpu.memory_space<vmem>>, vector<18x18x128xbf16>
    %11 = vector.extract_strided_slice %10 {offsets = [0, 0, 0], sizes = [16, 16, 128], strides = [1, 1, 1]} : vector<18x18x128xbf16> to vector<16x16x128xbf16>
    %12 = vector.extract_strided_slice %10 {offsets = [0, 1, 0], sizes = [16, 16, 128], strides = [1, 1, 1]} : vector<18x18x128xbf16> to vector<16x16x128xbf16>
    %13 = vector.extract_strided_slice %10 {offsets = [0, 2, 0], sizes = [16, 16, 128], strides = [1, 1, 1]} : vector<18x18x128xbf16> to vector<16x16x128xbf16>
    %14 = vector.extract_strided_slice %10 {offsets = [1, 0, 0], sizes = [16, 16, 128], strides = [1, 1, 1]} : vector<18x18x128xbf16> to vector<16x16x128xbf16>
    %15 = vector.extract_strided_slice %10 {offsets = [1, 1, 0], sizes = [16, 16, 128], strides = [1, 1, 1]} : vector<18x18x128xbf16> to vector<16x16x128xbf16>
    %16 = vector.extract_strided_slice %10 {offsets = [1, 2, 0], sizes = [16, 16, 128], strides = [1, 1, 1]} : vector<18x18x128xbf16> to vector<16x16x128xbf16>
    %17 = vector.extract_strided_slice %10 {offsets = [2, 0, 0], sizes = [16, 16, 128], strides = [1, 1, 1]} : vector<18x18x128xbf16> to vector<16x16x128xbf16>
    %18 = vector.extract_strided_slice %10 {offsets = [2, 1, 0], sizes = [16, 16, 128], strides = [1, 1, 1]} : vector<18x18x128xbf16> to vector<16x16x128xbf16>
    %19 = vector.extract_strided_slice %10 {offsets = [2, 2, 0], sizes = [16, 16, 128], strides = [1, 1, 1]} : vector<18x18x128xbf16> to vector<16x16x128xbf16>
    %20 = tpu.concatenate %11, %12, %13, %14, %15, %16, %17, %18, %19 in 2 : vector<16x16x128xbf16>, vector<16x16x128xbf16>, vector<16x16x128xbf16>, vector<16x16x128xbf16>, vector<16x16x128xbf16>, vector<16x16x128xbf16>, vector<16x16x128xbf16>, vector<16x16x128xbf16>, vector<16x16x128xbf16> -> vector<16x16x1152xbf16>
    %21 = vector.shape_cast %20 : vector<16x16x1152xbf16> to vector<256x1152xbf16>
    %c0_19 = arith.constant 0 : index
    %c0_20 = arith.constant 0 : index
    %22 = vector.load %arg2[%c0_19, %c0_20] : memref<1152x128xbf16, #tpu.memory_space<vmem>>, vector<1152x128xbf16>
    %cst_21 = arith.constant dense<0.000000e+00> : vector<256x128xf32>
    %23 = tpu.matmul %21, %22, %cst_21 {dimension_numbers = #tpu.dot_dimension_numbers<[1], [0], [0], [1], [0, 0, 1, 1], [], []>} : vector<256x1152xbf16>, vector<1152x128xbf16>, vector<256x128xf32> -> vector<256x128xf32>
    %24 = vector.broadcast %8 : vector<1x128xf32> to vector<256x128xf32>
    %25 = arith.mulf %23, %24 : vector<256x128xf32>
    %26 = vector.broadcast %9 : vector<1x128xf32> to vector<256x128xf32>
    %27 = arith.addf %25, %26 : vector<256x128xf32>
    %28 = arith.negf %27 : vector<256x128xf32>
    %29 = math.exp %28 : vector<256x128xf32>
    %cst_22 = arith.constant 1.000000e+00 : f32
    %30 = vector.broadcast %cst_22 : f32 to vector<256x128xf32>
    %31 = arith.addf %30, %29 : vector<256x128xf32>
    %32 = arith.divf %30, %31 : vector<256x128xf32>
    %33 = arith.mulf %27, %32 : vector<256x128xf32>
    %34 = vector.shape_cast %33 : vector<256x128xf32> to vector<16x16x128xf32>
    %35 = arith.truncf %34 : vector<16x16x128xf32> to vector<16x16x128xbf16>
    %c1_23 = arith.constant 1 : index
    %c1_24 = arith.constant 1 : index
    %c0_25 = arith.constant 0 : index
    %36 = vector.load %arg10[%c1_23, %c1_24, %c0_25] : memref<18x18x128xbf16, #tpu.memory_space<vmem>>, vector<16x16x128xbf16>
    tpu.vector_store %arg10[%c1_23, %c1_24, %c0_25], %35 {strides = array<i32>} : memref<18x18x128xbf16, #tpu.memory_space<vmem>>, vector<16x16x128xbf16>,
    %c0_26 = arith.constant 0 : index
    %c0_27 = arith.constant 0 : index
    %37 = vector.load %arg6[%c0_26, %c0_27] : memref<1x128xf32, #tpu.memory_space<vmem>>, vector<1x128xf32>
    %c0_28 = arith.constant 0 : index
    %c0_29 = arith.constant 0 : index
    %38 = vector.load %arg7[%c0_28, %c0_29] : memref<1x128xf32, #tpu.memory_space<vmem>>, vector<1x128xf32>
    %c0_30 = arith.constant 0 : index
    %c0_31 = arith.constant 0 : index
    %c0_32 = arith.constant 0 : index
    %39 = vector.load %arg10[%c0_30, %c0_31, %c0_32] : memref<18x18x128xbf16, #tpu.memory_space<vmem>>, vector<18x18x128xbf16>
    %40 = vector.extract_strided_slice %39 {offsets = [0, 0, 0], sizes = [16, 16, 128], strides = [1, 1, 1]} : vector<18x18x128xbf16> to vector<16x16x128xbf16>
    %41 = vector.extract_strided_slice %39 {offsets = [0, 1, 0], sizes = [16, 16, 128], strides = [1, 1, 1]} : vector<18x18x128xbf16> to vector<16x16x128xbf16>
    %42 = vector.extract_strided_slice %39 {offsets = [0, 2, 0], sizes = [16, 16, 128], strides = [1, 1, 1]} : vector<18x18x128xbf16> to vector<16x16x128xbf16>
    %43 = vector.extract_strided_slice %39 {offsets = [1, 0, 0], sizes = [16, 16, 128], strides = [1, 1, 1]} : vector<18x18x128xbf16> to vector<16x16x128xbf16>
    %44 = vector.extract_strided_slice %39 {offsets = [1, 1, 0], sizes = [16, 16, 128], strides = [1, 1, 1]} : vector<18x18x128xbf16> to vector<16x16x128xbf16>
    %45 = vector.extract_strided_slice %39 {offsets = [1, 2, 0], sizes = [16, 16, 128], strides = [1, 1, 1]} : vector<18x18x128xbf16> to vector<16x16x128xbf16>
    %46 = vector.extract_strided_slice %39 {offsets = [2, 0, 0], sizes = [16, 16, 128], strides = [1, 1, 1]} : vector<18x18x128xbf16> to vector<16x16x128xbf16>
    %47 = vector.extract_strided_slice %39 {offsets = [2, 1, 0], sizes = [16, 16, 128], strides = [1, 1, 1]} : vector<18x18x128xbf16> to vector<16x16x128xbf16>
    %48 = vector.extract_strided_slice %39 {offsets = [2, 2, 0], sizes = [16, 16, 128], strides = [1, 1, 1]} : vector<18x18x128xbf16> to vector<16x16x128xbf16>
    %49 = tpu.concatenate %40, %41, %42, %43, %44, %45, %46, %47, %48 in 2 : vector<16x16x128xbf16>, vector<16x16x128xbf16>, vector<16x16x128xbf16>, vector<16x16x128xbf16>, vector<16x16x128xbf16>, vector<16x16x128xbf16>, vector<16x16x128xbf16>, vector<16x16x128xbf16>, vector<16x16x128xbf16> -> vector<16x16x1152xbf16>
    %50 = vector.shape_cast %49 : vector<16x16x1152xbf16> to vector<256x1152xbf16>
    %c0_33 = arith.constant 0 : index
    %c0_34 = arith.constant 0 : index
    %51 = vector.load %arg5[%c0_33, %c0_34] : memref<1152x128xbf16, #tpu.memory_space<vmem>>, vector<1152x128xbf16>
    %cst_35 = arith.constant dense<0.000000e+00> : vector<256x128xf32>
    %52 = tpu.matmul %50, %51, %cst_35 {dimension_numbers = #tpu.dot_dimension_numbers<[1], [0], [0], [1], [0, 0, 1, 1], [], []>} : vector<256x1152xbf16>, vector<1152x128xbf16>, vector<256x128xf32> -> vector<256x128xf32>
    %53 = vector.broadcast %37 : vector<1x128xf32> to vector<256x128xf32>
    %54 = arith.mulf %52, %53 : vector<256x128xf32>
    %55 = vector.broadcast %38 : vector<1x128xf32> to vector<256x128xf32>
    %56 = arith.addf %54, %55 : vector<256x128xf32>
    %57 = arith.negf %56 : vector<256x128xf32>
    %58 = math.exp %57 : vector<256x128xf32>
    %cst_36 = arith.constant 1.000000e+00 : f32
    %59 = vector.broadcast %cst_36 : f32 to vector<256x128xf32>
    %60 = arith.addf %59, %58 : vector<256x128xf32>
    %61 = arith.divf %59, %60 : vector<256x128xf32>
    %62 = arith.mulf %56, %61 : vector<256x128xf32>
    %c0_37 = arith.constant 0 : index
    %c0_38 = arith.constant 0 : index
    %c0_39 = arith.constant 0 : index
    %c0_40 = arith.constant 0 : index
    %63 = vector.load %arg1[%c0_37, %c0_38, %c0_39, %c0_40] : memref<1x16x16x128xf32, #tpu.memory_space<vmem>>, vector<1x16x16x128xf32>
    %64 = vector.shape_cast %63 : vector<1x16x16x128xf32> to vector<16x16x128xf32>
    %65 = vector.shape_cast %64 : vector<16x16x128xf32> to vector<256x128xf32>
    %66 = arith.addf %62, %65 : vector<256x128xf32>
    %67 = vector.shape_cast %66 : vector<256x128xf32> to vector<16x16x128xf32>
    %c0_41 = arith.constant 0 : index
    %c0_42 = arith.constant 0 : index
    %c0_43 = arith.constant 0 : index
    %c0_44 = arith.constant 0 : index
    %68 = vector.load %arg8[%c0_41, %c0_42, %c0_43, %c0_44] : memref<1x16x16x128xf32, #tpu.memory_space<vmem>>, vector<1x16x16x128xf32>
    %69 = vector.shape_cast %68 : vector<1x16x16x128xf32> to vector<16x16x128xf32>
    %70 = vector.shape_cast %67 : vector<16x16x128xf32> to vector<1x16x16x128xf32>
    tpu.vector_store %arg8[%c0_41, %c0_42, %c0_43, %c0_44], %70 {strides = array<i32>} : memref<1x16x16x128xf32, #tpu.memory_space<vmem>>, vector<1x16x16x128xf32>,
    return
  }
  func.func @transform_0(%arg0: i32) -> (i32, i32, i32, i32) {
    %c0_i32 = arith.constant 0 : i32
    %c0_i32_0 = arith.constant 0 : i32
    %c0_i32_1 = arith.constant 0 : i32
    %c0_i32_2 = arith.constant 0 : i32
    return %arg0, %c0_i32, %c0_i32_0, %c0_i32_1 : i32, i32, i32, i32
  }
  func.func @transform_1(%arg0: i32) -> (i32, i32) {
    %c0_i32 = arith.constant 0 : i32
    %c0_i32_0 = arith.constant 0 : i32
    %c0_i32_1 = arith.constant 0 : i32
    return %c0_i32, %c0_i32_0 : i32, i32
  }
  func.func @transform_2(%arg0: i32) -> (i32, i32) {
    %c0_i32 = arith.constant 0 : i32
    %c0_i32_0 = arith.constant 0 : i32
    %c0_i32_1 = arith.constant 0 : i32
    return %c0_i32, %c0_i32_0 : i32, i32
  }
  func.func @transform_3(%arg0: i32) -> (i32, i32) {
    %c0_i32 = arith.constant 0 : i32
    %c0_i32_0 = arith.constant 0 : i32
    %c0_i32_1 = arith.constant 0 : i32
    return %c0_i32, %c0_i32_0 : i32, i32
  }
  func.func @transform_4(%arg0: i32) -> (i32, i32) {
    %c0_i32 = arith.constant 0 : i32
    %c0_i32_0 = arith.constant 0 : i32
    %c0_i32_1 = arith.constant 0 : i32
    return %c0_i32, %c0_i32_0 : i32, i32
  }
  func.func @transform_5(%arg0: i32) -> (i32, i32) {
    %c0_i32 = arith.constant 0 : i32
    %c0_i32_0 = arith.constant 0 : i32
    %c0_i32_1 = arith.constant 0 : i32
    return %c0_i32, %c0_i32_0 : i32, i32
  }
  func.func @transform_6(%arg0: i32) -> (i32, i32) {
    %c0_i32 = arith.constant 0 : i32
    %c0_i32_0 = arith.constant 0 : i32
    %c0_i32_1 = arith.constant 0 : i32
    return %c0_i32, %c0_i32_0 : i32, i32
  }
  func.func @transform_7(%arg0: i32) -> (i32, i32, i32, i32) {
    %c0_i32 = arith.constant 0 : i32
    %c0_i32_0 = arith.constant 0 : i32
    %c0_i32_1 = arith.constant 0 : i32
    %c0_i32_2 = arith.constant 0 : i32
    return %arg0, %c0_i32, %c0_i32_0, %c0_i32_1 : i32, i32, i32, i32
  }
}

</mosaic_0001>

<bundles_post_ra>
// kernel: tpu_custom_call.1
= control target key start
LH: loop header
LB: loop body
LE: loop exit
PB: predicated region body
PF: predicated region fallthrough
CT: control target
= control target key end

     0   :  { %12 = vsyncpa [#allocation5], 0  ;;  %s10731_s0 = inlined_call_operand.hbm [shape: f32[2,16,16,128], index: 0, kind: input, shape index: {}]   ;;  %s10732_s1 = inlined_call_operand.hbm [shape: bf16[1152,128], index: 1, kind: input, shape index: {}]   ;;  %s10733_s2 = inlined_call_operand.vmem [shape: f32[1,128], index: 2, kind: input, shape index: {}]   ;;  %s10734_s3 = inlined_call_operand.vmem [shape: f32[1,128], index: 3, kind: input, shape index: {}]   ;;  %s10735_s4 = inlined_call_operand.hbm [shape: bf16[1152,128], index: 4, kind: input, shape index: {}]   ;;  %s10736_s5 = inlined_call_operand.vmem [shape: f32[1,128], index: 5, kind: input, shape index: {}]   ;;  %s10737_s6 = inlined_call_operand.vmem [shape: f32[1,128], index: 6, kind: input, shape index: {}]   ;;  %s10738_s7 = inlined_call_operand.hbm [shape: f32[2,16,16,128], index: 7, kind: output, shape index: {}]  }
   0x1   :  { %14 = vsyncpa [#allocation5 + $0x1], 0 }
   0x2   :  { %15 = vsyncpa [#allocation8], 0 }
   0x3   :  { %16 = vsyncpa [#allocation6], 0 }
   0x4   :  { %18 = vsyncpa [#allocation6 + $0x1], 0  ;;  %s8386_s24 = smov 0   ;;  %s8388_s25 = smov 0  }
   0x5   :  { %s8390_s26 = smov 0   ;;  %s8392_s27 = smov 0  }
   0x6 LB: > { %s8407_s28 = sadd.s32 4294967295, %s8333_s27   ;;  %s6147_s29 = sadd.s32 4294967294, %s8333_s27   ;;  %s8333_s27 = sphi %s8392_s27, %s10777_s27   ;;  %s8329_s26 = sphi %s8390_s26, %s10776_s26   ;;  %s8325_s25 = sphi %s8388_s25, %s10775_s25   ;;  %s8321_s24 = sphi %s8386_s24, %s10774_s24  }
   0x7   : > { %p44_p0 = scmp.ne.s32.totalorder %s8325_s25, %s8321_s24  ;;  %p10739_p1 = scmp.eq.s32.totalorder %s8407_s28, 0 }
   0x8   : > { %p200_p3 = scmp.eq.s32.totalorder %s6147_s29, 1  ;;  %p6148_p5 = scmp.ge.s32.totalorder %s8333_s27, 1 }
   0x9   : > { %p8416_p4 = por %p10739_p1, %p44_p0  ;;  %p207_p7 = scmp.lt.s32.totalorder %s8333_s27, 3 }
   0xa   : > { %p8421_p6 = por %p200_p3, %p44_p0  ;;  %s8335_s10 = smov [#allocation7]  }
   0xb   : > { %s10743_s30 = scalar_select %p8416_p4, 1, 0 }
   0xc   : > { %s10744_s8 = scalar_select %p8421_p6, 1, 0 }
   0xd   : > { %p8426_p8 = pnand %p6148_p5, %p207_p7  ;;  %s219_s11 = sshll.u32 %s8335_s10, 4  ;;  %s8430_s11 = int_to_ptr.vmem [resolvable:$true] %s219_s11 }
   0xe   : > { %s8336_s13 = smov [#allocation9]   ;;  %s8177_s17 = scalar_lea.hbm %s10732_s1, 9216 }
   0xf   : > { %p7631_p9 = pneg %p8426_p8  ;;  %s238_s14 = sshll.u32 %s8336_s13, 4  ;;  %s8441_s14 = int_to_ptr.vmem [resolvable:$true] %s238_s14 }
  0x10   : > { %p8178_p12 = scmp.ne.s32.totalorder %s10732_s1, %s8177_s17  ;;  %p8184_p5 = scmp.lt.u32.totalorder %s8177_s17, %s10732_s1 }
  0x11   : > { %p8437_p11 = pnand %p7631_p9, %p10739_p1 }
  0x13   : > { %p8179_p13 = pneg %p8437_p11 }
  0x15   : > { %p8180_p0 = pnand %p8179_p13, %p8178_p12 }
  0x17   : > { %p8181_p3 = pneg %p8180_p0 }
  0x19   : > { %p8186_p7 = pnand %p8184_p5, %p8181_p3 }
  0x1b   : > { %8189 = shalt.err (!%p8186_p7)
}
  0x1c   : > { %s8190_s22 = scalar_lea.vmem %s8430_s11, 9216  ;;  %p8198_p2 = scmp.lt.s32.totalorder %s8430_s11, %s8430_s11 }
  0x1d   : > { %p8191_p9 = scmp.ne.s32.totalorder %s8430_s11, %s8190_s22  ;;  %p8199_p12 = scmp.lt.s32.totalorder %s8190_s22, %s8190_s22 }
  0x1f   : > { %p8193_p10 = pnand %p8191_p9, %p8179_p13  ;;  %p8200_p0 = por %p8199_p12, %p8198_p2 }
  0x21   : > { %p8194_p1 = pneg %p8193_p10 }
  0x23   : > { %p8201_p6 = pnand %p8200_p0, %p8194_p1 }
  0x25   : > { %8204 = shalt.err (!%p8201_p6)
}
  0x26   : > { %s8337_s23 = smov 64   ;;  %s8338_s29 = smov 4  }
  0x27   : > { %7634 = dma.hbm_to_vmem [thread:$0]  (!%p8437_p11), %s10732_s1, 9216, %s8430_s11, [#allocation8], %s8337_s23, %s8337_s23, %s8338_s29  }
  0x28   : > { %s8205_s17 = scalar_lea.hbm %s10735_s4, 9216 }
  0x29   : > { %p8206_p2 = scmp.ne.s32.totalorder %s10735_s4, %s8205_s17  ;;  %p8212_p10 = scmp.lt.u32.totalorder %s8205_s17, %s10735_s4 }
  0x2b   : > { %p8208_p1 = pnand %p8206_p2, %p8179_p13 }
  0x2d   : > { %p8209_p6 = pneg %p8208_p1 }
  0x2f   : > { %p8214_p3 = pnand %p8212_p10, %p8209_p6 }
  0x31   : > { %8217 = shalt.err (!%p8214_p3)
}
  0x32   : > { %s8218_s11 = scalar_lea.vmem %s8441_s14, 9216  ;;  %p8226_p12 = scmp.lt.s32.totalorder %s8441_s14, %s8441_s14 }
  0x33   : > { %p8219_p5 = scmp.ne.s32.totalorder %s8441_s14, %s8218_s11  ;;  %p8227_p0 = scmp.lt.s32.totalorder %s8218_s11, %s8218_s11 }
  0x35   : > { %p8221_p7 = pnand %p8219_p5, %p8179_p13  ;;  %p8228_p2 = por %p8227_p0, %p8226_p12 }
  0x37   : > { %p8222_p9 = pneg %p8221_p7 }
  0x39   : > { %p8229_p1 = pnand %p8228_p2, %p8222_p9 }
  0x3b   : > { %8232 = shalt.err (!%p8229_p1)
}
  0x3c   : > { %7637 = dma.hbm_to_vmem [thread:$0]  (!%p8437_p11), %s10735_s4, 9216, %s8441_s14, [#allocation8], %s8337_s23, %s8337_s23, %s8338_s29  }
  0x3d   : > { %s8496_s13 = sadd.s32 1, %s8333_s27   ;;  %s31_s12 = sadd.s32 1, %s8329_s26 }
  0x3e   : > { %s28_s15 = ssub.s32 %s8333_s27, %s8496_s13  ;;  %p38_p13 = scmp.ne.s32.totalorder %s8329_s26, %s8325_s25 }
  0x3f   : > { %p29_p6 = scmp.eq.s32.totalorder %s28_s15, 0  ;;  %p39_p10 = scmp.eq.s32.totalorder %s8333_s27, 0 }
  0x40   : > { %p10747_p3 = scmp.eq.s32.totalorder %s8407_s28, 1  ;;  %p7648_p7 = scmp.lt.s32.totalorder %s8333_s27, 2 }
  0x41   : > { %s8512_s17 = scalar_select %p29_p6, %s8329_s26, %s31_s12  }
  0x42   : > { %p8506_p5 = por %p10747_p3, %p38_p13  ;;  %p40_p9 = por %p39_p10, %p38_p13 }
  0x43   : > { %s258_s18 = sand.u32 1, %s8329_s26   ;;  %s6513_s14 = sshll.u32 %s8333_s27, 12 }
  0x44   : > { %s10748_s16 = scalar_select %p8506_p5, 1, 0 }
  0x45   : > { %s6152_s19 = sshll.u32 %s258_s18, 8  ;;  %s8519_s20 = scalar_lea.hbm %s10731_s0, %s6513_s14 }
  0x46   : > { %s262_s21 = scalar_lea.vmem [#allocation4], %s6152_s19  ;;  %p8523_p11 = pnand %p7648_p7, %p40_p9 }
  0x47   : > { %s269_s11 = sshll.u32 %s262_s21, 4  ;;  %s8527_s10 = scalar_lea.sflag [#allocation5], %s258_s18  ;;  %s8521_s11 = int_to_ptr.vmem [resolvable:$true] %s269_s11 }
  0x48   : > { %s8233_s12 = scalar_lea.hbm %s8519_s20, 4096  ;;  %p8235_p0 = pneg %p8523_p11 }
  0x49   : > { %p8234_p12 = scmp.ne.s32.totalorder %s8519_s20, %s8233_s12  ;;  %s8238_s14 = scalar_lea.hbm %s10731_s0, 8192 }
  0x4a   : > { %p8239_p13 = scmp.lt.u32.totalorder %s8519_s20, %s10731_s0  ;;  %p8240_p6 = scmp.lt.u32.totalorder %s8238_s14, %s8233_s12 }
  0x4b   : > { %p8236_p2 = pnand %p8235_p0, %p8234_p12  ;;  %p8242_p3 = scmp.lt.u32.totalorder %s8233_s12, %s8519_s20 }
  0x4c   : > { %p8241_p10 = por %p8240_p6, %p8239_p13 }
  0x4d   : > { %p8237_p1 = pneg %p8236_p2 }
  0x4e   : > { %p8243_p7 = por %p8242_p3, %p8241_p10 }
  0x50   : > { %p8244_p9 = pnand %p8243_p7, %p8237_p1 }
  0x52   : > { %8247 = shalt.err (!%p8244_p9)
}
  0x53   : > { %s8248_s18 = scalar_lea.vmem %s8521_s11, 4096  ;;  %s8339_s21 = smov [#allocation4]  }
  0x54   : > { %p8249_p12 = scmp.ne.s32.totalorder %s8521_s11, %s8248_s18  ;;  %s8253_s15 = sshll.u32 %s8339_s21, 4  ;;  %s8254_s15 = int_to_ptr.vmem [resolvable:$false] %s8253_s15 }
  0x55   : > { %s8255_s19 = scalar_lea.vmem %s8254_s15, 8192  ;;  %p8256_p4 = scmp.lt.s32.totalorder %s8521_s11, %s8254_s15 }
  0x56   : > { %p8251_p2 = pnand %p8249_p12, %p8235_p0  ;;  %p8257_p13 = scmp.lt.s32.totalorder %s8255_s19, %s8248_s18 }
  0x58   : > { %p8252_p5 = pneg %p8251_p2  ;;  %p8258_p6 = por %p8257_p13, %p8256_p4 }
  0x5a   : > { %p8259_p10 = pnand %p8258_p6, %p8252_p5 }
  0x5c   : > { %8262 = shalt.err (!%p8259_p10)
}
  0x5d   : > { %s8340_s12 = smov 128   ;;  %s8341_s14 = smov 8  }
  0x5e   : > { %7641 = dma.hbm_to_vmem [thread:$0]  (!%p8523_p11), %s8519_s20, 4096, %s8521_s11, %s8527_s10, %s8340_s12, %s8340_s12, %s8341_s14  }
  0x5f   : > { %281 = sbr.rel (%p8426_p8) target bundleno = 1339 (0x53b), region = 48 }
  0x66   : > { %s8558_s23 = sand.u32 1, %s8325_s25   ;;  %p10750_p4 = scmp.ne.s32.totalorder %s10743_s30, 0 }
  0x67   : > { %s6156_s29 = sshll.u32 %s8558_s23, 8  ;;  %s284_s18 = scalar_lea.sflag [#allocation5], %s8558_s23 }
  0x68   : > { %s8564_s21 = scalar_lea.vmem [#allocation4], %s6156_s29 }
  0x69   : > { %8308 = dma.done.wait (%p10750_p4), %s284_s18, 4096  }
  0x6a   : > { %8310 = vsyncadd (%p10750_p4), %s284_s18, 4294963200  ;;  %p10751_p5 = scmp.eq.s32.totalorder %s8407_s28, 0 }
  0x6c   : > { %8312 = dma.done.wait (%p10751_p5), [#allocation8], 18432   ;;  %p10752_p8 = pmov %p10751_p5 }
  0x6d   : > { %v8342_v0 = vmov 0   ;;  %v7693_v1 = vld [vmem:[#allocation7 + $0x40] sm:$0xff]   ;;  %v7697_v5 = vld [vmem:[#allocation7 + $0x48] sm:$0xff]   ;;  %v7701_v9 = vld [vmem:[#allocation7 + $0x50] sm:$0xff]   ;;  %vm509_vm0 = vsmask.f32 256 }
  0x6e   : > { %8314 = vsyncadd (%p10752_p8), [#allocation8], 4294948864  ;;  %327 = vst [vmem:[#allocation2] sm:$0xf] %v8342_v0  ;;  %v7694_v2 = vld [vmem:[#allocation7 + $0xc0] sm:$0xff]   ;;  %6579 = vmatprep.subr.bf16.mxu0 %v7693_v1  ;;  %v7698_v6 = vld [vmem:[#allocation7 + $0xc8] sm:$0xff]  }
  0x6f   : > { %328 = vst [vmem:[#allocation2 + $0x4] sm:$0xf] %v8342_v0  ;;  %329 = vst [vmem:[#allocation2 + $0x8] sm:$0x1] %v8342_v0  ;;  %v7695_v3 = vld [vmem:[#allocation7] sm:$0xff]   ;;  %6691 = vmatprep.subr.bf16.mxu1 %v7694_v2  ;;  %v7699_v7 = vld [vmem:[#allocation7 + $0x8] sm:$0xff]  }
  0x70   : > { %330 = vst [vmem:[#allocation2 + $0xc] sm:$0xf] %v8342_v0  ;;  %331 = vst [vmem:[#allocation2 + $0x10] sm:$0xf] %v8342_v0  ;;  %v7696_v4 = vld [vmem:[#allocation7 + $0x80] sm:$0xff]   ;;  %6580 = vmatpush3.bf16.msra.mxu0 %v7695_v3  ;;  %v7700_v8 = vld [vmem:[#allocation7 + $0x88] sm:$0xff]  }
  0x71   : > { %332 = vst [vmem:[#allocation2 + $0x14] sm:$0x1] %v8342_v0  ;;  %333 = vst [vmem:[#allocation2 + $0x18] sm:$0xf] %v8342_v0  ;;  %6692 = vmatpush3.bf16.msra.mxu1 %v7696_v4  ;;  %6581 = vmatprep.subr.bf16.mxu0 %v7697_v5  ;;  %v7702_v10 = vld [vmem:[#allocation7 + $0xd0] sm:$0xff]   ;;  %v7705_v13 = vld [vmem:[#allocation7 + $0x58] sm:$0xff]  }
  0x72   : > { %334 = vst [vmem:[#allocation2 + $0x1c] sm:$0xf] %v8342_v0  ;;  %335 = vst [vmem:[#allocation2 + $0x20] sm:$0x1] %v8342_v0  ;;  %6693 = vmatprep.subr.bf16.mxu1 %v7698_v6  ;;  %v7703_v11 = vld [vmem:[#allocation7 + $0x10] sm:$0xff]   ;;  %v7706_v14 = vld [vmem:[#allocation7 + $0xd8] sm:$0xff]  }
  0x73   : > { %336 = vst [vmem:[#allocation2 + $0x24] sm:$0xf] %v8342_v0  ;;  %337 = vst [vmem:[#allocation2 + $0x28] sm:$0xf] %v8342_v0  ;;  %v7704_v12 = vld [vmem:[#allocation7 + $0x90] sm:$0xff]   ;;  %v7707_v15 = vld [vmem:[#allocation7 + $0x18] sm:$0xff]  }
  0x74   : > { %338 = vst [vmem:[#allocation2 + $0x2c] sm:$0x1] %v8342_v0  ;;  %339 = vst [vmem:[#allocation2 + $0x30] sm:$0xf] %v8342_v0  ;;  %6582 = vmatpush3.bf16.msra.mxu0 %v7699_v7  ;;  %v7708_v16 = vld [vmem:[#allocation7 + $0x98] sm:$0xff]   ;;  %v7709_v17 = vld [vmem:[#allocation7 + $0x60] sm:$0xff]  }
  0x75   : > { %340 = vst [vmem:[#allocation2 + $0x34] sm:$0xf] %v8342_v0  ;;  %341 = vst [vmem:[#allocation2 + $0x38] sm:$0x1] %v8342_v0  ;;  %6694 = vmatpush3.bf16.msra.mxu1 %v7700_v8  ;;  %6583 = vmatprep.subr.bf16.mxu0 %v7701_v9  ;;  %v7710_v18 = vld [vmem:[#allocation7 + $0xe0] sm:$0xff]   ;;  %v7713_v21 = vld [vmem:[#allocation7 + $0x68] sm:$0xff]  }
  0x76   : > { %342 = vst [vmem:[#allocation2 + $0x3c] sm:$0xf] %v8342_v0  ;;  %343 = vst [vmem:[#allocation2 + $0x40] sm:$0xf] %v8342_v0  ;;  %6695 = vmatprep.subr.bf16.mxu1 %v7702_v10  ;;  %v7711_v19 = vld [vmem:[#allocation7 + $0x20] sm:$0xff]   ;;  %v7714_v22 = vld [vmem:[#allocation7 + $0xe8] sm:$0xff]  }
  0x77   : > { %344 = vst [vmem:[#allocation2 + $0x44] sm:$0x1] %v8342_v0  ;;  %345 = vst [vmem:[#allocation2 + $0x48] sm:$0xf] %v8342_v0  ;;  %v7712_v20 = vld [vmem:[#allocation7 + $0xa0] sm:$0xff]   ;;  %v7715_v23 = vld [vmem:[#allocation7 + $0x28] sm:$0xff]  }
  0x78   : > { %346 = vst [vmem:[#allocation2 + $0x4c] sm:$0xf] %v8342_v0  ;;  %347 = vst [vmem:[#allocation2 + $0x50] sm:$0x1] %v8342_v0  ;;  %6584 = vmatpush3.bf16.msra.mxu0 %v7703_v11  ;;  %v7716_v24 = vld [vmem:[#allocation7 + $0xa8] sm:$0xff]   ;;  %v7717_v25 = vld [vmem:[#allocation7 + $0x70] sm:$0xff]  }
  0x79   : > { %348 = vst [vmem:[#allocation2 + $0x54] sm:$0xf] %v8342_v0  ;;  %349 = vst [vmem:[#allocation2 + $0x58] sm:$0xf] %v8342_v0  ;;  %6696 = vmatpush3.bf16.msra.mxu1 %v7704_v12  ;;  %6585 = vmatprep.subr.bf16.mxu0 %v7705_v13  ;;  %v7718_v26 = vld [vmem:[#allocation7 + $0xf0] sm:$0xff]   ;;  %v7721_v29 = vld [vmem:[#allocation7 + $0x78] sm:$0xff]  }
  0x7a   : > { %350 = vst [vmem:[#allocation2 + $0x5c] sm:$0x1] %v8342_v0  ;;  %351 = vst [vmem:[#allocation2 + $0x60] sm:$0xf] %v8342_v0  ;;  %6697 = vmatprep.subr.bf16.mxu1 %v7706_v14  ;;  %vm510_vm1 = vsmask.f32 4368 }
  0x7b   : > { %352 = vst [vmem:[#allocation2 + $0x64] sm:$0xf] %v8342_v0  ;;  %353 = vst [vmem:[#allocation2 + $0x68] sm:$0x1] %v8342_v0  ;;  %v7719_v27 = vld [vmem:[#allocation7 + $0x30] sm:$0xff]   ;;  %v7722_v30 = vld [vmem:[#allocation7 + $0xf8] sm:$0xff]  }
  0x7c   : > { %354 = vst [vmem:[#allocation2 + $0x6c] sm:$0xf] %v8342_v0  ;;  %355 = vst [vmem:[#allocation2 + $0x70] sm:$0xf] %v8342_v0  ;;  %6586 = vmatpush3.bf16.msra.mxu0 %v7707_v15  ;;  %v7720_v28 = vld [vmem:[#allocation7 + $0xb0] sm:$0xff]   ;;  %v7723_v31 = vld [vmem:[#allocation7 + $0x38] sm:$0xff]  }
  0x7d   : > { %356 = vst [vmem:[#allocation2 + $0x74] sm:$0x1] %v8342_v0  ;;  %357 = vst [vmem:[#allocation2 + $0x78] sm:$0xf] %v8342_v0  ;;  %6698 = vmatpush3.bf16.msra.mxu1 %v7708_v16  ;;  %6587 = vmatprep.subr.bf16.mxu0 %v7709_v17  ;;  %v7724_v32 = vld [vmem:[#allocation7 + $0xb8] sm:$0xff]   ;;  %v8682_v33 = vld [vmem:[#allocation2] sm:$0xff]  }
  0x7e   : > { %358 = vst [vmem:[#allocation2 + $0x7c] sm:$0xf] %v8342_v0  ;;  %359 = vst [vmem:[#allocation2 + $0x80] sm:$0x1] %v8342_v0  ;;  %6699 = vmatprep.subr.bf16.mxu1 %v7710_v18  ;;  %v381_v35 = vld [vmem:[%s8564_s21] sm:$0xff]  ;;  %vm833_vm2 = vcmask 1043456  }
  0x7f   : > { %360 = vst [vmem:[#allocation2 + $0x84] sm:$0xf] %v8342_v0  ;;  %361 = vst [vmem:[#allocation2 + $0x88] sm:$0xf] %v8342_v0  ;;  %v382_v36 = vld [vmem:[%s8564_s21 + $0x8] sm:$0xff]  ;;  %v6514_v37 = vpack.c.bf16 %v381_v35, %v381_v35  ;;  %vm840_vm4 = vcmask 1040384  }
  0x80   : > { %362 = vst [vmem:[#allocation2 + $0x8c] sm:$0x1] %v8342_v0  ;;  %363 = vst [vmem:[#allocation2 + $0x90] sm:$0xf] %v8342_v0  ;;  %6588 = vmatpush3.bf16.msra.mxu0 %v7711_v19  ;;  %vm834_vm3 = vsmask.f32 7938  ;;  %v6515_v41 = vpack.c.bf16 %v382_v36, %v382_v36 }
  0x81   : > { %364 = vst [vmem:[#allocation2 + $0x94] sm:$0xf] %v8342_v0  ;;  %365 = vst [vmem:[#allocation2 + $0x98] sm:$0x1] %v8342_v0  ;;  %6700 = vmatpush3.bf16.msra.mxu1 %v7712_v20  ;;  %6589 = vmatprep.subr.bf16.mxu0 %v7713_v21  ;;  %v1206_v38 = vshrl.u32 %v8682_v33, 16  ;;  %v1208_v39 = vshll.u32 %v8682_v33, 16 }
  0x82   : > { %366 = vst [vmem:[#allocation2 + $0x9c] sm:$0xf] %v8342_v0  ;;  %367 = vst [vmem:[#allocation2 + $0xa0] sm:$0xf] %v8342_v0  ;;  %6701 = vmatprep.subr.bf16.mxu1 %v7714_v22  ;;  %v7728_v42 = vld [vmem:[#allocation7 + $0x140] sm:$0xff]   ;;  %v513_v44 = vshrl.u32 %v6514_v37, 16 }
  0x83   : > { %368 = vst [vmem:[#allocation2 + $0xa4] sm:$0x1] %v8342_v0  ;;  %369 = vst [vmem:[#allocation2 + $0xa8] sm:$0xf] %v8342_v0  ;;  %v516_v45 = vshll.u32 %v6514_v37, 16  ;;  %v1210_v46 = vrot.slane %v1208_v39, 1 }
  0x84   : > { %370 = vst [vmem:[#allocation2 + $0xac] sm:$0xf] %v8342_v0  ;;  %371 = vst [vmem:[#allocation2 + $0xb0] sm:$0x1] %v8342_v0  ;;  %6590 = vmatpush3.bf16.msra.mxu0 %v7715_v23  ;;  %v521_v48 = vshrl.u32 %v6515_v41, 16  ;;  %v524_v49 = vshll.u32 %v6515_v41, 16 }
  0x85   : > { %372 = vst [vmem:[#allocation2 + $0xb4] sm:$0xf] %v8342_v0  ;;  %373 = vst [vmem:[#allocation2 + $0xb8] sm:$0xf] %v8342_v0  ;;  %6702 = vmatpush3.bf16.msra.mxu1 %v7716_v24  ;;  %6591 = vmatprep.subr.bf16.mxu0 %v7717_v25  ;;  %vm1204_vm7 = vsmask.f32 7424  ;;  %v1211_v54 = vor.u32 %v1210_v46, %v1206_v38 }
  0x86   : > { %374 = vst [vmem:[#allocation2 + $0xbc] sm:$0x1] %v8342_v0  ;;  %375 = vst [vmem:[#allocation2 + $0xc0] sm:$0xf] %v8342_v0  ;;  %6703 = vmatprep.subr.bf16.mxu1 %v7718_v26  ;;  %v515_v51 = vrot.slane %v513_v44, 7  ;;  %v383_v53 = vld [vmem:[%s8564_s21 + $0x10] sm:$0xff] }
  0x87   : > { %376 = vst [vmem:[#allocation2 + $0xc4] sm:$0xf] %v8342_v0  ;;  %377 = vst [vmem:[#allocation2 + $0xc8] sm:$0x1] %v8342_v0  ;;  %v523_v55 = vrot.slane %v521_v48, 7  ;;  %v7729_v57 = vld [vmem:[#allocation7 + $0x100] sm:$0xff]   ;;  %v6516_v59 = vpack.c.bf16 %v383_v53, %v383_v53 }
  0x88   : > { %378 = vst [vmem:[#allocation2 + $0xcc] sm:$0xf] %v8342_v0  ;;  %379 = vst [vmem:[#allocation2 + $0xd0] sm:$0xf] %v8342_v0  ;;  %6592 = vmatpush3.bf16.msra.mxu0 %v7719_v27  ;;  %v836_v56 = vld [vmem:[#allocation2 + $0xc] sm:$0xf]  ;;  %v518_v60 = vor.u32 %v516_v45, %v515_v51 }
  0x89   : > { %380 = vst [vmem:[#allocation2 + $0xd4] sm:$0x1] %v8342_v0  ;;  %950 = vst [vmem:[#allocation3] sm:$0xf] %v8342_v0  ;;  %6704 = vmatpush3.bf16.msra.mxu1 %v7720_v28  ;;  %6593 = vmatprep.subr.bf16.mxu0 %v7721_v29  ;;  %v384_v58 = vld [vmem:[%s8564_s21 + $0x18] sm:$0xff]  ;;  %v519_v61 = vrot.slane %v515_v51, 4  ;;  %v526_v3 = vor.u32 %v524_v49, %v523_v55 }
  0x8a   : > { %951 = vst [vmem:[#allocation3 + $0x4] sm:$0xf] %v8342_v0  ;;  %952 = vst [vmem:[#allocation3 + $0x8] sm:$0x1] %v8342_v0  ;;  %6705 = vmatprep.subr.bf16.mxu1 %v7722_v30  ;;  %vm1413_vm9 = vcmask 1046528   ;;  %v6517_v63 = vpack.c.bf16 %v384_v58, %v384_v58  ;;  %v386_v1 = vld [vmem:[%s8564_s21 + $0x28] sm:$0xff] }
  0x8b   : > { %953 = vst [vmem:[#allocation3 + $0xc] sm:$0xf] %v8342_v0  ;;  %954 = vst [vmem:[#allocation3 + $0x10] sm:$0xf] %v8342_v0  ;;  %v842_v62 = vld [vmem:[#allocation2 + $0x14] sm:$0x1]  ;;  %v6519_v19 = vpack.c.bf16 %v386_v1, %v386_v1 }
  0x8c   : > { %955 = vst [vmem:[#allocation3 + $0x14] sm:$0x1] %v8342_v0  ;;  %956 = vst [vmem:[#allocation3 + $0x18] sm:$0xf] %v8342_v0  ;;  %6594 = vmatpush3.bf16.msra.mxu0 %v7723_v31  ;;  %v528_v4 = vrot.slane %v523_v55, 4  ;;  %v530_v5 = vshrl.u32 %v6516_v59, 16 }
  0x8d   : > { %957 = vst [vmem:[#allocation3 + $0x1c] sm:$0xf] %v8342_v0  ;;  %958 = vst [vmem:[#allocation3 + $0x20] sm:$0x1] %v8342_v0  ;;  %6706 = vmatpush3.bf16.msra.mxu1 %v7724_v32  ;;  %6803 = vmatprep.subr.bf16.mxu0 %v7728_v42  ;;  %v533_v7 = vshll.u32 %v6516_v59, 16  ;;  %v538_v8 = vshrl.u32 %v6517_v63, 16 }
  0x8e   : > { %959 = vst [vmem:[#allocation3 + $0x24] sm:$0xf] %v8342_v0  ;;  %960 = vst [vmem:[#allocation3 + $0x28] sm:$0xf] %v8342_v0  ;;  %v541_v9 = vshll.u32 %v6517_v63, 16  ;;  %v7734_v10 = vld [vmem:[#allocation7 + $0x148] sm:$0xff]  }
  0x8f   : > { %961 = vst [vmem:[#allocation3 + $0x2c] sm:$0x1] %v8342_v0  ;;  %962 = vst [vmem:[#allocation3 + $0x30] sm:$0xf] %v8342_v0  ;;  %v532_v13 = vrot.slane %v530_v5, 7  ;;  %v1414_v16 = vrot.slane %v8682_v33, 1 }
  0x90   : > { %963 = vst [vmem:[#allocation3 + $0x34] sm:$0xf] %v8342_v0  ;;  %964 = vst [vmem:[#allocation3 + $0x38] sm:$0x1] %v8342_v0  ;;  %v845_v14 = vld [vmem:[#allocation2 + $0x18] sm:$0xf] }
  0x91   : > { %965 = vst [vmem:[#allocation3 + $0x3c] sm:$0xf] %v8342_v0  ;;  %966 = vst [vmem:[#allocation3 + $0x40] sm:$0xf] %v8342_v0  ;;  %v540_v18 = vrot.slane %v538_v8, 7  ;;  %v7735_v20 = vld [vmem:[#allocation7 + $0x108] sm:$0xff]   ;;  %v535_v23 = vor.u32 %v533_v7, %v532_v13 }
  0x92   : > { %967 = vst [vmem:[#allocation3 + $0x44] sm:$0x1] %v8342_v0  ;;  %968 = vst [vmem:[#allocation3 + $0x48] sm:$0xf] %v8342_v0  ;;  %v387_v21 = vld [vmem:[%s8564_s21 + $0x30] sm:$0xff]  ;;  %v388_v22 = vld [vmem:[%s8564_s21 + $0x38] sm:$0xff] }
  0x93   : > { %969 = vst [vmem:[#allocation3 + $0x4c] sm:$0xf] %v8342_v0  ;;  %970 = vst [vmem:[#allocation3 + $0x50] sm:$0x1] %v8342_v0  ;;  %v536_v24 = vrot.slane %v532_v13, 4  ;;  %v389_v28 = vld [vmem:[%s8564_s21 + $0x40] sm:$0xff]  ;;  %v543_v29 = vor.u32 %v541_v9, %v540_v18  ;;  %v6520_v37 = vpack.c.bf16 %v387_v21, %v387_v21  ;;  %v6521_v38 = vpack.c.bf16 %v388_v22, %v388_v22 }
  0x94   : > { %971 = vst [vmem:[#allocation3 + $0x54] sm:$0xf] %v8342_v0  ;;  %972 = vst [vmem:[#allocation3 + $0x58] sm:$0xf] %v8342_v0  ;;  %v849_v25 = vld [vmem:[#allocation2 + $0x20] sm:$0x1]  ;;  %v8732_v44 = vpack.c.bf16 %v389_v28, %v389_v28 }
  0x95   : > { %973 = vst [vmem:[#allocation3 + $0x5c] sm:$0x1] %v8342_v0  ;;  %974 = vst [vmem:[#allocation3 + $0x60] sm:$0xf] %v8342_v0  ;;  %v545_v30 = vrot.slane %v540_v18, 4  ;;  %v555_v31 = vshrl.u32 %v6519_v19, 16 }
  0x96   : > { %975 = vst [vmem:[#allocation3 + $0x64] sm:$0xf] %v8342_v0  ;;  %976 = vst [vmem:[#allocation3 + $0x68] sm:$0x1] %v8342_v0  ;;  %v558_v32 = vshll.u32 %v6519_v19, 16  ;;  %v7740_v39 = vld [vmem:[#allocation7 + $0x150] sm:$0xff]  }
  0x97   : > { %977 = vst [vmem:[#allocation3 + $0x6c] sm:$0xf] %v8342_v0  ;;  %978 = vst [vmem:[#allocation3 + $0x70] sm:$0xf] %v8342_v0  ;;  %v557_v42 = vrot.slane %v555_v31, 7  ;;  %v7741_v45 = vld [vmem:[#allocation7 + $0x110] sm:$0xff]  }
  0x98   : > { %979 = vst [vmem:[#allocation3 + $0x74] sm:$0x1] %v8342_v0  ;;  %980 = vst [vmem:[#allocation3 + $0x78] sm:$0xf] %v8342_v0  ;;  %v856_v48 = vld [vmem:[#allocation2 + $0x2c] sm:$0x1] }
  0x99   : > { %981 = vst [vmem:[#allocation3 + $0x7c] sm:$0xf] %v8342_v0  ;;  %982 = vst [vmem:[#allocation3 + $0x80] sm:$0x1] %v8342_v0  ;;  %v564_v49 = vshrl.u32 %v6520_v37, 16  ;;  %v567_v51 = vshll.u32 %v6520_v37, 16  ;;  %v560_v53 = vor.u32 %v558_v32, %v557_v42 }
  0x9a   : > { %983 = vst [vmem:[#allocation3 + $0x84] sm:$0xf] %v8342_v0  ;;  %984 = vst [vmem:[#allocation3 + $0x88] sm:$0xf] %v8342_v0  ;;  %v572_v55 = vshrl.u32 %v6521_v38, 16  ;;  %v7746_v13 = vld [vmem:[#allocation7 + $0x158] sm:$0xff]  }
  0x9b   : > { %985 = vst [vmem:[#allocation3 + $0x8c] sm:$0x1] %v8342_v0  ;;  %986 = vst [vmem:[#allocation3 + $0x90] sm:$0xf] %v8342_v0  ;;  %v391_v18 = vld [vmem:[%s8564_s21 + $0x50] sm:$0xff]  ;;  %v7747_v19 = vld [vmem:[#allocation7 + $0x118] sm:$0xff]  }
  0x9c   : > { %987 = vst [vmem:[#allocation3 + $0x94] sm:$0xf] %v8342_v0  ;;  %988 = vst [vmem:[#allocation3 + $0x98] sm:$0x1] %v8342_v0  ;;  %s10498_s9 = scalar_lea.vmem [#allocation10], %s6156_s29  ;;  %s6578_s29 = sshll.u32 %s8407_s28, 12 }
  0x9d   : > { %989 = vst [vmem:[#allocation3 + $0x9c] sm:$0xf] %v8342_v0  ;;  %990 = vst [vmem:[#allocation3 + $0xa0] sm:$0xf] %v8342_v0  ;;  %s6055_s20 = sshll.u32 %s10498_s9, 4  ;;  %s10683_s10 = scalar_lea.hbm %s10738_s7, %s6578_s29  ;;  %s10685_s20 = int_to_ptr.vmem [resolvable:$true] %s6055_s20 }
  0x9e   : > { %991 = vst [vmem:[#allocation3 + $0xa4] sm:$0x1] %v8342_v0  ;;  %992 = vst [vmem:[#allocation3 + $0xa8] sm:$0xf] %v8342_v0  ;;  %s6042_s28 = scalar_lea.sflag [#allocation6], %s8558_s23  ;;  %s8263_s15 = scalar_lea.vmem %s10685_s20, 4096 }
  0x9f   : > { %993 = vst [vmem:[#allocation3 + $0xac] sm:$0xf] %v8342_v0  ;;  %994 = vst [vmem:[#allocation3 + $0xb0] sm:$0x1] %v8342_v0  ;;  %p8264_p11 = scmp.ne.s32.totalorder %s10685_s20, %s8263_s15  ;;  %p10771_p0 = scmp.ne.s32.totalorder %s10748_s16, 0 }
  0xa0   : > { %995 = vst [vmem:[#allocation3 + $0xb4] sm:$0xf] %v8342_v0  ;;  %996 = vst [vmem:[#allocation3 + $0xb8] sm:$0xf] %v8342_v0 }
  0xa1   : > { %997 = vst [vmem:[#allocation3 + $0xbc] sm:$0x1] %v8342_v0  ;;  %998 = vst [vmem:[#allocation3 + $0xc0] sm:$0xf] %v8342_v0  ;;  %p8265_p1 = pnand %p8264_p11, %p10771_p0 }
  0xa2   : > { %999 = vst [vmem:[#allocation3 + $0xc4] sm:$0xf] %v8342_v0  ;;  %1000 = vst [vmem:[#allocation3 + $0xc8] sm:$0x1] %v8342_v0 }
  0xa3   : > { %1001 = vst [vmem:[#allocation3 + $0xcc] sm:$0xf] %v8342_v0  ;;  %1002 = vst [vmem:[#allocation3 + $0xd0] sm:$0xf] %v8342_v0  ;;  %p8266_p3 = pneg %p8265_p1 }
  0xa4   : > { %1003 = vst [vmem:[#allocation3 + $0xd4] sm:$0x1] %v8342_v0  ;;  %v8684_v34 = vld [vmem:[#allocation2 + $0x8] ss:$0 sps:$4 sm:$0x11]   ;;  %vm8693_vm5 = vmor %vm509_vm0, %vm510_vm1  ;;  %v385_v0 = vld [vmem:[%s8564_s21 + $0x20] sm:$0xff] }
  0xa5   : > { %v1213_v40 = vshll.u32 %v8684_v34, 16  ;;  %vm8698_vm6 = vmand %vm833_vm2, %vm834_vm3  ;;  %v527_v11 = vsel %vm8693_vm5, %v519_v61, %v526_v3  ;;  %v6518_v15 = vpack.c.bf16 %v385_v0, %v385_v0  ;;  %v1415_v17 = vrot.slane %v8684_v34, 1  ;;  %v390_v34 = vld [vmem:[%s8564_s21 + $0x48] sm:$0xff] }
  0xa6   : > { %vm8704_vm8 = vmand %vm840_vm4, %vm509_vm0  ;;  %v837_v6 = vsel %vm8698_vm6, %v518_v60, %v836_v56  ;;  %839 = vst [vmem:[#allocation2 + $0x10] sm:$0xf] %v527_v11  ;;  %v846_v35 = vsel %vm8698_vm6, %v535_v23, %v845_v14  ;;  %v575_v56 = vshll.u32 %v6521_v38, 16  ;;  %v566_v61 = vrot.slane %v564_v49, 7 }
  0xa7   : > { %v1215_v47 = vrot.slane %v1213_v40, 1  ;;  %838 = vst [vmem:[#allocation2 + $0xc] sm:$0xf] %v837_v6  ;;  %v843_v12 = vsel %vm8704_vm8, %v528_v4, %v842_v62  ;;  %v547_v26 = vshrl.u32 %v6518_v15, 16  ;;  %v550_v27 = vshll.u32 %v6518_v15, 16 }
  0xa8   : > { %844 = vst [vmem:[#allocation2 + $0x14] sm:$0x1] %v843_v12  ;;  %v544_v40 = vsel %vm8693_vm5, %v536_v24, %v543_v29  ;;  %847 = vst [vmem:[#allocation2 + $0x18] sm:$0xf] %v846_v35  ;;  %v850_v41 = vsel %vm8704_vm8, %v545_v30, %v849_v25  ;;  %v1416_v59 = vsel %vm1413_vm9, %v1414_v16, %v1415_v17  ;;  %v581_v3 = vshrl.u32 %v8732_v44, 16  ;;  %v392_v29 = vld [vmem:[%s8564_s21 + $0x58] sm:$0xff] }
  0xa9   : > { %v1216_v2 = vsel %vm1204_vm7, %v1211_v54, %v1215_v47  ;;  %v549_v36 = vrot.slane %v547_v26, 7  ;;  %848 = vst [vmem:[#allocation2 + $0x1c] sm:$0xf] %v544_v40  ;;  %851 = vst [vmem:[#allocation2 + $0x20] sm:$0x1] %v850_v41  ;;  %v562_v54 = vrot.slane %v557_v42, 4  ;;  %v8739_v62 = vpack.c.bf16 %v390_v34, %v390_v34 }
  0xaa   : > { %2138 = vmatprep.mubr.bf16.mxu0 %v1216_v2  ;;  %v574_v2 = vrot.slane %v572_v55, 7  ;;  %v569_v7 = vor.u32 %v567_v51, %v566_v61  ;;  %v863_v12 = vld [vmem:[#allocation2 + $0x38] sm:$0x1]  ;;  %v8752_v17 = vrot.slane %v581_v3, 7  ;;  %v866_v34 = vld [vmem:[#allocation2 + $0x3c] sm:$0xf] }
  0xab   : > { %2139 = vmatmul.mubr.bf16.vlgmr.msra.gmra.mrb[0].mxu0 %v8682_v33  ;;  %v852_v33 = vld [vmem:[#allocation2 + $0x24] sm:$0xf]  ;;  %v552_v46 = vor.u32 %v550_v27, %v549_v36  ;;  %v553_v47 = vrot.slane %v549_v36, 4  ;;  %v857_v1 = vsel %vm8704_vm8, %v562_v54, %v856_v48  ;;  %v584_v27 = vshll.u32 %v8732_v44, 16  ;;  %v393_v35 = vld [vmem:[%s8564_s21 + $0x60] sm:$0xff]  ;;  %v394_v36 = vld [vmem:[%s8564_s21 + $0x68] sm:$0xff] }
  0xac   : > { %6804 = vmatpush3.bf16.msra.mxu0 %v7729_v57  ;;  %v859_v57 = vld [vmem:[#allocation2 + $0x30] sm:$0xf]  ;;  %858 = vst [vmem:[#allocation2 + $0x2c] sm:$0x1] %v857_v1  ;;  %v577_v11 = vor.u32 %v575_v56, %v574_v2  ;;  %v579_v16 = vrot.slane %v574_v2, 4  ;;  %v587_v28 = vrot.slane %v8752_v17, 4  ;;  %v6524_v44 = vpack.c.bf16 %v391_v18, %v391_v18 }
  0xad   : > { %6805 = vmatprep.subr.bf16.mxu0 %v7734_v10  ;;  %v853_v60 = vsel %vm8698_vm6, %v552_v46, %v852_v33  ;;  %v561_v0 = vsel %vm8693_vm5, %v553_v47, %v560_v53  ;;  %v570_v10 = vrot.slane %v566_v61, 4  ;;  %v860_v15 = vsel %vm8698_vm6, %v569_v7, %v859_v57  ;;  %v870_v57 = vld [vmem:[#allocation2 + $0x44] sm:$0x1] }
  0xae   : > { %v8734_v58 = vld [vmem:[#allocation2 + $0xc] sm:$0xff]   ;;  %854 = vst [vmem:[#allocation2 + $0x24] sm:$0xf] %v853_v60  ;;  %855 = vst [vmem:[#allocation2 + $0x28] sm:$0xf] %v561_v0  ;;  %v864_v26 = vsel %vm8704_vm8, %v579_v16, %v863_v12  ;;  %v589_v33 = vshrl.u32 %v8739_v62, 16  ;;  %v586_v40 = vor.u32 %v584_v27, %v8752_v17  ;;  %v8787_v51 = vpack.c.bf16 %v393_v35, %v393_v35 }
  0xaf   : > { %v7730_v63 = vld [vmem:[#allocation2 + $0x14] ss:$0 sps:$4 sm:$0x11]   ;;  %2299 = vmatprep.mubr.bf16.mxu1 %v8734_v58  ;;  %v1218_v4 = vshrl.u32 %v8734_v58, 16  ;;  %v1220_v5 = vshll.u32 %v8734_v58, 16  ;;  %v1417_v6 = vrot.slane %v8734_v58, 1  ;;  %v578_v23 = vsel %vm8693_vm5, %v570_v10, %v577_v11 }
  0xb0   : > { %6806 = vmatpush3.bf16.msra.mxu0 %v7735_v20  ;;  %2300 = vmatmul.mubr.bf16.vlgmr.msra.gmra.mrb[0].mxu1 %v1416_v59  ;;  %v1225_v8 = vshll.u32 %v7730_v63, 16  ;;  %v1418_v9 = vrot.slane %v7730_v63, 1  ;;  %v8755_v21 = vld [vmem:[#allocation2 + $0x18] sm:$0xff]   ;;  %861 = vst [vmem:[#allocation2 + $0x30] sm:$0xf] %v860_v15  ;;  %v591_v48 = vrot.slane %v589_v33, 7  ;;  %v867_v61 = vsel %vm8698_vm6, %v586_v40, %v866_v34 }
  0xb1   : > { %6807 = vmatprep.subr.bf16.mxu0 %v7740_v39  ;;  %v1222_v14 = vrot.slane %v1220_v5, 1  ;;  %v7732_v25 = vld [vmem:[#allocation2 + $0x20] ss:$0 sps:$4 sm:$0x11]   ;;  %862 = vst [vmem:[#allocation2 + $0x34] sm:$0xf] %v578_v23  ;;  %2307 = vmatprep.mubr.bf16.mxu1 %v8755_v21 }
  0xb2   : > { %v1227_v20 = vrot.slane %v1225_v8, 1  ;;  %v8758_v22 = vsel %vm1413_vm9, %v1417_v6, %v1418_v9  ;;  %v1230_v30 = vshrl.u32 %v8755_v21, 16  ;;  %v1232_v31 = vshll.u32 %v8755_v21, 16  ;;  %865 = vst [vmem:[#allocation2 + $0x38] sm:$0x1] %v864_v26  ;;  %v396_v63 = vld [vmem:[%s8564_s21 + $0x78] sm:$0xff] }
  0xb3   : > { %v1223_v24 = vor.u32 %v1222_v14, %v1218_v4  ;;  %v1420_v32 = vrot.slane %v8755_v21, 1  ;;  %v1237_v38 = vshll.u32 %v7732_v25, 16  ;;  %v1421_v39 = vrot.slane %v7732_v25, 1  ;;  %v8784_v47 = vld [vmem:[#allocation2 + $0x2c] ss:$0 sps:$4 sm:$0x11]  }
  0xb4   : > { %6808 = vmatpush3.bf16.msra.mxu0 %v7741_v45  ;;  %v1234_v41 = vrot.slane %v1232_v31, 1  ;;  %v8781_v45 = vpack.c.bf16 %v392_v29, %v392_v29  ;;  %v592_v49 = vshll.u32 %v8739_v62, 16  ;;  %v1249_v59 = vshll.u32 %v8784_v47, 16  ;;  %868 = vst [vmem:[#allocation2 + $0x3c] sm:$0xf] %v867_v61  ;;  %v7752_v25 = vld [vmem:[#allocation7 + $0x160] sm:$0xff]  }
  0xb5   : > { %6809 = vmatprep.subr.bf16.mxu0 %v7746_v13  ;;  %v8775_v37 = vsel %vm1204_vm7, %v1223_v24, %v1227_v20  ;;  %v8779_v42 = vld [vmem:[#allocation2 + $0x24] sm:$0xff]   ;;  %v1239_v46 = vrot.slane %v1237_v38, 1  ;;  %v8798_v62 = vpack.c.bf16 %v394_v36, %v394_v36  ;;  %v596_v3 = vrot.slane %v591_v48, 4  ;;  %v7753_v31 = vld [vmem:[#allocation7 + $0x120] sm:$0xff]  }
  0xb6   : > { %2146 = vmatprep.mubr.bf16.mxu0 %v8775_v37  ;;  %v1235_v53 = vor.u32 %v1234_v41, %v1230_v30  ;;  %v1242_v54 = vshrl.u32 %v8779_v42, 16  ;;  %v1244_v55 = vshll.u32 %v8779_v42, 16  ;;  %v1423_v56 = vrot.slane %v8779_v42, 1  ;;  %v873_v24 = vld [vmem:[#allocation2 + $0x48] sm:$0xf]  ;;  %v397_v36 = vld [vmem:[%s8564_s21 + $0x80] sm:$0xff] }
  0xb7   : > { %2147 = vmatmul.mubr.bf16.gmra.mrb[4].mxu0 %v8734_v58  ;;  %v395_v58 = vld [vmem:[%s8564_s21 + $0x70] sm:$0xff]  ;;  %v594_v60 = vor.u32 %v592_v49, %v591_v48  ;;  %v598_v4 = vshrl.u32 %v6524_v44, 16  ;;  %v8808_v5 = vsel %vm1413_vm9, %v1420_v32, %v1421_v39  ;;  %v1251_v6 = vrot.slane %v1249_v59, 1  ;;  %v877_v30 = vld [vmem:[#allocation2 + $0x50] sm:$0x1] }
  0xb8   : > { %6810 = vmatpush3.bf16.msra.mxu0 %v7747_v19  ;;  %2308 = vmatmul.mubr.bf16.gmra.mrb[4].mxu1 %v8758_v22  ;;  %v8802_v0 = vsel %vm1204_vm7, %v1235_v53, %v1239_v46  ;;  %v1246_v1 = vrot.slane %v1244_v55, 1  ;;  %v8804_v2 = vld [vmem:[#allocation2 + $0x30] sm:$0xff]   ;;  %v8814_v9 = vpack.c.bf16 %v395_v58, %v395_v58  ;;  %v1424_v11 = vrot.slane %v8784_v47, 1  ;;  %v884_v59 = vld [vmem:[#allocation2 + $0x5c] sm:$0x1] }
  0xb9   : > { %2315 = vmatprep.mubr.bf16.mxu1 %v8779_v42  ;;  %2154 = vmatprep.mubr.bf16.mxu0 %v8802_v0  ;;  %v8810_v7 = vld [vmem:[#allocation2 + $0x38] ss:$0 sps:$4 sm:$0x11]   ;;  %v595_v8 = vsel %vm8693_vm5, %v587_v28, %v594_v60  ;;  %v1254_v12 = vshrl.u32 %v8804_v2, 16  ;;  %v1256_v13 = vshll.u32 %v8804_v2, 16  ;;  %v871_v15 = vsel %vm8704_vm8, %v596_v3, %v870_v57 }
  0xba   : > { %v1247_v10 = vor.u32 %v1246_v1, %v1242_v54  ;;  %869 = vst [vmem:[#allocation2 + $0x40] sm:$0xf] %v595_v8  ;;  %v1261_v14 = vshll.u32 %v8810_v7, 16  ;;  %v600_v16 = vrot.slane %v598_v4, 7  ;;  %v8822_v17 = vpack.c.bf16 %v396_v63, %v396_v63  ;;  %872 = vst [vmem:[#allocation2 + $0x44] sm:$0x1] %v871_v15  ;;  %6811 = vmatprep.subr.bf16.mxu0 %v7752_v25 }
  0xbb   : > { %v1258_v19 = vrot.slane %v1256_v13, 1  ;;  %v601_v20 = vshll.u32 %v6524_v44, 16  ;;  %v606_v23 = vshrl.u32 %v8781_v45, 16  ;;  %v1426_v27 = vrot.slane %v8804_v2, 1  ;;  %v880_v47 = vld [vmem:[#allocation2 + $0x54] sm:$0xf] }
  0xbc   : > { %v8825_v18 = vsel %vm1204_vm7, %v1247_v10, %v1251_v6  ;;  %v1263_v26 = vrot.slane %v1261_v14, 1  ;;  %v604_v28 = vrot.slane %v600_v16, 4  ;;  %v609_v29 = vshll.u32 %v8781_v45, 16  ;;  %6812 = vmatpush3.bf16.msra.mxu0 %v7753_v31  ;;  %v887_v13 = vld [vmem:[#allocation2 + $0x60] sm:$0xf] }
  0xbd   : > { %v1259_v32 = vor.u32 %v1258_v19, %v1254_v12  ;;  %v603_v33 = vor.u32 %v601_v20, %v600_v16  ;;  %v608_v34 = vrot.slane %v606_v23, 7  ;;  %v615_v35 = vshrl.u32 %v8787_v51, 16  ;;  %v891_v20 = vld [vmem:[#allocation2 + $0x68] sm:$0x1]  ;;  %v7758_v23 = vld [vmem:[#allocation7 + $0x168] sm:$0xff]  }
  0xbe   : > { %v623_v38 = vshrl.u32 %v8798_v62, 16  ;;  %v626_v39 = vshll.u32 %v8798_v62, 16  ;;  %v632_v40 = vshrl.u32 %v8814_v9, 16  ;;  %v1427_v41 = vrot.slane %v8810_v7, 1  ;;  %6813 = vmatprep.subr.bf16.mxu0 %v7758_v23 }
  0xbf   : > { %2155 = vmatmul.mubr.bf16.gmra.mrb[8].mxu0 %v8755_v21  ;;  %v618_v21 = vshll.u32 %v8787_v51, 16  ;;  %v611_v44 = vor.u32 %v609_v29, %v608_v34  ;;  %v874_v45 = vsel %vm8698_vm6, %v603_v33, %v873_v24  ;;  %v613_v46 = vrot.slane %v608_v34, 4  ;;  %v399_v33 = vld [vmem:[%s8564_s21 + $0x90] sm:$0xff] }
  0xc0   : > { %2316 = vmatmul.mubr.bf16.gmra.mrb[8].mxu1 %v8808_v5  ;;  %2162 = vmatprep.mubr.bf16.mxu0 %v8825_v18  ;;  %v8846_v48 = vsel %vm1413_vm9, %v1423_v56, %v1424_v11  ;;  %875 = vst [vmem:[#allocation2 + $0x48] sm:$0xf] %v874_v45  ;;  %v617_v51 = vrot.slane %v615_v35, 7  ;;  %v625_v53 = vrot.slane %v623_v38, 7  ;;  %v634_v54 = vrot.slane %v632_v40, 7  ;;  %v398_v56 = vld [vmem:[%s8564_s21 + $0x88] sm:$0xff] }
  0xc1   : > { %2323 = vmatprep.mubr.bf16.mxu1 %v8804_v2  ;;  %v8848_v49 = vld [vmem:[#allocation2 + $0x3c] sm:$0xff]   ;;  %v8851_v55 = vsel %vm1204_vm7, %v1259_v32, %v1263_v26  ;;  %v612_v57 = vsel %vm8693_vm5, %v604_v28, %v611_v44  ;;  %v878_v58 = vsel %vm8704_vm8, %v613_v46, %v877_v30  ;;  %v635_v60 = vshll.u32 %v8814_v9, 16  ;;  %v8859_v61 = vld [vmem:[#allocation2 + $0x44] ss:$0 sps:$4 sm:$0x11]  }
  0xc2   : > { %876 = vst [vmem:[#allocation2 + $0x4c] sm:$0xf] %v612_v57  ;;  %879 = vst [vmem:[#allocation2 + $0x50] sm:$0x1] %v878_v58  ;;  %v620_v62 = vor.u32 %v618_v21, %v617_v51  ;;  %v628_v63 = vor.u32 %v626_v39, %v625_v53  ;;  %v640_v1 = vshrl.u32 %v8822_v17, 16  ;;  %v6530_v3 = vpack.c.bf16 %v397_v36, %v397_v36  ;;  %v7759_v28 = vld [vmem:[#allocation7 + $0x128] sm:$0xff]  }
  0xc3   : > { %v1266_v4 = vshrl.u32 %v8848_v49, 16  ;;  %v1268_v6 = vshll.u32 %v8848_v49, 16  ;;  %v621_v8 = vrot.slane %v617_v51, 4  ;;  %v630_v10 = vrot.slane %v625_v53, 4  ;;  %v894_v38 = vld [vmem:[#allocation2 + $0x6c] sm:$0xf]  ;;  %6814 = vmatpush3.bf16.msra.mxu0 %v7759_v28 }
  0xc4   : > { %v1273_v9 = vshll.u32 %v8859_v61, 16  ;;  %v881_v11 = vsel %vm8698_vm6, %v620_v62, %v880_v47  ;;  %v637_v12 = vor.u32 %v635_v60, %v634_v54  ;;  %v6531_v14 = vpack.c.bf16 %v398_v56, %v398_v56  ;;  %v400_v39 = vld [vmem:[%s8564_s21 + $0x98] sm:$0xff]  ;;  %v898_v57 = vld [vmem:[#allocation2 + $0x74] sm:$0x1]  ;;  %v403_v28 = vld [vmem:[%s8564_s21 + $0xb0] sm:$0xff] }
  0xc5   : > { %v1270_v15 = vrot.slane %v1268_v6, 1  ;;  %v629_v16 = vsel %vm8693_vm5, %v621_v8, %v628_v63  ;;  %882 = vst [vmem:[#allocation2 + $0x54] sm:$0xf] %v881_v11  ;;  %v638_v19 = vrot.slane %v634_v54, 4  ;;  %v642_v25 = vrot.slane %v640_v1, 7  ;;  %v401_v62 = vld [vmem:[%s8564_s21 + $0xa0] sm:$0xff] }
  0xc6   : > { %v1275_v24 = vrot.slane %v1273_v9, 1  ;;  %883 = vst [vmem:[#allocation2 + $0x58] sm:$0xf] %v629_v16  ;;  %v643_v26 = vshll.u32 %v8822_v17, 16  ;;  %v888_v30 = vsel %vm8698_vm6, %v637_v12, %v887_v13  ;;  %v649_v31 = vshrl.u32 %v6530_v3, 16 }
  0xc7   : > { %2163 = vmatmul.mubr.bf16.gmra.mrb[12].mxu0 %v8779_v42  ;;  %v885_v42 = vsel %vm8704_vm8, %v630_v10, %v884_v59  ;;  %v1271_v29 = vor.u32 %v1270_v15, %v1266_v4  ;;  %v652_v32 = vshll.u32 %v6530_v3, 16  ;;  %889 = vst [vmem:[#allocation2 + $0x60] sm:$0xf] %v888_v30  ;;  %v647_v35 = vrot.slane %v642_v25, 4 }
  0xc8   : > { %2324 = vmatmul.mubr.bf16.gmra.mrb[12].mxu1 %v8846_v48  ;;  %2170 = vmatprep.mubr.bf16.mxu0 %v8851_v55  ;;  %886 = vst [vmem:[#allocation2 + $0x5c] sm:$0x1] %v885_v42  ;;  %v645_v34 = vor.u32 %v643_v26, %v642_v25  ;;  %v657_v36 = vshrl.u32 %v6531_v14, 16  ;;  %v660_v21 = vshll.u32 %v6531_v14, 16  ;;  %v8885_v17 = vsel %vm1413_vm9, %v1426_v27, %v1427_v41  ;;  %v7764_v14 = vld [vmem:[#allocation7 + $0x170] sm:$0xff]  }
  0xc9   : > { %2331 = vmatprep.mubr.bf16.mxu1 %v8848_v49  ;;  %v8887_v40 = vld [vmem:[#allocation2 + $0x48] sm:$0xff]   ;;  %v651_v44 = vrot.slane %v649_v31, 7  ;;  %v8890_v45 = vsel %vm1204_vm7, %v1271_v29, %v1275_v24  ;;  %v8892_v46 = vld [vmem:[#allocation2 + $0x50] ss:$0 sps:$4 sm:$0x11]   ;;  %v892_v7 = vsel %vm8704_vm8, %v647_v35, %v891_v20  ;;  %v1429_v53 = vrot.slane %v8848_v49, 1  ;;  %6815 = vmatprep.subr.bf16.mxu0 %v7764_v14 }
  0xca   : > { %v646_v47 = vsel %vm8693_vm5, %v638_v19, %v645_v34  ;;  %v659_v51 = vrot.slane %v657_v36, 7  ;;  %v1278_v27 = vshrl.u32 %v8887_v40, 16  ;;  %v1280_v41 = vshll.u32 %v8887_v40, 16  ;;  %893 = vst [vmem:[#allocation2 + $0x68] sm:$0x1] %v892_v7  ;;  %v402_v19 = vld [vmem:[%s8564_s21 + $0xa8] sm:$0xff] }
  0xcb   : > { %890 = vst [vmem:[#allocation2 + $0x64] sm:$0xf] %v646_v47  ;;  %v654_v54 = vor.u32 %v652_v32, %v651_v44  ;;  %v1285_v58 = vshll.u32 %v8892_v46, 16  ;;  %v655_v59 = vrot.slane %v651_v44, 4  ;;  %v6532_v56 = vpack.c.bf16 %v399_v33, %v399_v33  ;;  %v7765_v20 = vld [vmem:[#allocation7 + $0x130] sm:$0xff]   ;;  %v7766_v29 = vld [vmem:[#allocation7 + $0x1c0] sm:$0xff]  }
  0xcc   : > { %v662_v60 = vor.u32 %v660_v21, %v659_v51  ;;  %v1282_v63 = vrot.slane %v1280_v41, 1  ;;  %v6533_v4 = vpack.c.bf16 %v400_v39, %v400_v39  ;;  %v664_v9 = vrot.slane %v659_v51, 4  ;;  %v901_v34 = vld [vmem:[#allocation2 + $0x78] sm:$0xf]  ;;  %6816 = vmatpush3.bf16.msra.mxu0 %v7765_v20  ;;  %6915 = vmatprep.subr.bf16.mxu1 %v7766_v29  ;;  %v905_v39 = vld [vmem:[#allocation2 + $0x80] sm:$0x1] }
  0xcd   : > { %v8906_v1 = vld [vmem:[#allocation2 + $0x54] sm:$0xff]   ;;  %v895_v3 = vsel %vm8698_vm6, %v654_v54, %v894_v38  ;;  %v1287_v6 = vrot.slane %v1285_v58, 1  ;;  %v8917_v13 = vpack.c.bf16 %v401_v62, %v401_v62  ;;  %v1432_v15 = vrot.slane %v8887_v40, 1  ;;  %v404_v7 = vld [vmem:[%s8564_s21 + $0xb8] sm:$0xff] }
  0xce   : > { %v663_v10 = vsel %vm8693_vm5, %v655_v59, %v662_v60  ;;  %896 = vst [vmem:[#allocation2 + $0x6c] sm:$0xf] %v895_v3  ;;  %v1283_v11 = vor.u32 %v1282_v63, %v1278_v27  ;;  %v1292_v12 = vshll.u32 %v8906_v1, 16  ;;  %v899_v16 = vsel %vm8704_vm8, %v664_v9, %v898_v57  ;;  %v908_v9 = vld [vmem:[#allocation2 + $0x84] sm:$0xf]  ;;  %v7767_v20 = vld [vmem:[#allocation7 + $0x180] sm:$0xff]  }
  0xcf   : > { %2171 = vmatmul.mubr.bf16.gmra.mrb[16].mxu0 %v8804_v2  ;;  %v1430_v2 = vrot.slane %v8859_v61, 1  ;;  %v8912_v8 = vld [vmem:[#allocation2 + $0x5c] ss:$0 sps:$4 sm:$0x11]   ;;  %897 = vst [vmem:[#allocation2 + $0x70] sm:$0xf] %v663_v10  ;;  %v6535_v44 = vpack.c.bf16 %v402_v19, %v402_v19  ;;  %v8940_v51 = vpack.c.bf16 %v403_v28, %v403_v28  ;;  %6916 = vmatpush3.bf16.msra.mxu1 %v7767_v20 }
  0xd0   : > { %2332 = vmatmul.mubr.bf16.gmra.mrb[16].mxu1 %v8885_v17  ;;  %2178 = vmatprep.mubr.bf16.mxu0 %v8890_v45  ;;  %v1290_v61 = vshrl.u32 %v8906_v1, 16  ;;  %v666_v42 = vshrl.u32 %v6532_v56, 16  ;;  %v1294_v23 = vrot.slane %v1292_v12, 1  ;;  %v1297_v24 = vshll.u32 %v8912_v8, 16  ;;  %900 = vst [vmem:[#allocation2 + $0x74] sm:$0x1] %v899_v16 }
  0xd1   : > { %2339 = vmatprep.mubr.bf16.mxu1 %v8887_v40  ;;  %v669_v25 = vshll.u32 %v6532_v56, 16  ;;  %v674_v26 = vshrl.u32 %v6533_v4, 16  ;;  %v8927_v30 = vsel %vm1413_vm9, %v1429_v53, %v1430_v2  ;;  %v8930_v31 = vsel %vm1204_vm7, %v1283_v11, %v1287_v6  ;;  %v8935_v35 = vld [vmem:[#allocation2 + $0x68] ss:$0 sps:$4 sm:$0x11]   ;;  %v406_v29 = vld [vmem:[%s8564_s21 + $0xc8] sm:$0xff] }
  0xd2   : > { %v1433_v32 = vrot.slane %v8892_v46, 1  ;;  %v8933_v33 = vld [vmem:[#allocation2 + $0x60] sm:$0xff]   ;;  %v668_v36 = vrot.slane %v666_v42, 7  ;;  %v677_v38 = vshll.u32 %v6533_v4, 16  ;;  %v683_v47 = vshrl.u32 %v8917_v13, 16  ;;  %v405_v46 = vld [vmem:[%s8564_s21 + $0xc0] sm:$0xff] }
  0xd3   : > { %v676_v21 = vrot.slane %v674_v26, 7  ;;  %v1295_v53 = vor.u32 %v1294_v23, %v1290_v61  ;;  %v1299_v27 = vrot.slane %v1297_v24, 1  ;;  %v1304_v41 = vshll.u32 %v8933_v33, 16  ;;  %v912_v26 = vld [vmem:[#allocation2 + $0x8c] sm:$0x1] }
  0xd4   : > { %v671_v54 = vor.u32 %v669_v25, %v668_v36  ;;  %v672_v58 = vrot.slane %v668_v36, 4  ;;  %v8951_v56 = vsel %vm1413_vm9, %v1432_v15, %v1433_v32  ;;  %v1435_v62 = vrot.slane %v8906_v1, 1  ;;  %v7768_v32 = vld [vmem:[#allocation7 + $0x1c8] sm:$0xff]  }
  0xd5   : > { %v679_v59 = vor.u32 %v677_v38, %v676_v21  ;;  %v681_v60 = vrot.slane %v676_v21, 4  ;;  %v685_v3 = vrot.slane %v683_v47, 7  ;;  %v1436_v4 = vrot.slane %v8912_v8, 1  ;;  %v915_v38 = vld [vmem:[#allocation2 + $0x90] sm:$0xf]  ;;  %6917 = vmatprep.subr.bf16.mxu1 %v7768_v32 }
  0xd6   : > { %v8948_v57 = vld [vmem:[#allocation2 + $0x6c] sm:$0xff]   ;;  %v902_v63 = vsel %vm8698_vm6, %v671_v54, %v901_v34  ;;  %v6537_v11 = vpack.c.bf16 %v404_v7, %v404_v7  ;;  %v1302_v12 = vshrl.u32 %v8933_v33, 16  ;;  %v1306_v14 = vrot.slane %v1304_v41, 1  ;;  %v922_v20 = vld [vmem:[#allocation2 + $0x9c] sm:$0xf] }
  0xd7   : > { %2179 = vmatmul.mubr.bf16.gmra.mrb[20].mxu0 %v8848_v49  ;;  %v1309_v49 = vshll.u32 %v8935_v35, 16  ;;  %v8957_v2 = vld [vmem:[#allocation2 + $0x74] ss:$0 sps:$4 sm:$0x11]   ;;  %v680_v6 = vsel %vm8693_vm5, %v672_v58, %v679_v59  ;;  %903 = vst [vmem:[#allocation2 + $0x78] sm:$0xf] %v902_v63  ;;  %v906_v10 = vsel %vm8704_vm8, %v681_v60, %v905_v39  ;;  %v8965_v8 = vpack.c.bf16 %v405_v46, %v405_v46 }
  0xd8   : > { %2340 = vmatmul.mubr.bf16.gmra.mrb[20].mxu1 %v8927_v30  ;;  %2186 = vmatprep.mubr.bf16.mxu0 %v8930_v31  ;;  %904 = vst [vmem:[#allocation2 + $0x7c] sm:$0xf] %v680_v6  ;;  %907 = vst [vmem:[#allocation2 + $0x80] sm:$0x1] %v906_v10  ;;  %v686_v15 = vshll.u32 %v8917_v13, 16  ;;  %v8968_v61 = vsel %vm1204_vm7, %v1295_v53, %v1299_v27  ;;  %v1316_v42 = vshll.u32 %v8948_v57, 16 }
  0xd9   : > { %2347 = vmatprep.mubr.bf16.mxu1 %v8906_v1  ;;  %v1311_v16 = vrot.slane %v1309_v49, 1  ;;  %v691_v19 = vshrl.u32 %v6535_v44, 16  ;;  %v1314_v23 = vshrl.u32 %v8948_v57, 16  ;;  %v694_v25 = vshll.u32 %v6535_v44, 16  ;;  %v919_v27 = vld [vmem:[#allocation2 + $0x98] sm:$0x1] }
  0xda   : > { %v688_v24 = vor.u32 %v686_v15, %v685_v3  ;;  %v700_v28 = vshrl.u32 %v8940_v51, 16  ;;  %v1321_v13 = vshll.u32 %v8957_v2, 16  ;;  %v689_v34 = vrot.slane %v685_v3, 4  ;;  %v407_v59 = vld [vmem:[%s8564_s21 + $0xd0] sm:$0xff]  ;;  %v7771_v60 = vld [vmem:[#allocation7 + $0x188] sm:$0xff]  }
  0xdb   : > { %v693_v36 = vrot.slane %v691_v19, 7  ;;  %v703_v21 = vshll.u32 %v8940_v51, 16  ;;  %v1307_v39 = vor.u32 %v1306_v14, %v1302_v12  ;;  %v708_v7 = vshrl.u32 %v6537_v11, 16  ;;  %6918 = vmatpush3.bf16.msra.mxu1 %v7771_v60  ;;  %v7772_v14 = vld [vmem:[#allocation7 + $0x1d0] sm:$0xff]  }
  0xdc   : > { %v909_v44 = vsel %vm8698_vm6, %v688_v24, %v908_v9  ;;  %v702_v47 = vrot.slane %v700_v28, 7  ;;  %v711_v51 = vshll.u32 %v6537_v11, 16  ;;  %v8983_v41 = vsel %vm1413_vm9, %v1435_v62, %v1436_v4  ;;  %6919 = vmatprep.subr.bf16.mxu1 %v7772_v14 }
  0xdd   : > { %v696_v46 = vor.u32 %v694_v25, %v693_v36  ;;  %910 = vst [vmem:[#allocation2 + $0x84] sm:$0xf] %v909_v44  ;;  %v698_v53 = vrot.slane %v693_v36, 4  ;;  %v710_v58 = vrot.slane %v708_v7, 7  ;;  %v6539_v10 = vpack.c.bf16 %v406_v29, %v406_v29  ;;  %v408_v29 = vld [vmem:[%s8564_s21 + $0xd8] sm:$0xff] }
  0xde   : > { %v705_v54 = vor.u32 %v703_v21, %v702_v47  ;;  %v706_v49 = vrot.slane %v702_v47, 4  ;;  %v717_v9 = vshrl.u32 %v8965_v8, 16  ;;  %v720_v12 = vshll.u32 %v8965_v8, 16  ;;  %v926_v7 = vld [vmem:[#allocation2 + $0xa4] sm:$0x1] }
  0xdf   : > { %2187 = vmatmul.mubr.bf16.gmra.mrb[24].mxu0 %v8887_v40  ;;  %v1318_v40 = vrot.slane %v1316_v42, 1  ;;  %v8986_v63 = vld [vmem:[#allocation2 + $0x78] sm:$0xff]   ;;  %v697_v3 = vsel %vm8693_vm5, %v689_v34, %v696_v46  ;;  %v913_v6 = vsel %vm8704_vm8, %v698_v53, %v912_v26  ;;  %v713_v62 = vor.u32 %v711_v51, %v710_v58  ;;  %v9001_v26 = vld [vmem:[#allocation2 + $0x80] ss:$0 sps:$4 sm:$0x11]   ;;  %v7774_v53 = vld [vmem:[#allocation7 + $0x1d8] sm:$0xff]  }
  0xe0   : > { %2348 = vmatmul.mubr.bf16.gmra.mrb[24].mxu1 %v8951_v56  ;;  %2194 = vmatprep.mubr.bf16.mxu0 %v8968_v61  ;;  %911 = vst [vmem:[#allocation2 + $0x88] sm:$0xf] %v697_v3  ;;  %914 = vst [vmem:[#allocation2 + $0x8c] sm:$0x1] %v913_v6  ;;  %v916_v4 = vsel %vm8698_vm6, %v705_v54, %v915_v38  ;;  %v715_v11 = vrot.slane %v710_v58, 4  ;;  %v8997_v15 = vsel %vm1204_vm7, %v1307_v39, %v1311_v16 }
  0xe1   : > { %2355 = vmatprep.mubr.bf16.mxu1 %v8933_v33  ;;  %v1438_v42 = vrot.slane %v8933_v33, 1  ;;  %917 = vst [vmem:[#allocation2 + $0x90] sm:$0xf] %v916_v4  ;;  %v719_v19 = vrot.slane %v717_v9, 7  ;;  %v6540_v24 = vpack.c.bf16 %v407_v59, %v407_v59  ;;  %v1439_v25 = vrot.slane %v8935_v35, 1  ;;  %v7773_v35 = vld [vmem:[#allocation7 + $0x190] sm:$0xff]  }
  0xe2   : > { %v714_v28 = vsel %vm8693_vm5, %v706_v49, %v713_v62  ;;  %v920_v8 = vsel %vm8704_vm8, %v715_v11, %v919_v27  ;;  %v1323_v16 = vrot.slane %v1321_v13, 1  ;;  %v1328_v32 = vshll.u32 %v8986_v63, 16  ;;  %6920 = vmatpush3.bf16.msra.mxu1 %v7773_v35  ;;  %v410_v11 = vld [vmem:[%s8564_s21 + $0xe8] sm:$0xff] }
  0xe3   : > { %918 = vst [vmem:[#allocation2 + $0x94] sm:$0xf] %v714_v28  ;;  %921 = vst [vmem:[#allocation2 + $0x98] sm:$0x1] %v920_v8  ;;  %v722_v34 = vor.u32 %v720_v12, %v719_v19  ;;  %v725_v36 = vshrl.u32 %v6539_v10, 16  ;;  %v1319_v21 = vor.u32 %v1318_v40, %v1314_v23  ;;  %v723_v38 = vrot.slane %v719_v19, 4  ;;  %6921 = vmatprep.subr.bf16.mxu1 %v7774_v53 }
  0xe4   : > { %v728_v39 = vshll.u32 %v6539_v10, 16  ;;  %v6541_v44 = vpack.c.bf16 %v408_v29, %v408_v29  ;;  %v734_v47 = vshrl.u32 %v6540_v24, 16  ;;  %v737_v46 = vshll.u32 %v6540_v24, 16  ;;  %v409_v10 = vld [vmem:[%s8564_s21 + $0xe0] sm:$0xff]  ;;  %v7777_v28 = vld [vmem:[#allocation7 + $0x198] sm:$0xff]  }
  0xe5   : > { %v923_v13 = vsel %vm8698_vm6, %v722_v34, %v922_v20  ;;  %v1326_v23 = vshrl.u32 %v8986_v63, 16  ;;  %v1330_v40 = vrot.slane %v1328_v32, 1  ;;  %v1333_v54 = vshll.u32 %v9001_v26, 16 }
  0xe6   : > { %924 = vst [vmem:[#allocation2 + $0x9c] sm:$0xf] %v923_v13  ;;  %v736_v49 = vrot.slane %v734_v47, 7  ;;  %v9020_v58 = vsel %vm1413_vm9, %v1438_v42, %v1439_v25  ;;  %v9023_v59 = vsel %vm1204_vm7, %v1319_v21, %v1323_v16  ;;  %v742_v6 = vshrl.u32 %v6541_v44, 16  ;;  %v929_v42 = vld [vmem:[#allocation2 + $0xa8] sm:$0xf]  ;;  %6922 = vmatpush3.bf16.msra.mxu1 %v7777_v28 }
  0xe7   : > { %2195 = vmatmul.mubr.bf16.gmra.mrb[28].mxu0 %v8906_v1  ;;  %v727_v1 = vrot.slane %v725_v36, 7  ;;  %v9025_v60 = vld [vmem:[#allocation2 + $0x84] sm:$0xff]   ;;  %v9030_v9 = vld [vmem:[#allocation2 + $0x8c] ss:$0 sps:$4 sm:$0x11]   ;;  %v1441_v12 = vrot.slane %v8948_v57, 1  ;;  %v6542_v19 = vpack.c.bf16 %v409_v10, %v409_v10  ;;  %v1331_v20 = vor.u32 %v1330_v40, %v1326_v23 }
  0xe8   : > { %2356 = vmatmul.mubr.bf16.gmra.mrb[28].mxu1 %v8983_v41  ;;  %2202 = vmatprep.mubr.bf16.mxu0 %v8997_v15  ;;  %v739_v4 = vor.u32 %v737_v46, %v736_v49  ;;  %v1442_v14 = vrot.slane %v8957_v2, 1  ;;  %v1335_v24 = vrot.slane %v1333_v54, 1  ;;  %v745_v25 = vshll.u32 %v6541_v44, 16  ;;  %v7778_v16 = vld [vmem:[#allocation7 + $0x178] sm:$0xff]   ;;  %v933_v21 = vld [vmem:[#allocation2 + $0xb0] sm:$0x1] }
  0xe9   : > { %2363 = vmatprep.mubr.bf16.mxu1 %v8948_v57  ;;  %v730_v51 = vor.u32 %v728_v39, %v727_v1  ;;  %v732_v27 = vrot.slane %v727_v1, 4  ;;  %v1444_v8 = vrot.slane %v8986_v63, 1  ;;  %v1340_v29 = vshll.u32 %v9025_v60, 16  ;;  %6817 = vmatprep.subr.bf16.mxu0 %v7778_v16 }
  0xea   : > { %v6543_v2 = vpack.c.bf16 %v410_v11, %v410_v11  ;;  %v1345_v32 = vshll.u32 %v9030_v9, 16  ;;  %v740_v34 = vrot.slane %v736_v49, 4  ;;  %v744_v36 = vrot.slane %v742_v6, 7  ;;  %v9050_v1 = vld [vmem:[#allocation2 + $0x90] sm:$0xff]  }
  0xeb   : > { %v731_v3 = vsel %vm8693_vm5, %v723_v38, %v730_v51  ;;  %v927_v62 = vsel %vm8704_vm8, %v732_v27, %v926_v7  ;;  %v930_v35 = vsel %vm8698_vm6, %v739_v4, %v929_v42  ;;  %v7779_v38 = vld [vmem:[#allocation7 + $0x138] sm:$0xff]   ;;  %v9048_v39 = vsel %vm1413_vm9, %v1441_v12, %v1442_v14  ;;  %v936_v49 = vld [vmem:[#allocation2 + $0xb4] sm:$0xf]  ;;  %v9061_v6 = vld [vmem:[#allocation2 + $0x98] ss:$0 sps:$4 sm:$0x11]  }
  0xec   : > { %925 = vst [vmem:[#allocation2 + $0xa0] sm:$0xf] %v731_v3  ;;  %928 = vst [vmem:[#allocation2 + $0xa4] sm:$0x1] %v927_v62  ;;  %v9053_v13 = vsel %vm1204_vm7, %v1331_v20, %v1335_v24  ;;  %v747_v44 = vor.u32 %v745_v25, %v744_v36  ;;  %v749_v47 = vrot.slane %v744_v36, 4  ;;  %v754_v7 = vshll.u32 %v6542_v19, 16  ;;  %6818 = vmatpush3.bf16.msra.mxu0 %v7779_v38 }
  0xed   : > { %931 = vst [vmem:[#allocation2 + $0xa8] sm:$0xf] %v930_v35  ;;  %v1338_v46 = vshrl.u32 %v9025_v60, 16  ;;  %v1342_v53 = vrot.slane %v1340_v29, 1  ;;  %v759_v27 = vshrl.u32 %v6543_v2, 16  ;;  %v762_v54 = vshll.u32 %v6543_v2, 16 }
  0xee   : > { %v748_v23 = vsel %vm8693_vm5, %v740_v34, %v747_v44  ;;  %v934_v40 = vsel %vm8704_vm8, %v749_v47, %v933_v21  ;;  %v7780_v3 = vld [vmem:[#allocation7 + $0x1e0] sm:$0xff]   ;;  %v1347_v4 = vrot.slane %v1345_v32, 1  ;;  %v1352_v11 = vshll.u32 %v9050_v1, 16  ;;  %v7782_v20 = vld [vmem:[#allocation7 + $0x1e8] sm:$0xff]   ;;  %v411_v36 = vld [vmem:[%s8564_s21 + $0xf0] sm:$0xff] }
  0xef   : > { %2203 = vmatmul.mubr.bf16.gmra.mrb[32].mxu0 %v8933_v33  ;;  %v1445_v33 = vrot.slane %v9001_v26, 1  ;;  %v751_v26 = vshrl.u32 %v6542_v19, 16  ;;  %932 = vst [vmem:[#allocation2 + $0xac] sm:$0xf] %v748_v23  ;;  %935 = vst [vmem:[#allocation2 + $0xb0] sm:$0x1] %v934_v40  ;;  %v1343_v42 = vor.u32 %v1342_v53, %v1338_v46  ;;  %6923 = vmatprep.subr.bf16.mxu1 %v7780_v3 }
  0xf0   : > { %2364 = vmatmul.mubr.bf16.gmra.mrb[32].mxu1 %v9020_v58  ;;  %2210 = vmatprep.mubr.bf16.mxu0 %v9023_v59  ;;  %v7781_v62 = vld [vmem:[#allocation7 + $0x1a0] sm:$0xff]   ;;  %v761_v14 = vrot.slane %v759_v27, 7  ;;  %v1354_v2 = vrot.slane %v1352_v11, 1  ;;  %v1357_v16 = vshll.u32 %v9061_v6, 16  ;;  %v940_v34 = vld [vmem:[#allocation2 + $0xbc] sm:$0x1] }
  0xf1   : > { %2371 = vmatprep.mubr.bf16.mxu1 %v8986_v63  ;;  %v753_v51 = vrot.slane %v751_v26, 7  ;;  %6924 = vmatpush3.bf16.msra.mxu1 %v7781_v62  ;;  %v9073_v29 = vsel %vm1413_vm9, %v1444_v8, %v1445_v33  ;;  %v412_v35 = vld [vmem:[%s8564_s21 + $0xf8] sm:$0xff]  ;;  %v9081_v21 = vsel %vm1204_vm7, %v1343_v42, %v1347_v4  ;;  %v6544_v26 = vpack.c.bf16 %v411_v36, %v411_v36  ;;  %v7785_v40 = vld [vmem:[#allocation7 + $0x1a8] sm:$0xff]   ;;  %v7787_v4 = vld [vmem:[#allocation7 + $0x1b0] sm:$0xff]  }
  0xf2   : > { %v764_v25 = vor.u32 %v762_v54, %v761_v14  ;;  %v766_v28 = vrot.slane %v761_v14, 4  ;;  %6925 = vmatprep.subr.bf16.mxu1 %v7782_v20  ;;  %v6545_v44 = vpack.c.bf16 %v412_v35, %v412_v35  ;;  %v1447_v8 = vrot.slane %v9025_v60, 1  ;;  %v7786_v54 = vld [vmem:[#allocation7 + $0x1f0] sm:$0xff]   ;;  %v7789_v35 = vld [vmem:[#allocation7 + $0x1b8] sm:$0xff]  }
  0xf3   : > { %v756_v10 = vor.u32 %v754_v7, %v753_v51  ;;  %v757_v12 = vrot.slane %v753_v51, 4  ;;  %v9070_v24 = vld [vmem:[#allocation2 + $0x9c] sm:$0xff]   ;;  %v9087_v33 = vld [vmem:[#allocation2 + $0xa4] ss:$0 sps:$4 sm:$0x11]   ;;  %v768_v47 = vshrl.u32 %v6544_v26, 16 }
  0xf4   : > { %v941_v38 = vsel %vm8704_vm8, %v766_v28, %v940_v34  ;;  %v771_v7 = vshll.u32 %v6544_v26, 16  ;;  %v776_v46 = vshrl.u32 %v6545_v44, 16  ;;  %v1448_v53 = vrot.slane %v9030_v9, 1  ;;  %v7790_v26 = vld [vmem:[#allocation7 + $0x200] sm:$0xff]  }
  0xf5   : > { %v937_v19 = vsel %vm8698_vm6, %v756_v10, %v936_v49  ;;  %v765_v32 = vsel %vm8693_vm5, %v757_v12, %v764_v25  ;;  %942 = vst [vmem:[#allocation2 + $0xbc] sm:$0x1] %v941_v38  ;;  %v1359_v51 = vrot.slane %v1357_v16, 1  ;;  %v1364_v27 = vshll.u32 %v9070_v24, 16  ;;  %v943_v10 = vld [vmem:[#allocation2 + $0xc0] sm:$0xf]  ;;  %6926 = vmatpush3.bf16.msra.mxu1 %v7785_v40  ;;  %7523 = vmatprep.subr.bf16.mxu0 %v7790_v26 }
  0xf6   : > { %938 = vst [vmem:[#allocation2 + $0xb4] sm:$0xf] %v937_v19  ;;  %939 = vst [vmem:[#allocation2 + $0xb8] sm:$0xf] %v765_v32  ;;  %v779_v23 = vshll.u32 %v6545_v44, 16  ;;  %v770_v49 = vrot.slane %v768_v47, 7  ;;  %6927 = vmatprep.subr.bf16.mxu1 %v7786_v54  ;;  %v9099_v20 = vsel %vm1413_vm9, %v1447_v8, %v1448_v53 }
  0xf7   : > { %2211 = vmatmul.mubr.bf16.gmra.mrb[36].mxu0 %v8948_v57  ;;  %v1350_v57 = vshrl.u32 %v9050_v1, 16  ;;  %v778_v3 = vrot.slane %v776_v46, 7  ;;  %v1362_v62 = vshrl.u32 %v9070_v24, 16  ;;  %v1369_v11 = vshll.u32 %v9087_v33, 16  ;;  %v9096_v42 = vld [vmem:[#allocation2 + $0xa8] sm:$0xff]  }
  0xf8   : > { %2372 = vmatmul.mubr.bf16.gmra.mrb[36].mxu1 %v9048_v39  ;;  %2218 = vmatprep.mubr.bf16.mxu0 %v9053_v13  ;;  %v773_v12 = vor.u32 %v771_v7, %v770_v49  ;;  %v774_v9 = vrot.slane %v770_v49, 4  ;;  %v1366_v14 = vrot.slane %v1364_v27, 1  ;;  %v7775_v25 = vld [vmem:[#allocation2 + $0xb0] ss:$0 sps:$4 sm:$0x11]   ;;  %v1450_v16 = vrot.slane %v9050_v1, 1 }
  0xf9   : > { %2379 = vmatprep.mubr.bf16.mxu1 %v9025_v60  ;;  %v781_v19 = vor.u32 %v779_v23, %v778_v3  ;;  %6928 = vmatpush3.bf16.msra.mxu1 %v7787_v4  ;;  %v1376_v38 = vshll.u32 %v9096_v42, 16  ;;  %v1451_v44 = vrot.slane %v9061_v6, 1  ;;  %v1371_v47 = vrot.slane %v1369_v11, 1 }
  0xfa   : > { %v944_v28 = vsel %vm8698_vm6, %v773_v12, %v943_v10  ;;  %v1367_v8 = vor.u32 %v1366_v14, %v1362_v62  ;;  %v1453_v7 = vrot.slane %v9070_v24, 1  ;;  %v1381_v46 = vshll.u32 %v7775_v25, 16  ;;  %v947_v14 = vld [vmem:[#allocation2 + $0xc8] sm:$0x1] }
  0xfb   : > { %v782_v34 = vsel %vm8693_vm5, %v774_v9, %v781_v19  ;;  %945 = vst [vmem:[#allocation2 + $0xc0] sm:$0xf] %v944_v28  ;;  %v1374_v53 = vshrl.u32 %v9096_v42, 16  ;;  %v1378_v27 = vrot.slane %v1376_v38, 1  ;;  %v9121_v40 = vsel %vm1413_vm9, %v1450_v16, %v1451_v44  ;;  %v7791_v44 = vld [vmem:[#allocation7 + $0x208] sm:$0xff]  }
  0xfc   : > { %v7783_v36 = vld [vmem:[#allocation2 + $0xbc] ss:$0 sps:$4 sm:$0x11]   ;;  %946 = vst [vmem:[#allocation2 + $0xc4] sm:$0xf] %v782_v34  ;;  %v9124_v54 = vsel %vm1204_vm7, %v1367_v8, %v1371_v47  ;;  %v1454_v6 = vrot.slane %v9087_v33, 1 }
  0xfd   : > { %v9107_v32 = vld [vmem:[#allocation2 + $0xb4] sm:$0xff]   ;;  %v1393_v23 = vshll.u32 %v7783_v36, 16  ;;  %v1456_v49 = vrot.slane %v9096_v42, 1  ;;  %v1457_v10 = vrot.slane %v7775_v25, 1  ;;  %v783_v12 = vrot.slane %v778_v3, 4  ;;  %v7792_v8 = vld [vmem:[#allocation7 + $0x210] sm:$0xff]  }
  0xfe   : > { %v1386_v62 = vshrl.u32 %v9107_v32, 16  ;;  %v1379_v9 = vor.u32 %v1378_v27, %v1374_v53  ;;  %v9136_v19 = vsel %vm1413_vm9, %v1453_v7, %v1454_v6  ;;  %v1459_v34 = vrot.slane %v9107_v32, 1  ;;  %v8165_v47 = vld [vmem:[#allocation2 + $0x18] sm:$0xff]   ;;  %v7794_v7 = vld [vmem:[#allocation7 + $0x220] sm:$0xff]  }
  0xff   : > { %2219 = vmatmul.mubr.bf16.gmra.mrb[40].mxu0 %v8986_v63  ;;  %v1355_v63 = vor.u32 %v1354_v2, %v1350_v57  ;;  %v7788_v2 = vld [vmem:[#allocation7 + $0x1f8] sm:$0xff]   ;;  %v1395_v11 = vrot.slane %v1393_v23, 1  ;;  %v948_v33 = vsel %vm8704_vm8, %v783_v12, %v947_v14  ;;  %v8168_v53 = vld [vmem:[#allocation2 + $0x3c] sm:$0xff]  }
 0x100   : > { %2380 = vmatmul.mubr.bf16.gmra.mrb[40].mxu1 %v9073_v29  ;;  %2226 = vmatprep.mubr.bf16.mxu0 %v9081_v21  ;;  %949 = vst [vmem:[#allocation2 + $0xc8] sm:$0x1] %v948_v33 }
 0x101   : > { %2387 = vmatprep.mubr.bf16.mxu1 %v9050_v1  ;;  %v9102_v57 = vsel %vm1204_vm7, %v1355_v63, %v1359_v51  ;;  %6929 = vmatprep.subr.bf16.mxu1 %v7788_v2  ;;  %v1388_v51 = vshll.u32 %v9107_v32, 16  ;;  %v1383_v63 = vrot.slane %v1381_v46, 1  ;;  %v9148_v2 = vsel %vm1413_vm9, %v1456_v49, %v1457_v10  ;;  %v7796_v46 = vld [vmem:[#allocation7 + $0x230] sm:$0xff]  }
 0x102   : > { %6930 = vmatpush3.bf16.msra.mxu1 %v7789_v35  ;;  %v1460_v35 = vrot.slane %v7783_v36, 1  ;;  %v7793_v36 = vld [vmem:[#allocation7 + $0x218] sm:$0xff]  }
 0x103   : > { %v1390_v4 = vrot.slane %v1388_v51, 1  ;;  %v9139_v25 = vsel %vm1204_vm7, %v1379_v9, %v1383_v63  ;;  %v9145_v28 = vld [vmem:[#allocation2 + $0xc0] sm:$0xff]  }
 0x104   : > { %v9159_v38 = vsel %vm1413_vm9, %v1459_v34, %v1460_v35  ;;  %v8171_v51 = vld [vmem:[#allocation2 + $0x60] sm:$0xff]  }
 0x105   : > { %v1391_v3 = vor.u32 %v1390_v4, %v1386_v62 }
 0x107   : > { %2227 = vmatmul.mubr.bf16.gmra.mrb[44].mxu0 %v9025_v60  ;;  %v9151_v16 = vsel %vm1204_vm7, %v1391_v3, %v1395_v11 }
 0x108   : > { %2388 = vmatmul.mubr.bf16.gmra.mrb[44].mxu1 %v9099_v20  ;;  %2234 = vmatprep.mubr.bf16.mxu0 %v9102_v57 }
 0x109   : > { %2395 = vmatprep.mubr.bf16.mxu1 %v9070_v24 }
 0x10f   : > { %2235 = vmatmul.mubr.bf16.gmra.mrb[48].mxu0 %v9050_v1 }
 0x110   : > { %2396 = vmatmul.mubr.bf16.gmra.mrb[48].mxu1 %v9121_v40  ;;  %2242 = vmatprep.mubr.bf16.mxu0 %v9124_v54 }
 0x111   : > { %2403 = vmatprep.mubr.bf16.mxu1 %v9096_v42 }
 0x117   : > { %2243 = vmatmul.mubr.bf16.gmra.mrb[52].mxu0 %v9070_v24 }
 0x118   : > { %2404 = vmatmul.mubr.bf16.gmra.mrb[52].mxu1 %v9136_v19  ;;  %2250 = vmatprep.mubr.bf16.mxu0 %v9139_v25 }
 0x119   : > { %2411 = vmatprep.mubr.bf16.mxu1 %v9107_v32 }
 0x11f   : > { %2251 = vmatmul.mubr.bf16.gmra.mrb[56].mxu0 %v9096_v42 }
 0x120   : > { %2412 = vmatmul.mubr.bf16.gmra.mrb[56].mxu1 %v9148_v2  ;;  %2258 = vmatprep.mubr.bf16.mxu0 %v9151_v16 }
 0x121   : > { %2419 = vmatprep.mubr.bf16.mxu1 %v9145_v28 }
 0x127   : > { %2259 = vmatmul.mubr.bf16.gmra.mrb[60].mxu0 %v9107_v32 }
 0x128   : > { %2420 = vmatmul.mubr.bf16.gmra.mrb[60].mxu1 %v9159_v38  ;;  %2460 = vmatprep.mubr.bf16.mxu0 %v8758_v22  ;;  %v8166_v22 = vld [vmem:[#allocation2 + $0x24] sm:$0xff]  }
 0x129   : > { %2621 = vmatprep.mubr.bf16.mxu1 %v8802_v0 }
 0x12f   : > { %2461 = vmatmul.mubr.bf16.vlgmr.msra.gmra.mrb[64].mxu0 %v8775_v37  ;;  %v7795_v37 = vld [vmem:[#allocation7 + $0x228] sm:$0xff]  }
 0x130   : > { %7524 = vmatpush3.bf16.msra.mxu0 %v7790_v26  ;;  %2622 = vmatmul.mubr.bf16.vlgmr.msra.gmra.mrb[64].mxu1 %v8165_v47  ;;  %v8167_v26 = vld [vmem:[#allocation2 + $0x30] sm:$0xff]  }
 0x131   : > { %2468 = vmatprep.mubr.bf16.mxu0 %v8808_v5  ;;  %2629 = vmatprep.mubr.bf16.mxu1 %v8825_v18 }
 0x132   : > { %7525 = vmatprep.subr.bf16.mxu0 %v7791_v44 }
 0x134   : > { %7526 = vmatpush3.bf16.msra.mxu0 %v7791_v44 }
 0x135   : > { %7527 = vmatprep.subr.bf16.mxu0 %v7792_v8 }
 0x137   : > { %2469 = vmatmul.mubr.bf16.gmra.mrb[68].mxu0 %v8802_v0  ;;  %v7797_v0 = vld [vmem:[#allocation7 + $0x238] sm:$0xff]  }
 0x138   : > { %2630 = vmatmul.mubr.bf16.gmra.mrb[68].mxu1 %v8166_v22  ;;  %2476 = vmatprep.mubr.bf16.mxu0 %v8846_v48 }
 0x139   : > { %2637 = vmatprep.mubr.bf16.mxu1 %v8851_v55  ;;  %7528 = vmatpush3.bf16.msra.mxu0 %v7792_v8 }
 0x13a   : > { %7529 = vmatprep.subr.bf16.mxu0 %v7793_v36 }
 0x13d   : > { %7530 = vmatpush3.bf16.msra.mxu0 %v7793_v36 }
 0x13e   : > { %7531 = vmatprep.subr.bf16.mxu0 %v7794_v7 }
 0x13f   : > { %2477 = vmatmul.mubr.bf16.gmra.mrb[72].mxu0 %v8825_v18  ;;  %v8169_v18 = vld [vmem:[#allocation2 + $0x48] sm:$0xff]  }
 0x140   : > { %2638 = vmatmul.mubr.bf16.gmra.mrb[72].mxu1 %v8167_v26  ;;  %2484 = vmatprep.mubr.bf16.mxu0 %v8885_v17 }
 0x141   : > { %2645 = vmatprep.mubr.bf16.mxu1 %v8890_v45  ;;  %7532 = vmatpush3.bf16.msra.mxu0 %v7794_v7  ;;  %v9213_v7 = vld [vmem:[#allocation2 + $0xcc] sm:$0xff]  }
 0x142   : > { %7533 = vmatprep.subr.bf16.mxu0 %v7795_v37 }
 0x145   : > { %7534 = vmatpush3.bf16.msra.mxu0 %v7795_v37 }
 0x146   : > { %7535 = vmatprep.subr.bf16.mxu0 %v7796_v46 }
 0x147   : > { %2485 = vmatmul.mubr.bf16.gmra.mrb[76].mxu0 %v8851_v55  ;;  %v8170_v55 = vld [vmem:[#allocation2 + $0x54] sm:$0xff]  }
 0x148   : > { %2646 = vmatmul.mubr.bf16.gmra.mrb[76].mxu1 %v8168_v53  ;;  %2492 = vmatprep.mubr.bf16.mxu0 %v8927_v30 }
 0x149   : > { %2653 = vmatprep.mubr.bf16.mxu1 %v8930_v31  ;;  %7536 = vmatpush3.bf16.msra.mxu0 %v7796_v46 }
 0x14a   : > { %7537 = vmatprep.subr.bf16.mxu0 %v7797_v0 }
 0x14d   : > { %7538 = vmatpush3.bf16.msra.mxu0 %v7797_v0 }
 0x14f   : > { %2493 = vmatmul.mubr.bf16.gmra.mrb[80].mxu0 %v8890_v45  ;;  %v8172_v45 = vld [vmem:[#allocation2 + $0x6c] sm:$0xff]  }
 0x150   : > { %2654 = vmatmul.mubr.bf16.gmra.mrb[80].mxu1 %v8169_v18  ;;  %2500 = vmatprep.mubr.bf16.mxu0 %v8951_v56 }
 0x151   : > { %2661 = vmatprep.mubr.bf16.mxu1 %v8968_v61 }
 0x157   : > { %2501 = vmatmul.mubr.bf16.gmra.mrb[84].mxu0 %v8930_v31  ;;  %v8173_v31 = vld [vmem:[#allocation2 + $0x78] sm:$0xff]  }
 0x158   : > { %2662 = vmatmul.mubr.bf16.gmra.mrb[84].mxu1 %v8170_v55  ;;  %2508 = vmatprep.mubr.bf16.mxu0 %v8983_v41  ;;  %v9223_v55 = vld [vmem:[#allocation2 + $0xd4] ss:$0 sps:$4 sm:$0x11]  }
 0x159   : > { %2669 = vmatprep.mubr.bf16.mxu1 %v8997_v15 }
 0x15f   : > { %2509 = vmatmul.mubr.bf16.gmra.mrb[88].mxu0 %v8968_v61 }
 0x160   : > { %2670 = vmatmul.mubr.bf16.gmra.mrb[88].mxu1 %v8171_v51  ;;  %2516 = vmatprep.mubr.bf16.mxu0 %v9020_v58  ;;  %v1516_v51 = vshll.u32 %v9213_v7, 16 }
 0x161   : > { %2677 = vmatprep.mubr.bf16.mxu1 %v9023_v59 }
 0x167   : > { %2517 = vmatmul.mubr.bf16.gmra.mrb[92].mxu0 %v8997_v15 }
 0x168   : > { %2678 = vmatmul.mubr.bf16.gmra.mrb[92].mxu1 %v8172_v45  ;;  %2524 = vmatprep.mubr.bf16.mxu0 %v9048_v39 }
 0x169   : > { %2685 = vmatprep.mubr.bf16.mxu1 %v9053_v13 }
 0x16f   : > { %2525 = vmatmul.mubr.bf16.gmra.mrb[96].mxu0 %v9023_v59 }
 0x170   : > { %2686 = vmatmul.mubr.bf16.gmra.mrb[96].mxu1 %v8173_v31  ;;  %2532 = vmatprep.mubr.bf16.mxu0 %v9073_v29 }
 0x171   : > { %2693 = vmatprep.mubr.bf16.mxu1 %v9081_v21 }
 0x177   : > { %2533 = vmatmul.mubr.bf16.gmra.mrb[100].mxu0 %v9053_v13 }
 0x178   : > { %2694 = vmatmul.mubr.bf16.gmra.mrb[100].mxu1 %v9025_v60  ;;  %2540 = vmatprep.mubr.bf16.mxu0 %v9099_v20 }
 0x179   : > { %2701 = vmatprep.mubr.bf16.mxu1 %v9102_v57 }
 0x17e   : > { %v6595_v61 = vpop.f32.mrb[0].mxu0 }
 0x17f   : > { %v6596_v15 = vpop.f32.mrb[1].mxu0  ;;  %2541 = vmatmul.mubr.bf16.gmra.mrb[104].mxu0 %v9081_v21  ;;  %v1490_v21 = vshll.u32 %v9145_v28, 16 }
 0x180   : > { %v6597_v27 = vadd.f32 %v6596_v15, %v6595_v61  ;;  %v6598_v23 = vpop.f32.mrb[2].mxu0  ;;  %2702 = vmatmul.mubr.bf16.gmra.mrb[104].mxu1 %v9050_v1  ;;  %2548 = vmatprep.mubr.bf16.mxu0 %v9121_v40  ;;  %v9206_v1 = vld [vmem:[#allocation2 + $0xc8] ss:$0 sps:$4 sm:$0x11]  }
 0x181   : > { %v6599_v6 = vpop.f32.mrb[3].mxu0  ;;  %2709 = vmatprep.mubr.bf16.mxu1 %v9124_v54  ;;  %v1492_v8 = vrot.slane %v1490_v21, 1  ;;  %v1495_v47 = vshll.u32 %v9206_v1, 16  ;;  %v1500_v21 = vrot.slane %v9145_v28, 1 }
 0x182   : > { %v6600_v59 = vadd.f32 %v6599_v6, %v6598_v23 }
 0x183   : > { %v6707_v13 = vpop.f32.mrb[0].mxu1  ;;  %v1497_v0 = vrot.slane %v1495_v47, 1 }
 0x184   : > { %v6708_v60 = vpop.f32.mrb[1].mxu1 }
 0x185   : > { %v6709_v63 = vadd.f32 %v6708_v60, %v6707_v13  ;;  %v6710_v49 = vpop.f32.mrb[2].mxu1  ;;  %v1514_v60 = vshrl.u32 %v9213_v7, 16 }
 0x186   : > { %v6711_v10 = vpop.f32.mrb[3].mxu1 }
 0x187   : > { %v6712_v62 = vadd.f32 %v6711_v10, %v6710_v49  ;;  %2549 = vmatmul.mubr.bf16.gmra.mrb[108].mxu0 %v9102_v57  ;;  %v9201_v4 = vadd.f32 %v6709_v63, %v6597_v27  ;;  %v1518_v63 = vrot.slane %v1516_v51, 1  ;;  %v1521_v49 = vshll.u32 %v9223_v55, 16 }
 0x188   : > { %2710 = vmatmul.mubr.bf16.gmra.mrb[108].mxu1 %v9070_v24  ;;  %2556 = vmatprep.mubr.bf16.mxu0 %v9136_v19  ;;  %v1488_v24 = vshrl.u32 %v9145_v28, 16 }
 0x189   : > { %2717 = vmatprep.mubr.bf16.mxu1 %v9139_v25  ;;  %v9209_v11 = vadd.f32 %v6712_v62, %v6600_v59 }
 0x18a   : > { %v6601_v12 = vpop.f32.mrb[4].mxu0  ;;  %v1493_v46 = vor.u32 %v1492_v8, %v1488_v24 }
 0x18b   : > { %v6713_v9 = vpop.f32.mrb[4].mxu1  ;;  %v6602_v14 = vpop.f32.mrb[5].mxu0 }
 0x18c   : > { %v6603_v33 = vadd.f32 %v6602_v14, %v6601_v12  ;;  %v6714_v3 = vpop.f32.mrb[5].mxu1  ;;  %v6604_v57 = vpop.f32.mrb[6].mxu0  ;;  %v1498_v6 = vsel %vm1204_vm7, %v1493_v46, %v1497_v0  ;;  %v1501_v12 = vrot.slane %v9206_v1, 1 }
 0x18d   : > { %v6715_v34 = vadd.f32 %v6714_v3, %v6713_v9  ;;  %v6716_v35 = vpop.f32.mrb[6].mxu1  ;;  %v6605_v44 = vpop.f32.mrb[7].mxu0  ;;  %v1523_v3 = vrot.slane %v1521_v49, 1 }
 0x18e   : > { %v6606_v36 = vadd.f32 %v6605_v44, %v6604_v57  ;;  %v6717_v22 = vpop.f32.mrb[7].mxu1  ;;  %v9239_v47 = vsel %vm1413_vm9, %v1500_v21, %v1501_v12 }
 0x18f   : > { %v6718_v37 = vadd.f32 %v6717_v22, %v6716_v35  ;;  %2557 = vmatmul.mubr.bf16.gmra.mrb[112].mxu0 %v9124_v54  ;;  %v9216_v26 = vadd.f32 %v6715_v34, %v6603_v33  ;;  %v1519_v33 = vor.u32 %v1518_v63, %v1514_v60 }
 0x190   : > { %2718 = vmatmul.mubr.bf16.gmra.mrb[112].mxu1 %v9096_v42  ;;  %2564 = vmatprep.mubr.bf16.mxu0 %v9148_v2 }
 0x191   : > { %2725 = vmatprep.mubr.bf16.mxu1 %v9151_v16  ;;  %v9221_v53 = vadd.f32 %v6718_v37, %v6606_v36  ;;  %v1524_v1 = vsel %vm1204_vm7, %v1519_v33, %v1523_v3 }
 0x192   : > { %v6607_v18 = vpop.f32.mrb[8].mxu0 }
 0x193   : > { %v6719_v45 = vpop.f32.mrb[8].mxu1  ;;  %v6608_v31 = vpop.f32.mrb[9].mxu0 }
 0x194   : > { %v6609_v54 = vadd.f32 %v6608_v31, %v6607_v18  ;;  %v6720_v61 = vpop.f32.mrb[9].mxu1  ;;  %v6610_v15 = vpop.f32.mrb[10].mxu0 }
 0x195   : > { %v6721_v27 = vadd.f32 %v6720_v61, %v6719_v45  ;;  %v6722_v42 = vpop.f32.mrb[10].mxu1  ;;  %v6611_v23 = vpop.f32.mrb[11].mxu0 }
 0x196   : > { %v6612_v59 = vadd.f32 %v6611_v23, %v6610_v15  ;;  %v6723_v13 = vpop.f32.mrb[11].mxu1 }
 0x197   : > { %v6724_v10 = vadd.f32 %v6723_v13, %v6722_v42  ;;  %2565 = vmatmul.mubr.bf16.gmra.mrb[116].mxu0 %v9139_v25  ;;  %v9230_v62 = vadd.f32 %v6721_v27, %v6609_v54 }
 0x198   : > { %2726 = vmatmul.mubr.bf16.gmra.mrb[116].mxu1 %v9107_v32  ;;  %2572 = vmatprep.mubr.bf16.mxu0 %v9159_v38 }
 0x199   : > { %2733 = vmatprep.mubr.bf16.mxu1 %v1498_v6  ;;  %v9236_v9 = vadd.f32 %v6724_v10, %v6612_v59 }
 0x19a   : > { %v6613_v14 = vpop.f32.mrb[12].mxu0 }
 0x19b   : > { %v6725_v57 = vpop.f32.mrb[12].mxu1  ;;  %v6614_v34 = vpop.f32.mrb[13].mxu0 }
 0x19c   : > { %v6615_v35 = vadd.f32 %v6614_v34, %v6613_v14  ;;  %v6726_v25 = vpop.f32.mrb[13].mxu1  ;;  %v6616_v44 = vpop.f32.mrb[14].mxu0 }
 0x19d   : > { %v6727_v24 = vadd.f32 %v6726_v25, %v6725_v57  ;;  %v6728_v8 = vpop.f32.mrb[14].mxu1  ;;  %v6617_v32 = vpop.f32.mrb[15].mxu0 }
 0x19e   : > { %v6618_v36 = vadd.f32 %v6617_v32, %v6616_v44  ;;  %v6729_v22 = vpop.f32.mrb[15].mxu1 }
 0x19f   : > { %v6730_v37 = vadd.f32 %v6729_v22, %v6728_v8  ;;  %2573 = vmatmul.mubr.bf16.gmra.mrb[120].mxu0 %v9151_v16  ;;  %v9243_v46 = vadd.f32 %v6727_v24, %v6615_v35 }
 0x1a0   : > { %2734 = vmatmul.mubr.bf16.gmra.mrb[120].mxu1 %v9145_v28  ;;  %2580 = vmatprep.mubr.bf16.mxu0 %v9239_v47 }
 0x1a1   : > { %2741 = vmatprep.mubr.bf16.mxu1 %v1524_v1  ;;  %v9247_v0 = vadd.f32 %v6730_v37, %v6618_v36 }
 0x1a2   : > { %v6619_v18 = vpop.f32.mrb[16].mxu0 }
 0x1a3   : > { %v6731_v51 = vpop.f32.mrb[16].mxu1  ;;  %v6620_v45 = vpop.f32.mrb[17].mxu0 }
 0x1a4   : > { %v6621_v31 = vadd.f32 %v6620_v45, %v6619_v18  ;;  %v6732_v54 = vpop.f32.mrb[17].mxu1  ;;  %v6622_v61 = vpop.f32.mrb[18].mxu0 }
 0x1a5   : > { %v6733_v15 = vadd.f32 %v6732_v54, %v6731_v51  ;;  %v6734_v27 = vpop.f32.mrb[18].mxu1  ;;  %v6623_v42 = vpop.f32.mrb[19].mxu0 }
 0x1a6   : > { %v6624_v23 = vadd.f32 %v6623_v42, %v6622_v61  ;;  %v6735_v16 = vpop.f32.mrb[19].mxu1 }
 0x1a7   : > { %v6736_v59 = vadd.f32 %v6735_v16, %v6734_v27  ;;  %2581 = vmatmul.mubr.bf16.gmra.mrb[124].mxu0 %v1498_v6  ;;  %v9249_v13 = vadd.f32 %v6733_v15, %v6621_v31 }
 0x1a8   : > { %2742 = vmatmul.mubr.bf16.gmra.mrb[124].mxu1 %v9213_v7  ;;  %7539 = vmatprep.mubr.bf16.mxu0 %v8808_v5 }
 0x1a9   : > { %v9253_v28 = vadd.f32 %v6736_v59, %v6624_v23 }
 0x1aa   : > { %v6625_v60 = vpop.f32.mrb[20].mxu0 }
 0x1ab   : > { %v6737_v63 = vpop.f32.mrb[20].mxu1  ;;  %v6626_v49 = vpop.f32.mrb[21].mxu0 }
 0x1ac   : > { %v6627_v10 = vadd.f32 %v6626_v49, %v6625_v60  ;;  %v6738_v21 = vpop.f32.mrb[21].mxu1  ;;  %v6628_v12 = vpop.f32.mrb[22].mxu0  ;;  %v7801_v49 = vld [vmem:[#allocation9 + $0x40] sm:$0xff]  }
 0x1ad   : > { %v6739_v14 = vadd.f32 %v6738_v21, %v6737_v63  ;;  %v6740_v33 = vpop.f32.mrb[22].mxu1  ;;  %v6629_v3 = vpop.f32.mrb[23].mxu0  ;;  %7051 = vmatprep.subr.bf16.mxu1 %v7801_v49 }
 0x1ae   : > { %v6630_v57 = vadd.f32 %v6629_v3, %v6628_v12  ;;  %v6741_v34 = vpop.f32.mrb[23].mxu1 }
 0x1af   : > { %v6742_v6 = vadd.f32 %v6741_v34, %v6740_v33  ;;  %7540 = vmatmul.mubr.bf16.vlgmr.msra.gmra.mrb[128].mxu0 %v8846_v48  ;;  %v9256_v35 = vadd.f32 %v6739_v14, %v6627_v10  ;;  %v7802_v10 = vld [vmem:[#allocation9] sm:$0xff]  }
 0x1b0   : > { %7543 = vmatprep.mubr.bf16.mxu0 %v8885_v17  ;;  %7052 = vmatpush3.bf16.msra.mxu1 %v7802_v10 }
 0x1b1   : > { %v9259_v5 = vadd.f32 %v6742_v6, %v6630_v57 }
 0x1b2   : > { %v6631_v25 = vpop.f32.mrb[24].mxu0 }
 0x1b3   : > { %v6743_v44 = vpop.f32.mrb[24].mxu1  ;;  %v6632_v24 = vpop.f32.mrb[25].mxu0 }
 0x1b4   : > { %v6633_v8 = vadd.f32 %v6632_v24, %v6631_v25  ;;  %v6744_v32 = vpop.f32.mrb[25].mxu1  ;;  %v6634_v36 = vpop.f32.mrb[26].mxu0 }
 0x1b5   : > { %v6745_v22 = vadd.f32 %v6744_v32, %v6743_v44  ;;  %v6746_v1 = vpop.f32.mrb[26].mxu1  ;;  %v6635_v37 = vpop.f32.mrb[27].mxu0 }
 0x1b6   : > { %v6636_v18 = vadd.f32 %v6635_v37, %v6634_v36  ;;  %v6747_v51 = vpop.f32.mrb[27].mxu1 }
 0x1b7   : > { %v6748_v45 = vadd.f32 %v6747_v51, %v6746_v1  ;;  %7544 = vmatmul.mubr.bf16.gmra.mrb[132].mxu0 %v8927_v30  ;;  %v9262_v48 = vadd.f32 %v6745_v22, %v6633_v8 }
 0x1b8   : > { %7547 = vmatprep.mubr.bf16.mxu0 %v8951_v56 }
 0x1b9   : > { %v9265_v17 = vadd.f32 %v6748_v45, %v6636_v18 }
 0x1ba   : > { %v6637_v31 = vpop.f32.mrb[28].mxu0 }
 0x1bb   : > { %v6749_v54 = vpop.f32.mrb[28].mxu1  ;;  %v6638_v61 = vpop.f32.mrb[29].mxu0 }
 0x1bc   : > { %v6639_v15 = vadd.f32 %v6638_v61, %v6637_v31  ;;  %v6750_v27 = vpop.f32.mrb[29].mxu1  ;;  %v6640_v42 = vpop.f32.mrb[30].mxu0 }
 0x1bd   : > { %v6751_v23 = vadd.f32 %v6750_v27, %v6749_v54  ;;  %v6752_v16 = vpop.f32.mrb[30].mxu1  ;;  %v6641_v59 = vpop.f32.mrb[31].mxu0  ;;  %v7803_v27 = vld [vmem:[#allocation9 + $0x48] sm:$0xff]  }
 0x1be   : > { %v6642_v60 = vadd.f32 %v6641_v59, %v6640_v42  ;;  %v6753_v63 = vpop.f32.mrb[31].mxu1  ;;  %v7804_v42 = vld [vmem:[#allocation9 + $0x8] sm:$0xff]   ;;  %7053 = vmatprep.subr.bf16.mxu1 %v7803_v27 }
 0x1bf   : > { %v6754_v30 = vadd.f32 %v6753_v63, %v6752_v16  ;;  %7548 = vmatmul.mubr.bf16.gmra.mrb[136].mxu0 %v8983_v41  ;;  %v9268_v21 = vadd.f32 %v6751_v23, %v6639_v15  ;;  %7054 = vmatpush3.bf16.msra.mxu1 %v7804_v42 }
 0x1c0   : > { %7551 = vmatprep.mubr.bf16.mxu0 %v9020_v58 }
 0x1c1   : > { %v9271_v56 = vadd.f32 %v6754_v30, %v6642_v60 }
 0x1c2   : > { %v6643_v12 = vpop.f32.mrb[32].mxu0 }
 0x1c3   : > { %v6755_v14 = vpop.f32.mrb[32].mxu1  ;;  %v6644_v33 = vpop.f32.mrb[33].mxu0 }
 0x1c4   : > { %v6645_v3 = vadd.f32 %v6644_v33, %v6643_v12  ;;  %v6756_v57 = vpop.f32.mrb[33].mxu1  ;;  %v6646_v34 = vpop.f32.mrb[34].mxu0 }
 0x1c5   : > { %v6757_v6 = vadd.f32 %v6756_v57, %v6755_v14  ;;  %v6758_v25 = vpop.f32.mrb[34].mxu1  ;;  %v6647_v44 = vpop.f32.mrb[35].mxu0 }
 0x1c6   : > { %v6648_v24 = vadd.f32 %v6647_v44, %v6646_v34  ;;  %v6759_v8 = vpop.f32.mrb[35].mxu1 }
 0x1c7   : > { %v9273_v41 = vadd.f32 %v6757_v6, %v6645_v3  ;;  %v6760_v32 = vadd.f32 %v6759_v8, %v6758_v25  ;;  %7552 = vmatmul.mubr.bf16.gmra.mrb[140].mxu0 %v9048_v39 }
 0x1c8   : > { %7555 = vmatprep.mubr.bf16.mxu0 %v9073_v29 }
 0x1c9   : > { %v9277_v58 = vadd.f32 %v6760_v32, %v6648_v24 }
 0x1ca   : > { %v6649_v36 = vpop.f32.mrb[36].mxu0 }
 0x1cb   : > { %v6761_v22 = vpop.f32.mrb[36].mxu1  ;;  %v6650_v1 = vpop.f32.mrb[37].mxu0 }
 0x1cc   : > { %v6651_v37 = vadd.f32 %v6650_v1, %v6649_v36  ;;  %v6762_v18 = vpop.f32.mrb[37].mxu1  ;;  %v6652_v51 = vpop.f32.mrb[38].mxu0 }
 0x1cd   : > { %v6763_v45 = vadd.f32 %v6762_v18, %v6761_v22  ;;  %v6764_v31 = vpop.f32.mrb[38].mxu1  ;;  %v6653_v54 = vpop.f32.mrb[39].mxu0  ;;  %v7805_v18 = vld [vmem:[#allocation9 + $0x50] sm:$0xff]  }
 0x1ce   : > { %v6654_v61 = vadd.f32 %v6653_v54, %v6652_v51  ;;  %v6765_v15 = vpop.f32.mrb[39].mxu1  ;;  %v7806_v51 = vld [vmem:[#allocation9 + $0x10] sm:$0xff]   ;;  %7055 = vmatprep.subr.bf16.mxu1 %v7805_v18 }
 0x1cf   : > { %v9279_v23 = vadd.f32 %v6763_v45, %v6651_v37  ;;  %v6766_v39 = vadd.f32 %v6765_v15, %v6764_v31  ;;  %7556 = vmatmul.mubr.bf16.gmra.mrb[144].mxu0 %v9099_v20  ;;  %v1527_v31 = vrot.slane %v9223_v55, 1  ;;  %7056 = vmatpush3.bf16.msra.mxu1 %v7806_v51 }
 0x1d0   : > { %7559 = vmatprep.mubr.bf16.mxu0 %v9121_v40 }
 0x1d1   : > { %v9283_v29 = vadd.f32 %v6766_v39, %v6654_v61 }
 0x1d2   : > { %v6655_v16 = vpop.f32.mrb[40].mxu0 }
 0x1d3   : > { %v6767_v59 = vpop.f32.mrb[40].mxu1  ;;  %v6656_v60 = vpop.f32.mrb[41].mxu0 }
 0x1d4   : > { %v6657_v63 = vadd.f32 %v6656_v60, %v6655_v16  ;;  %v6768_v49 = vpop.f32.mrb[41].mxu1  ;;  %v6658_v10 = vpop.f32.mrb[42].mxu0 }
 0x1d5   : > { %v6769_v30 = vadd.f32 %v6768_v49, %v6767_v59  ;;  %v6770_v12 = vpop.f32.mrb[42].mxu1  ;;  %v6659_v14 = vpop.f32.mrb[43].mxu0 }
 0x1d6   : > { %v6660_v33 = vadd.f32 %v6659_v14, %v6658_v10  ;;  %v6771_v3 = vpop.f32.mrb[43].mxu1 }
 0x1d7   : > { %v9285_v57 = vadd.f32 %v6769_v30, %v6657_v63  ;;  %v6772_v20 = vadd.f32 %v6771_v3, %v6770_v12  ;;  %7560 = vmatmul.mubr.bf16.gmra.mrb[148].mxu0 %v9136_v19 }
 0x1d8   : > { %7563 = vmatprep.mubr.bf16.mxu0 %v9148_v2  ;;  %v1526_v2 = vrot.slane %v9213_v7, 1 }
 0x1d9   : > { %v9289_v40 = vadd.f32 %v6772_v20, %v6660_v33 }
 0x1da   : > { %v6661_v34 = vpop.f32.mrb[44].mxu0  ;;  %v1528_v59 = vsel %vm1413_vm9, %v1526_v2, %v1527_v31 }
 0x1db   : > { %v6773_v6 = vpop.f32.mrb[44].mxu1  ;;  %v6662_v25 = vpop.f32.mrb[45].mxu0 }
 0x1dc   : > { %v6663_v44 = vadd.f32 %v6662_v25, %v6661_v34  ;;  %v6774_v24 = vpop.f32.mrb[45].mxu1  ;;  %v6664_v8 = vpop.f32.mrb[46].mxu0 }
 0x1dd   : > { %v6775_v32 = vadd.f32 %v6774_v24, %v6773_v6  ;;  %v6776_v36 = vpop.f32.mrb[46].mxu1  ;;  %v6665_v22 = vpop.f32.mrb[47].mxu0 }
 0x1de   : > { %v6666_v1 = vadd.f32 %v6665_v22, %v6664_v8  ;;  %v6777_v37 = vpop.f32.mrb[47].mxu1  ;;  %v7807_v8 = vld [vmem:[#allocation9 + $0x58] sm:$0xff]  }
 0x1df   : > { %v9291_v45 = vadd.f32 %v6775_v32, %v6663_v44  ;;  %v6778_v19 = vadd.f32 %v6777_v37, %v6776_v36  ;;  %7564 = vmatmul.mubr.bf16.gmra.mrb[152].mxu0 %v9159_v38  ;;  %v7808_v32 = vld [vmem:[#allocation9 + $0x18] sm:$0xff]   ;;  %7057 = vmatprep.subr.bf16.mxu1 %v7807_v8 }
 0x1e0   : > { %7567 = vmatprep.mubr.bf16.mxu0 %v9239_v47  ;;  %7058 = vmatpush3.bf16.msra.mxu1 %v7808_v32 }
 0x1e1   : > { %v9297_v54 = vadd.f32 %v6778_v19, %v6666_v1 }
 0x1e2   : > { %v6667_v61 = vpop.f32.mrb[48].mxu0 }
 0x1e3   : > { %v6779_v15 = vpop.f32.mrb[48].mxu1  ;;  %v6668_v27 = vpop.f32.mrb[49].mxu0 }
 0x1e4   : > { %v6669_v42 = vadd.f32 %v6668_v27, %v6667_v61  ;;  %v6780_v39 = vpop.f32.mrb[49].mxu1  ;;  %v6670_v16 = vpop.f32.mrb[50].mxu0 }
 0x1e5   : > { %v6781_v60 = vadd.f32 %v6780_v39, %v6779_v15  ;;  %v6782_v38 = vpop.f32.mrb[50].mxu1  ;;  %v6671_v63 = vpop.f32.mrb[51].mxu0 }
 0x1e6   : > { %v6672_v47 = vadd.f32 %v6671_v63, %v6670_v16  ;;  %v6783_v49 = vpop.f32.mrb[51].mxu1 }
 0x1e7   : > { %v9300_v7 = vadd.f32 %v6781_v60, %v6669_v42  ;;  %v6784_v55 = vadd.f32 %v6783_v49, %v6782_v38  ;;  %7568 = vmatmul.mubr.bf16.gmra.mrb[156].mxu0 %v1528_v59 }
 0x1e9   : > { %v9302_v10 = vadd.f32 %v6784_v55, %v6672_v47 }
 0x1ea   : > { %v6673_v30 = vpop.f32.mrb[52].mxu0 }
 0x1eb   : > { %v6785_v12 = vpop.f32.mrb[52].mxu1  ;;  %v6674_v14 = vpop.f32.mrb[53].mxu0 }
 0x1ec   : > { %v6675_v33 = vadd.f32 %v6674_v14, %v6673_v30  ;;  %v6786_v3 = vpop.f32.mrb[53].mxu1  ;;  %v6676_v20 = vpop.f32.mrb[54].mxu0 }
 0x1ed   : > { %v6787_v34 = vadd.f32 %v6786_v3, %v6785_v12  ;;  %v6788_v6 = vpop.f32.mrb[54].mxu1  ;;  %v6677_v25 = vpop.f32.mrb[55].mxu0 }
 0x1ee   : > { %v6678_v44 = vadd.f32 %v6677_v25, %v6676_v20  ;;  %v6789_v24 = vpop.f32.mrb[55].mxu1 }
 0x1ef   : > { %v9304_v36 = vadd.f32 %v6787_v34, %v6675_v33  ;;  %v6790_v22 = vadd.f32 %v6789_v24, %v6788_v6  ;;  %v7809_v34 = vld [vmem:[#allocation9 + $0x60] sm:$0xff]  }
 0x1f0   : > { %v7810_v6 = vld [vmem:[#allocation9 + $0x20] sm:$0xff]   ;;  %7059 = vmatprep.subr.bf16.mxu1 %v7809_v34 }
 0x1f1   : > { %v9306_v1 = vadd.f32 %v6790_v22, %v6678_v44  ;;  %7060 = vmatpush3.bf16.msra.mxu1 %v7810_v6 }
 0x1f2   : > { %v6679_v37 = vpop.f32.mrb[56].mxu0 }
 0x1f3   : > { %v6791_v18 = vpop.f32.mrb[56].mxu1  ;;  %v6680_v51 = vpop.f32.mrb[57].mxu0 }
 0x1f4   : > { %v6681_v19 = vadd.f32 %v6680_v51, %v6679_v37  ;;  %v6792_v2 = vpop.f32.mrb[57].mxu1  ;;  %v6682_v31 = vpop.f32.mrb[58].mxu0 }
 0x1f5   : > { %v6793_v61 = vadd.f32 %v6792_v2, %v6791_v18  ;;  %v6794_v15 = vpop.f32.mrb[58].mxu1  ;;  %v6683_v27 = vpop.f32.mrb[59].mxu0 }
 0x1f6   : > { %v6684_v42 = vadd.f32 %v6683_v27, %v6682_v31  ;;  %v6795_v39 = vpop.f32.mrb[59].mxu1 }
 0x1f7   : > { %v9308_v16 = vadd.f32 %v6793_v61, %v6681_v19  ;;  %v6796_v59 = vadd.f32 %v6795_v39, %v6794_v15 }
 0x1f9   : > { %v9310_v60 = vadd.f32 %v6796_v59, %v6684_v42 }
 0x1fa   : > { %v6685_v38 = vpop.f32.mrb[60].mxu0 }
 0x1fb   : > { %v6797_v63 = vpop.f32.mrb[60].mxu1  ;;  %v6686_v47 = vpop.f32.mrb[61].mxu0 }
 0x1fc   : > { %v6687_v49 = vadd.f32 %v6686_v47, %v6685_v38  ;;  %v6798_v55 = vpop.f32.mrb[61].mxu1  ;;  %v6688_v30 = vpop.f32.mrb[62].mxu0 }
 0x1fd   : > { %v6799_v12 = vadd.f32 %v6798_v55, %v6797_v63  ;;  %v6800_v14 = vpop.f32.mrb[62].mxu1  ;;  %v6689_v33 = vpop.f32.mrb[63].mxu0 }
 0x1fe   : > { %v6690_v3 = vadd.f32 %v6689_v33, %v6688_v30  ;;  %v6801_v20 = vpop.f32.mrb[63].mxu1 }
 0x1ff   : > { %v9312_v25 = vadd.f32 %v6799_v12, %v6687_v49  ;;  %v6802_v44 = vadd.f32 %v6801_v20, %v6800_v14 }
 0x201   : > { %v9314_v24 = vadd.f32 %v6802_v44, %v6690_v3 }
 0x202   : > { %v6819_v8 = vpop.f32.mrb[64].mxu0 }
 0x203   : > { %v6820_v32 = vpop.f32.mrb[65].mxu0  ;;  %v6931_v22 = vpop.f32.mrb[64].mxu1 }
 0x204   : > { %v6821_v37 = vadd.f32 %v6820_v32, %v6819_v8  ;;  %v6822_v18 = vpop.f32.mrb[66].mxu0  ;;  %v6932_v51 = vpop.f32.mrb[65].mxu1 }
 0x205   : > { %v6823_v19 = vpop.f32.mrb[67].mxu0  ;;  %v6933_v2 = vadd.f32 %v6932_v51, %v6931_v22  ;;  %v6934_v31 = vpop.f32.mrb[66].mxu1 }
 0x206   : > { %v2463_v61 = vadd.f32 %v6821_v37, %v9201_v4  ;;  %v6824_v15 = vadd.f32 %v6823_v19, %v6822_v18  ;;  %v6935_v27 = vpop.f32.mrb[67].mxu1 }
 0x207   : > { %v6936_v42 = vadd.f32 %v6935_v27, %v6934_v31 }
 0x208   : > { %v2466_v39 = vadd.f32 %v6824_v15, %v9209_v11  ;;  %v9318_v59 = vadd.f32 %v6933_v2, %v2463_v61 }
 0x20a   : > { %v6825_v38 = vpop.f32.mrb[68].mxu0  ;;  %v9320_v63 = vadd.f32 %v6936_v42, %v2466_v39 }
 0x20b   : > { %v6826_v47 = vpop.f32.mrb[69].mxu0  ;;  %v6937_v49 = vpop.f32.mrb[68].mxu1 }
 0x20c   : > { %v6827_v55 = vadd.f32 %v6826_v47, %v6825_v38  ;;  %v6828_v30 = vpop.f32.mrb[70].mxu0  ;;  %v6938_v12 = vpop.f32.mrb[69].mxu1 }
 0x20d   : > { %v6829_v14 = vpop.f32.mrb[71].mxu0  ;;  %v6939_v33 = vadd.f32 %v6938_v12, %v6937_v49  ;;  %v6940_v3 = vpop.f32.mrb[70].mxu1 }
 0x20e   : > { %v2471_v4 = vadd.f32 %v6827_v55, %v9216_v26  ;;  %v6830_v20 = vadd.f32 %v6829_v14, %v6828_v30  ;;  %v6941_v34 = vpop.f32.mrb[71].mxu1 }
 0x20f   : > { %v6942_v6 = vadd.f32 %v6941_v34, %v6940_v3 }
 0x210   : > { %v2474_v11 = vadd.f32 %v6830_v20, %v9221_v53  ;;  %v9324_v44 = vadd.f32 %v6939_v33, %v2471_v4 }
 0x212   : > { %v6831_v8 = vpop.f32.mrb[72].mxu0  ;;  %v9326_v32 = vadd.f32 %v6942_v6, %v2474_v11 }
 0x213   : > { %v6832_v22 = vpop.f32.mrb[73].mxu0  ;;  %v6943_v37 = vpop.f32.mrb[72].mxu1 }
 0x214   : > { %v6833_v18 = vadd.f32 %v6832_v22, %v6831_v8  ;;  %v6834_v51 = vpop.f32.mrb[74].mxu0  ;;  %v6944_v19 = vpop.f32.mrb[73].mxu1 }
 0x215   : > { %v6835_v2 = vpop.f32.mrb[75].mxu0  ;;  %v6945_v31 = vadd.f32 %v6944_v19, %v6943_v37  ;;  %v6946_v61 = vpop.f32.mrb[74].mxu1 }
 0x216   : > { %v2479_v26 = vadd.f32 %v6833_v18, %v9230_v62  ;;  %v6836_v15 = vadd.f32 %v6835_v2, %v6834_v51  ;;  %v6947_v27 = vpop.f32.mrb[75].mxu1 }
 0x217   : > { %v6948_v42 = vadd.f32 %v6947_v27, %v6946_v61 }
 0x218   : > { %v2482_v53 = vadd.f32 %v6836_v15, %v9236_v9  ;;  %v9330_v39 = vadd.f32 %v6945_v31, %v2479_v26  ;;  %v7815_v15 = vld [vmem:[#allocation9 + $0xc0] sm:$0xff]  }
 0x219   : > { %7163 = vmatprep.subr.bf16.mxu0 %v7815_v15 }
 0x21a   : > { %v6837_v38 = vpop.f32.mrb[76].mxu0  ;;  %v9332_v47 = vadd.f32 %v6948_v42, %v2482_v53 }
 0x21b   : > { %v6838_v49 = vpop.f32.mrb[77].mxu0  ;;  %v6949_v55 = vpop.f32.mrb[76].mxu1 }
 0x21c   : > { %v6839_v30 = vadd.f32 %v6838_v49, %v6837_v38  ;;  %v6840_v12 = vpop.f32.mrb[78].mxu0  ;;  %v6950_v14 = vpop.f32.mrb[77].mxu1 }
 0x21d   : > { %v6841_v33 = vpop.f32.mrb[79].mxu0  ;;  %v6951_v3 = vadd.f32 %v6950_v14, %v6949_v55  ;;  %v6952_v4 = vpop.f32.mrb[78].mxu1  ;;  %v7811_v55 = vld [vmem:[#allocation9 + $0x68] sm:$0xff]  }
 0x21e   : > { %v2487_v62 = vadd.f32 %v6839_v30, %v9243_v46  ;;  %v6842_v20 = vadd.f32 %v6841_v33, %v6840_v12  ;;  %v6953_v34 = vpop.f32.mrb[79].mxu1  ;;  %7061 = vmatprep.subr.bf16.mxu1 %v7811_v55  ;;  %v7818_v55 = vld [vmem:[#allocation9 + $0x88] sm:$0xff]  }
 0x21f   : > { %v6954_v6 = vadd.f32 %v6953_v34, %v6952_v4 }
 0x220   : > { %v2490_v9 = vadd.f32 %v6842_v20, %v9247_v0  ;;  %v9336_v11 = vadd.f32 %v6951_v3, %v2487_v62 }
 0x222   : > { %v6843_v8 = vpop.f32.mrb[80].mxu0  ;;  %v9338_v22 = vadd.f32 %v6954_v6, %v2490_v9 }
 0x223   : > { %v6844_v37 = vpop.f32.mrb[81].mxu0  ;;  %v6955_v18 = vpop.f32.mrb[80].mxu1 }
 0x224   : > { %v6845_v51 = vadd.f32 %v6844_v37, %v6843_v8  ;;  %v6846_v19 = vpop.f32.mrb[82].mxu0  ;;  %v6956_v2 = vpop.f32.mrb[81].mxu1 }
 0x225   : > { %v6847_v31 = vpop.f32.mrb[83].mxu0  ;;  %v6957_v61 = vadd.f32 %v6956_v2, %v6955_v18  ;;  %v6958_v26 = vpop.f32.mrb[82].mxu1  ;;  %v7816_v2 = vld [vmem:[#allocation9 + $0x80] sm:$0xff]  }
 0x226   : > { %v2495_v46 = vadd.f32 %v6845_v51, %v9249_v13  ;;  %v6848_v27 = vadd.f32 %v6847_v31, %v6846_v19  ;;  %v6959_v42 = vpop.f32.mrb[83].mxu1  ;;  %7164 = vmatpush3.bf16.msra.mxu0 %v7816_v2 }
 0x227   : > { %v6960_v53 = vadd.f32 %v6959_v42, %v6958_v26 }
 0x228   : > { %v2498_v0 = vadd.f32 %v6848_v27, %v9253_v28  ;;  %v9342_v38 = vadd.f32 %v6957_v61, %v2495_v46  ;;  %v7812_v28 = vld [vmem:[#allocation9 + $0x28] sm:$0xff]  }
 0x229   : > { %7062 = vmatpush3.bf16.msra.mxu1 %v7812_v28 }
 0x22a   : > { %v6849_v49 = vpop.f32.mrb[84].mxu0  ;;  %v9344_v30 = vadd.f32 %v6960_v53, %v2498_v0  ;;  %v7817_v53 = vld [vmem:[#allocation9 + $0xc8] sm:$0xff]  }
 0x22b   : > { %v6850_v12 = vpop.f32.mrb[85].mxu0  ;;  %v6961_v14 = vpop.f32.mrb[84].mxu1  ;;  %7165 = vmatprep.subr.bf16.mxu0 %v7817_v53 }
 0x22c   : > { %v6851_v33 = vadd.f32 %v6850_v12, %v6849_v49  ;;  %v6852_v3 = vpop.f32.mrb[86].mxu0  ;;  %v6962_v4 = vpop.f32.mrb[85].mxu1  ;;  %7166 = vmatpush3.bf16.msra.mxu0 %v7818_v55 }
 0x22d   : > { %v6853_v62 = vpop.f32.mrb[87].mxu0  ;;  %v6963_v13 = vadd.f32 %v6962_v4, %v6961_v14  ;;  %v6964_v20 = vpop.f32.mrb[86].mxu1  ;;  %v7819_v4 = vld [vmem:[#allocation9 + $0xd0] sm:$0xff]  }
 0x22e   : > { %v2503_v34 = vadd.f32 %v6851_v33, %v9256_v35  ;;  %v6854_v6 = vadd.f32 %v6853_v62, %v6852_v3  ;;  %v6965_v9 = vpop.f32.mrb[87].mxu1  ;;  %v7813_v3 = vld [vmem:[#allocation9 + $0x70] sm:$0xff]   ;;  %7167 = vmatprep.subr.bf16.mxu0 %v7819_v4 }
 0x22f   : > { %v6966_v8 = vadd.f32 %v6965_v9, %v6964_v20  ;;  %7063 = vmatprep.subr.bf16.mxu1 %v7813_v3 }
 0x230   : > { %v2506_v37 = vadd.f32 %v6854_v6, %v9259_v5  ;;  %v9348_v18 = vadd.f32 %v6963_v13, %v2503_v34  ;;  %v7814_v13 = vld [vmem:[#allocation9 + $0x30] sm:$0xff]  }
 0x231   : > { %7064 = vmatpush3.bf16.msra.mxu1 %v7814_v13 }
 0x232   : > { %v6855_v51 = vpop.f32.mrb[88].mxu0  ;;  %v9350_v19 = vadd.f32 %v6966_v8, %v2506_v37  ;;  %v7820_v8 = vld [vmem:[#allocation9 + $0x90] sm:$0xff]  }
 0x233   : > { %v6856_v31 = vpop.f32.mrb[89].mxu0  ;;  %v6967_v61 = vpop.f32.mrb[88].mxu1  ;;  %7168 = vmatpush3.bf16.msra.mxu0 %v7820_v8 }
 0x234   : > { %v6857_v26 = vadd.f32 %v6856_v31, %v6855_v51  ;;  %v6858_v15 = vpop.f32.mrb[90].mxu0  ;;  %v6968_v46 = vpop.f32.mrb[89].mxu1 }
 0x235   : > { %v6859_v35 = vpop.f32.mrb[91].mxu0  ;;  %v6969_v27 = vadd.f32 %v6968_v46, %v6967_v61  ;;  %v6970_v42 = vpop.f32.mrb[90].mxu1 }
 0x236   : > { %v2511_v0 = vadd.f32 %v6857_v26, %v9262_v48  ;;  %v6860_v5 = vadd.f32 %v6859_v35, %v6858_v15  ;;  %v6971_v49 = vpop.f32.mrb[91].mxu1  ;;  %v7821_v15 = vld [vmem:[#allocation9 + $0xd8] sm:$0xff]  }
 0x237   : > { %v6972_v12 = vadd.f32 %v6971_v49, %v6970_v42  ;;  %7169 = vmatprep.subr.bf16.mxu0 %v7821_v15 }
 0x238   : > { %v2514_v14 = vadd.f32 %v6860_v5, %v9265_v17  ;;  %v9354_v33 = vadd.f32 %v6969_v27, %v2511_v0  ;;  %v7822_v27 = vld [vmem:[#allocation9 + $0x98] sm:$0xff]  }
 0x239   : > { %7170 = vmatpush3.bf16.msra.mxu0 %v7822_v27 }
 0x23a   : > { %v6861_v62 = vpop.f32.mrb[92].mxu0  ;;  %v9356_v20 = vadd.f32 %v6972_v12, %v2514_v14 }
 0x23b   : > { %v6862_v34 = vpop.f32.mrb[93].mxu0  ;;  %v6973_v6 = vpop.f32.mrb[92].mxu1 }
 0x23c   : > { %v6863_v48 = vadd.f32 %v6862_v34, %v6861_v62  ;;  %v6864_v9 = vpop.f32.mrb[94].mxu0  ;;  %v6974_v28 = vpop.f32.mrb[93].mxu1 }
 0x23d   : > { %v6865_v37 = vpop.f32.mrb[95].mxu0  ;;  %v6975_v17 = vadd.f32 %v6974_v28, %v6973_v6  ;;  %v6976_v51 = vpop.f32.mrb[94].mxu1 }
 0x23e   : > { %v2519_v2 = vadd.f32 %v6863_v48, %v9268_v21  ;;  %v6866_v31 = vadd.f32 %v6865_v37, %v6864_v9  ;;  %v6977_v61 = vpop.f32.mrb[95].mxu1 }
 0x23f   : > { %v6978_v26 = vadd.f32 %v6977_v61, %v6976_v51 }
 0x240   : > { %v2522_v46 = vadd.f32 %v6866_v31, %v9271_v56  ;;  %v9360_v35 = vadd.f32 %v6975_v17, %v2519_v2  ;;  %v7825_v2 = vld [vmem:[#allocation9 + $0xe0] sm:$0xff]  }
 0x241   : > { %7171 = vmatprep.subr.bf16.mxu0 %v7825_v2 }
 0x242   : > { %v6867_v42 = vpop.f32.mrb[96].mxu0  ;;  %v9362_v53 = vadd.f32 %v6978_v26, %v2522_v46 }
 0x243   : > { %v6868_v0 = vpop.f32.mrb[97].mxu0  ;;  %v6979_v5 = vpop.f32.mrb[96].mxu1 }
 0x244   : > { %v6869_v49 = vadd.f32 %v6868_v0, %v6867_v42  ;;  %v6870_v55 = vpop.f32.mrb[98].mxu0  ;;  %v6980_v21 = vpop.f32.mrb[97].mxu1 }
 0x245   : > { %v6871_v12 = vpop.f32.mrb[99].mxu0  ;;  %v6981_v14 = vadd.f32 %v6980_v21, %v6979_v5  ;;  %v6982_v3 = vpop.f32.mrb[98].mxu1  ;;  %v7827_v5 = vld [vmem:[#allocation9 + $0xe8] sm:$0xff]  }
 0x246   : > { %v2527_v4 = vadd.f32 %v6869_v49, %v9273_v41  ;;  %v6872_v62 = vadd.f32 %v6871_v12, %v6870_v55  ;;  %v6983_v56 = vpop.f32.mrb[99].mxu1  ;;  %v7826_v41 = vld [vmem:[#allocation9 + $0xa0] sm:$0xff]   ;;  %v7828_v49 = vld [vmem:[#allocation9 + $0xa8] sm:$0xff]  }
 0x247   : > { %v6984_v13 = vadd.f32 %v6983_v56, %v6982_v3  ;;  %7172 = vmatpush3.bf16.msra.mxu0 %v7826_v41  ;;  %v7823_v3 = vld [vmem:[#allocation9 + $0x78] sm:$0xff]  }
 0x248   : > { %v2530_v34 = vadd.f32 %v6872_v62, %v9277_v58  ;;  %v9366_v6 = vadd.f32 %v6981_v14, %v2527_v4  ;;  %7173 = vmatprep.subr.bf16.mxu0 %v7827_v5  ;;  %7065 = vmatprep.subr.bf16.mxu1 %v7823_v3  ;;  %v7831_v3 = vld [vmem:[#allocation3] sm:$0xff]  }
 0x24a   : > { %v6873_v48 = vpop.f32.mrb[100].mxu0  ;;  %v9368_v9 = vadd.f32 %v6984_v13, %v2530_v34 }
 0x24b   : > { %v6874_v28 = vpop.f32.mrb[101].mxu0  ;;  %v6985_v8 = vpop.f32.mrb[100].mxu1  ;;  %7174 = vmatpush3.bf16.msra.mxu0 %v7828_v49 }
 0x24c   : > { %v6875_v37 = vadd.f32 %v6874_v28, %v6873_v48  ;;  %v6876_v17 = vpop.f32.mrb[102].mxu0  ;;  %v6986_v51 = vpop.f32.mrb[101].mxu1  ;;  %v7829_v48 = vld [vmem:[#allocation9 + $0xf0] sm:$0xff]  }
 0x24d   : > { %v6877_v31 = vpop.f32.mrb[103].mxu0  ;;  %v6987_v61 = vadd.f32 %v6986_v51, %v6985_v8  ;;  %v6988_v26 = vpop.f32.mrb[102].mxu1  ;;  %7175 = vmatprep.subr.bf16.mxu0 %v7829_v48 }
 0x24e   : > { %v2535_v15 = vadd.f32 %v6875_v37, %v9279_v23  ;;  %v6878_v46 = vadd.f32 %v6877_v31, %v6876_v17  ;;  %v6989_v27 = vpop.f32.mrb[103].mxu1 }
 0x24f   : > { %v6990_v58 = vadd.f32 %v6989_v27, %v6988_v26 }
 0x250   : > { %v2538_v42 = vadd.f32 %v6878_v46, %v9283_v29  ;;  %v9372_v0 = vadd.f32 %v6987_v61, %v2535_v15  ;;  %v7824_v29 = vld [vmem:[#allocation9 + $0x38] sm:$0xff]  }
 0x251   : > { %7066 = vmatpush3.bf16.msra.mxu1 %v7824_v29 }
 0x252   : > { %v6879_v55 = vpop.f32.mrb[104].mxu0  ;;  %v9374_v21 = vadd.f32 %v6990_v58, %v2538_v42 }
 0x253   : > { %v6880_v12 = vpop.f32.mrb[105].mxu0  ;;  %v6991_v14 = vpop.f32.mrb[104].mxu1 }
 0x254   : > { %v6881_v23 = vadd.f32 %v6880_v12, %v6879_v55  ;;  %v6882_v4 = vpop.f32.mrb[106].mxu0  ;;  %v6992_v62 = vpop.f32.mrb[105].mxu1 }
 0x255   : > { %v6883_v56 = vpop.f32.mrb[107].mxu0  ;;  %v6993_v13 = vadd.f32 %v6992_v62, %v6991_v14  ;;  %v6994_v34 = vpop.f32.mrb[106].mxu1  ;;  %v7832_v62 = vld [vmem:[#allocation3 + $0x8] ss:$0 sps:$4 sm:$0x11]  }
 0x256   : > { %v2543_v28 = vadd.f32 %v6881_v23, %v9285_v57  ;;  %v6884_v8 = vadd.f32 %v6883_v56, %v6882_v4  ;;  %v6995_v37 = vpop.f32.mrb[107].mxu1  ;;  %v3943_v56 = vshll.u32 %v7831_v3, 16 }
 0x257   : > { %v6996_v17 = vadd.f32 %v6995_v37, %v6994_v34 }
 0x258   : > { %v2546_v51 = vadd.f32 %v6884_v8, %v9289_v40  ;;  %v9378_v2 = vadd.f32 %v6993_v13, %v2543_v28  ;;  %v3941_v8 = vshrl.u32 %v7831_v3, 16 }
 0x25a   : > { %v6885_v31 = vpop.f32.mrb[108].mxu0  ;;  %v9380_v61 = vadd.f32 %v6996_v17, %v2546_v51 }
 0x25b   : > { %v6886_v26 = vpop.f32.mrb[109].mxu0  ;;  %v6997_v41 = vpop.f32.mrb[108].mxu1 }
 0x25c   : > { %v6887_v15 = vadd.f32 %v6886_v26, %v6885_v31  ;;  %v6888_v46 = vpop.f32.mrb[110].mxu0  ;;  %v6998_v27 = vpop.f32.mrb[109].mxu1  ;;  %v7830_v31 = vld [vmem:[#allocation9 + $0xb0] sm:$0xff]  }
 0x25d   : > { %v6889_v58 = vpop.f32.mrb[111].mxu0  ;;  %v6999_v42 = vadd.f32 %v6998_v27, %v6997_v41  ;;  %v7000_v57 = vpop.f32.mrb[110].mxu1  ;;  %7176 = vmatpush3.bf16.msra.mxu0 %v7830_v31 }
 0x25e   : > { %v2551_v5 = vadd.f32 %v6887_v15, %v9291_v45  ;;  %v6890_v49 = vadd.f32 %v6889_v58, %v6888_v46  ;;  %v7001_v55 = vpop.f32.mrb[111].mxu1  ;;  %v3945_v45 = vrot.slane %v3943_v56, 1  ;;  %v4148_v56 = vrot.slane %v7831_v3, 1 }
 0x25f   : > { %v7002_v12 = vadd.f32 %v7001_v55, %v7000_v57  ;;  %v7834_v55 = vld [vmem:[#allocation9 + $0xb8] sm:$0xff]  }
 0x260   : > { %v2554_v40 = vadd.f32 %v6890_v49, %v9297_v54  ;;  %v9384_v14 = vadd.f32 %v6999_v42, %v2551_v5  ;;  %v3948_v54 = vshll.u32 %v7832_v62, 16  ;;  %v3946_v46 = vor.u32 %v3945_v45, %v3941_v8  ;;  %v7833_v5 = vld [vmem:[#allocation9 + $0xf8] sm:$0xff]  }
 0x261   : > { %7177 = vmatprep.subr.bf16.mxu0 %v7833_v5 }
 0x262   : > { %v6891_v23 = vpop.f32.mrb[112].mxu0  ;;  %v9386_v4 = vadd.f32 %v7002_v12, %v2554_v40  ;;  %v3950_v58 = vrot.slane %v3948_v54, 1  ;;  %7178 = vmatpush3.bf16.msra.mxu0 %v7834_v55 }
 0x263   : > { %v6892_v13 = vpop.f32.mrb[113].mxu0  ;;  %v7003_v34 = vpop.f32.mrb[112].mxu1 }
 0x264   : > { %v6893_v29 = vadd.f32 %v6892_v13, %v6891_v23  ;;  %v6894_v48 = vpop.f32.mrb[114].mxu0  ;;  %v7004_v28 = vpop.f32.mrb[113].mxu1  ;;  %v3951_v49 = vsel %vm1204_vm7, %v3946_v46, %v3950_v58  ;;  %v4149_v13 = vrot.slane %v7832_v62, 1 }
 0x265   : > { %v6895_v37 = vpop.f32.mrb[115].mxu0  ;;  %v7005_v17 = vadd.f32 %v7004_v28, %v7003_v34  ;;  %v7006_v51 = vpop.f32.mrb[114].mxu1  ;;  %4872 = vmatprep.mubr.bf16.mxu1 %v3951_v49 }
 0x266   : > { %v2559_v26 = vadd.f32 %v6893_v29, %v9300_v7  ;;  %v6896_v41 = vadd.f32 %v6895_v37, %v6894_v48  ;;  %v7007_v15 = vpop.f32.mrb[115].mxu1  ;;  %4873 = vmatmul.mubr.bf16.vlgmr.msra.gmra.mrb[128].mxu1 %v7831_v3  ;;  %v9396_v45 = vsel %vm1413_vm9, %v4148_v56, %v4149_v13 }
 0x267   : > { %v7008_v27 = vadd.f32 %v7007_v15, %v7006_v51 }
 0x268   : > { %v2562_v42 = vadd.f32 %v6896_v41, %v9302_v10  ;;  %v9390_v57 = vadd.f32 %v7005_v17, %v2559_v26 }
 0x26a   : > { %v6897_v12 = vpop.f32.mrb[116].mxu0  ;;  %v9393_v40 = vadd.f32 %v7008_v27, %v2562_v42 }
 0x26b   : > { %v6898_v7 = vpop.f32.mrb[117].mxu0  ;;  %v7009_v23 = vpop.f32.mrb[116].mxu1 }
 0x26c   : > { %v6899_v34 = vadd.f32 %v6898_v7, %v6897_v12  ;;  %v6900_v29 = vpop.f32.mrb[118].mxu0  ;;  %v7010_v10 = vpop.f32.mrb[117].mxu1 }
 0x26d   : > { %v6901_v48 = vpop.f32.mrb[119].mxu0  ;;  %v7011_v28 = vadd.f32 %v7010_v10, %v7009_v23  ;;  %v7012_v8 = vpop.f32.mrb[118].mxu1 }
 0x26e   : > { %v2567_v37 = vadd.f32 %v6899_v34, %v9304_v36  ;;  %v6902_v17 = vadd.f32 %v6901_v48, %v6900_v29  ;;  %v7013_v51 = vpop.f32.mrb[119].mxu1 }
 0x26f   : > { %v7014_v31 = vadd.f32 %v7013_v51, %v7012_v8 }
 0x270   : > { %v2570_v54 = vadd.f32 %v6902_v17, %v9306_v1  ;;  %v9400_v26 = vadd.f32 %v7011_v28, %v2567_v37 }
 0x272   : > { %v6903_v3 = vpop.f32.mrb[120].mxu0  ;;  %v9402_v62 = vadd.f32 %v7014_v31, %v2570_v54 }
 0x273   : > { %v6904_v41 = vpop.f32.mrb[121].mxu0  ;;  %v7015_v15 = vpop.f32.mrb[120].mxu1 }
 0x274   : > { %v6905_v46 = vadd.f32 %v6904_v41, %v6903_v3  ;;  %v6906_v27 = vpop.f32.mrb[122].mxu0  ;;  %v7016_v58 = vpop.f32.mrb[121].mxu1  ;;  %v9417_v41 = vld [vmem:[%s10733_s2] ss:$0 sm:$0xff] }
 0x275   : > { %v6907_v42 = vpop.f32.mrb[123].mxu0  ;;  %v7017_v5 = vadd.f32 %v7016_v58, %v7015_v15  ;;  %v7018_v49 = vpop.f32.mrb[122].mxu1 }
 0x276   : > { %v2575_v36 = vadd.f32 %v6905_v46, %v9308_v16  ;;  %v6908_v55 = vadd.f32 %v6907_v42, %v6906_v27  ;;  %v7019_v12 = vpop.f32.mrb[123].mxu1 }
 0x277   : > { %v7020_v7 = vadd.f32 %v7019_v12, %v7018_v49 }
 0x278   : > { %v2578_v1 = vadd.f32 %v6908_v55, %v9310_v60  ;;  %v9406_v23 = vadd.f32 %v7017_v5, %v2575_v36 }
 0x27a   : > { %10759 = vst [vmem:[#allocation14_spill] sm:$0xff] %v9406_v23  ;;  %v6909_v56 = vpop.f32.mrb[124].mxu0  ;;  %v9408_v13 = vadd.f32 %v7020_v7, %v2578_v1  ;;  %v3632_v23 = vld [vmem:[#allocation3 + $0x14] sm:$0x1] }
 0x27b   : > { %v6910_v34 = vpop.f32.mrb[125].mxu0  ;;  %v7021_v29 = vpop.f32.mrb[124].mxu1 }
 0x27c   : > { %10760 = vst [vmem:[#allocation15_spill] sm:$0xff] %v9408_v13  ;;  %v6911_v10 = vadd.f32 %v6910_v34, %v6909_v56  ;;  %v6912_v48 = vpop.f32.mrb[126].mxu0  ;;  %v7022_v28 = vpop.f32.mrb[125].mxu1  ;;  %v3639_v13 = vld [vmem:[#allocation3 + $0x20] sm:$0x1] }
 0x27d   : > { %v6913_v8 = vpop.f32.mrb[127].mxu0  ;;  %v7023_v37 = vadd.f32 %v7022_v28, %v7021_v29  ;;  %v7024_v17 = vpop.f32.mrb[126].mxu1 }
 0x27e   : > { %v2583_v16 = vadd.f32 %v6911_v10, %v9312_v25  ;;  %v6914_v51 = vadd.f32 %v6913_v8, %v6912_v48  ;;  %v7025_v31 = vpop.f32.mrb[127].mxu1  ;;  %v9425_v25 = vld [vmem:[%s10734_s3] ss:$0 sm:$0xff] }
 0x27f   : > { %v7026_v54 = vadd.f32 %v7025_v31, %v7024_v17 }
 0x280   : > { %v2586_v60 = vadd.f32 %v6914_v51, %v9314_v24  ;;  %v9412_v3 = vadd.f32 %v7023_v37, %v2583_v16 }
 0x282   : > { %10761 = vst [vmem:[#allocation16_spill] sm:$0xff] %v9412_v3  ;;  %v7541_v15 = vpop.f32.mrb[128].mxu0  ;;  %v9419_v46 = vadd.f32 %v7026_v54, %v2586_v60 }
 0x283   : > { %v2793_v27 = vadd.f32 %v7541_v15, %v9324_v44  ;;  %v2784_v58 = vpop.f32.mrb[129].mxu0 }
 0x284   : > { %10762 = vst [vmem:[#allocation17_spill] sm:$0xff] %v9419_v46  ;;  %v2785_v24 = vadd.f32 %v2784_v58, %v9318_v59  ;;  %v7542_v42 = vpop.f32.mrb[130].mxu0 }
 0x285   : > { %v2919_v5 = vmul.f32 %v9417_v41, %v2793_v27  ;;  %v2796_v49 = vadd.f32 %v7542_v42, %v9326_v32  ;;  %v2787_v36 = vpop.f32.mrb[131].mxu0 }
 0x286   : > { %v2917_v55 = vmul.f32 %v9417_v41, %v2785_v24  ;;  %v2788_v12 = vadd.f32 %v2787_v36, %v9320_v63 }
 0x287   : > { %v9433_v44 = vadd.f32 %v9425_v25, %v2919_v5  ;;  %v2920_v7 = vmul.f32 %v9417_v41, %v2796_v49 }
 0x288   : > { %v9437_v1 = vadd.f32 %v9425_v25, %v2917_v55  ;;  %v2918_v59 = vmul.f32 %v9417_v41, %v2788_v12 }
 0x289   : > { %v6304_v56 = vmul.f32 -1.442695, %v9433_v44  ;;  %v9442_v34 = vadd.f32 %v9425_v25, %v2920_v7 }
 0x28a   : > { %v6302_v32 = vmul.f32 -1.442695, %v9437_v1  ;;  %v9446_v29 = vadd.f32 %v9425_v25, %v2918_v59  ;;  %v7545_v63 = vpop.f32.mrb[132].mxu0 }
 0x28b   : > { %7909 = vpow2.f32 %v6304_v56  ;;  %v6305_v10 = vmul.f32 -1.442695, %v9442_v34  ;;  %v2809_v48 = vadd.f32 %v7545_v63, %v9336_v11  ;;  %v2800_v28 = vpop.f32.mrb[133].mxu0 }
 0x28c   : > { %7911 = vpow2.f32 %v6302_v32  ;;  %v6303_v8 = vmul.f32 -1.442695, %v9446_v29  ;;  %v2801_v37 = vadd.f32 %v2800_v28, %v9330_v39  ;;  %v7546_v17 = vpop.f32.mrb[134].mxu0 }
 0x28d   : > { %7913 = vpow2.f32 %v6305_v10  ;;  %v2923_v16 = vmul.f32 %v9417_v41, %v2809_v48  ;;  %v2812_v51 = vadd.f32 %v7546_v17, %v9338_v22  ;;  %v2803_v31 = vpop.f32.mrb[135].mxu0 }
 0x28e   : > { %7915 = vpow2.f32 %v6303_v8  ;;  %v2921_v54 = vmul.f32 %v9417_v41, %v2801_v37  ;;  %v2804_v60 = vadd.f32 %v2803_v31, %v9332_v47  ;;  %v7836_v8 = vld [vmem:[#allocation9 + $0x140] sm:$0xff]  }
 0x28f   : > { %v9457_v11 = vadd.f32 %v9425_v25, %v2923_v16  ;;  %v2924_v15 = vmul.f32 %v9417_v41, %v2812_v51  ;;  %v7837_v51 = vld [vmem:[#allocation9 + $0x100] sm:$0xff]   ;;  %7275 = vmatprep.subr.bf16.mxu1 %v7836_v8 }
 0x290   : > { %v9461_v27 = vadd.f32 %v9425_v25, %v2921_v54  ;;  %v2922_v39 = vmul.f32 %v9417_v41, %v2804_v60  ;;  %7276 = vmatpush3.bf16.msra.mxu1 %v7837_v51 }
 0x291   : > { %v6308_v58 = vmul.f32 -1.442695, %v9457_v11  ;;  %v9466_v22 = vadd.f32 %v9425_v25, %v2924_v15 }
 0x292   : > { %v6306_v24 = vmul.f32 -1.442695, %v9461_v27  ;;  %v9470_v42 = vadd.f32 %v9425_v25, %v2922_v39  ;;  %v7549_v47 = vpop.f32.mrb[136].mxu0 }
 0x293   : > { %7917 = vpow2.f32 %v6308_v58  ;;  %v6309_v5 = vmul.f32 -1.442695, %v9466_v22  ;;  %v2825_v49 = vadd.f32 %v7549_v47, %v9348_v18  ;;  %v2816_v36 = vpop.f32.mrb[137].mxu0  ;;  %v7842_v58 = vld [vmem:[#allocation9 + $0x148] sm:$0xff]  }
 0x294   : > { %7919 = vpow2.f32 %v6306_v24  ;;  %v6307_v55 = vmul.f32 -1.442695, %v9470_v42  ;;  %v2817_v12 = vadd.f32 %v2816_v36, %v9342_v38  ;;  %v7550_v7 = vpop.f32.mrb[138].mxu0  ;;  %v7848_v36 = vld [vmem:[#allocation9 + $0x150] sm:$0xff]   ;;  %7277 = vmatprep.subr.bf16.mxu1 %v7842_v58 }
 0x295   : > { %v7910_v59 = vpop.eup %7909  ;;  %7921 = vpow2.f32 %v6309_v5  ;;  %v2927_v56 = vmul.f32 %v9417_v41, %v2825_v49  ;;  %v2828_v32 = vadd.f32 %v7550_v7, %v9350_v19  ;;  %v2819_v63 = vpop.f32.mrb[139].mxu0  ;;  %v7844_v49 = vld [vmem:[#allocation9 + $0x108] sm:$0xff]  }
 0x296   : > { %v7912_v10 = vpop.eup %7911  ;;  %v3085_v48 = vadd.f32 1.0, %v7910_v59  ;;  %7923 = vpow2.f32 %v6307_v55  ;;  %v2925_v28 = vmul.f32 %v9417_v41, %v2817_v12  ;;  %v2820_v18 = vadd.f32 %v2819_v63, %v9344_v30  ;;  %7278 = vmatpush3.bf16.msra.mxu1 %v7844_v49 }
 0x297   : > { %v7914_v37 = vpop.eup %7913  ;;  %v3083_v17 = vadd.f32 1.0, %v7912_v10  ;;  %v9481_v38 = vadd.f32 %v9425_v25, %v2927_v56  ;;  %v2928_v16 = vmul.f32 %v9417_v41, %v2828_v32  ;;  %7279 = vmatprep.subr.bf16.mxu1 %v7848_v36 }
 0x298   : > { %v7916_v31 = vpop.eup %7915  ;;  %7925 = vrcp.f32 %v3085_v48  ;;  %v3086_v19 = vadd.f32 1.0, %v7914_v37  ;;  %v9485_v54 = vadd.f32 %v9425_v25, %v2925_v28  ;;  %v2926_v60 = vmul.f32 %v9417_v41, %v2820_v18  ;;  %v7850_v18 = vld [vmem:[#allocation9 + $0x110] sm:$0xff]  }
 0x299   : > { %7927 = vrcp.f32 %v3083_v17  ;;  %v3084_v30 = vadd.f32 1.0, %v7916_v31  ;;  %v6312_v15 = vmul.f32 -1.442695, %v9481_v38  ;;  %v9490_v39 = vadd.f32 %v9425_v25, %v2928_v16 }
 0x29a   : > { %7929 = vrcp.f32 %v3086_v19  ;;  %v6310_v24 = vmul.f32 -1.442695, %v9485_v54  ;;  %v9494_v47 = vadd.f32 %v9425_v25, %v2926_v60  ;;  %v7553_v5 = vpop.f32.mrb[140].mxu0  ;;  %7280 = vmatpush3.bf16.msra.mxu1 %v7850_v18 }
 0x29b   : > { %7931 = vrcp.f32 %v3084_v30  ;;  %v6313_v55 = vmul.f32 -1.442695, %v9490_v39  ;;  %v2841_v12 = vadd.f32 %v7553_v5, %v9360_v35  ;;  %v2832_v7 = vpop.f32.mrb[141].mxu0 }
 0x29c   : > { %7933 = vpow2.f32 %v6312_v15  ;;  %v6311_v59 = vmul.f32 -1.442695, %v9494_v47  ;;  %v2833_v56 = vadd.f32 %v2832_v7, %v9354_v33  ;;  %v7554_v32 = vpop.f32.mrb[142].mxu0 }
 0x29d   : > { %v7918_v63 = vpop.eup %7917  ;;  %7935 = vpow2.f32 %v6310_v24  ;;  %v2931_v10 = vmul.f32 %v9417_v41, %v2841_v12  ;;  %v2844_v48 = vadd.f32 %v7554_v32, %v9362_v53  ;;  %v2835_v28 = vpop.f32.mrb[143].mxu0 }
 0x29e   : > { %v7920_v8 = vpop.eup %7919  ;;  %v3089_v37 = vadd.f32 1.0, %v7918_v63  ;;  %7937 = vpow2.f32 %v6313_v55  ;;  %v2929_v35 = vmul.f32 %v9417_v41, %v2833_v56  ;;  %v2836_v17 = vadd.f32 %v2835_v28, %v9356_v20  ;;  %v7854_v55 = vld [vmem:[#allocation9 + $0x158] sm:$0xff]  }
 0x29f   : > { %v7922_v16 = vpop.eup %7921  ;;  %v3087_v33 = vadd.f32 1.0, %v7920_v8  ;;  %7939 = vpow2.f32 %v6311_v59  ;;  %v9505_v51 = vadd.f32 %v9425_v25, %v2931_v10  ;;  %v2932_v31 = vmul.f32 %v9417_v41, %v2844_v48  ;;  %7281 = vmatprep.subr.bf16.mxu1 %v7854_v55 }
 0x2a0   : > { %v7924_v53 = vpop.eup %7923  ;;  %7941 = vrcp.f32 %v3089_v37  ;;  %v3090_v19 = vadd.f32 1.0, %v7922_v16  ;;  %v9509_v60 = vadd.f32 %v9425_v25, %v2929_v35  ;;  %v2930_v30 = vmul.f32 %v9417_v41, %v2836_v17 }
 0x2a1   : > { %7943 = vrcp.f32 %v3087_v33  ;;  %v3088_v15 = vadd.f32 1.0, %v7924_v53  ;;  %v6316_v20 = vmul.f32 -1.442695, %v9505_v51  ;;  %v9514_v58 = vadd.f32 %v9425_v25, %v2932_v31 }
 0x2a2   : > { %v7926_v24 = vpop.eup %7925  ;;  %7945 = vrcp.f32 %v3090_v19  ;;  %v6314_v5 = vmul.f32 -1.442695, %v9509_v60  ;;  %v9518_v49 = vadd.f32 %v9425_v25, %v2930_v30  ;;  %v7557_v36 = vpop.f32.mrb[144].mxu0 }
 0x2a3   : > { %v7928_v12 = vpop.eup %7927  ;;  %v3181_v7 = vmul.f32 %v7926_v24, %v9433_v44  ;;  %7947 = vrcp.f32 %v3088_v15  ;;  %v6317_v59 = vmul.f32 -1.442695, %v9514_v58  ;;  %v2857_v56 = vadd.f32 %v7557_v36, %v9372_v0  ;;  %v2848_v32 = vpop.f32.mrb[145].mxu0 }
 0x2a4   : > { %10763 = vst [vmem:[#allocation18_spill] sm:$0xff] %v9518_v49  ;;  %v7930_v63 = vpop.eup %7929  ;;  %v3179_v10 = vmul.f32 %v7928_v12, %v9437_v1  ;;  %7949 = vpow2.f32 %v6316_v20  ;;  %v9525_v48 = vmul.f32 -1.442695, %v9518_v49  ;;  %v2849_v28 = vadd.f32 %v2848_v32, %v9366_v6  ;;  %v9528_v18 = vpop.f32.mrb[146].mxu0 }
 0x2a5   : > { %v7932_v8 = vpop.eup %7931  ;;  %v6548_v44 = vpack.c.bf16 %v3181_v7, %v3181_v7  ;;  %v3182_v37 = vmul.f32 %v7930_v63, %v9442_v34  ;;  %7951 = vpow2.f32 %v6314_v5  ;;  %v9532_v0 = vmul.f32 %v9417_v41, %v2857_v56  ;;  %v9534_v35 = vpop.f32.mrb[147].mxu0  ;;  %v3635_v56 = vld [vmem:[#allocation3 + $0x18] sm:$0xf] }
 0x2a6   : > { %v7934_v1 = vpop.eup %7933  ;;  %v6546_v17 = vpack.c.bf16 %v3179_v10, %v3179_v10  ;;  %v3180_v16 = vmul.f32 %v7932_v8, %v9446_v29  ;;  %7953 = vpow2.f32 %v6317_v59  ;;  %v9538_v6 = vmul.f32 %v9417_v41, %v2849_v28  ;;  %v7856_v29 = vld [vmem:[#allocation9 + $0x118] sm:$0xff]  }
 0x2a7   : > { %v7936_v33 = vpop.eup %7935  ;;  %v3325_v31 = vshrl.u32 %v6548_v44, 16  ;;  %v3328_v53 = vshll.u32 %v6548_v44, 16  ;;  %v6549_v19 = vpack.c.bf16 %v3182_v37, %v3182_v37  ;;  %v3093_v30 = vadd.f32 1.0, %v7934_v1  ;;  %v3628_v1 = vld [vmem:[#allocation3 + $0xc] sm:$0xf]  ;;  %7282 = vmatpush3.bf16.msra.mxu1 %v7856_v29 }
 0x2a8   : > { %v9540_v34 = vpop.eup %7937  ;;  %v3308_v15 = vshrl.u32 %v6546_v17, 16  ;;  %v3311_v20 = vshll.u32 %v6546_v17, 16  ;;  %v6547_v24 = vpack.c.bf16 %v3180_v16, %v3180_v16  ;;  %v3091_v5 = vadd.f32 1.0, %v7936_v33 }
 0x2a9   : > { %v7940_v36 = vpop.eup %7939  ;;  %v3327_v55 = vrot.slane %v3325_v31, 7  ;;  %v3333_v12 = vshrl.u32 %v6549_v19, 16  ;;  %v3336_v7 = vshll.u32 %v6549_v19, 16  ;;  %7955 = vrcp.f32 %v3093_v30 }
 0x2aa   : > { %v7942_v59 = vpop.eup %7941  ;;  %v3310_v32 = vrot.slane %v3308_v15, 7  ;;  %v3316_v63 = vshrl.u32 %v6547_v24, 16  ;;  %v3319_v10 = vshll.u32 %v6547_v24, 16  ;;  %7957 = vrcp.f32 %v3091_v5  ;;  %v9542_v28 = vpop.f32.mrb[148].mxu0 }
 0x2ab   : > { %v7944_v8 = vpop.eup %7943  ;;  %v3330_v44 = vor.u32 %v3328_v53, %v3327_v55  ;;  %v3331_v37 = vrot.slane %v3327_v55, 4  ;;  %v3335_v17 = vrot.slane %v3333_v12, 7  ;;  %v3185_v16 = vmul.f32 %v7942_v59, %v9457_v11  ;;  %v9545_v33 = vpop.f32.mrb[149].mxu0 }
 0x2ac   : > { %v7946_v31 = vpop.eup %7945  ;;  %v3313_v19 = vor.u32 %v3311_v20, %v3310_v32  ;;  %v3314_v30 = vrot.slane %v3310_v32, 4  ;;  %v3318_v15 = vrot.slane %v3316_v63, 7  ;;  %v3183_v24 = vmul.f32 %v7944_v8, %v9461_v27  ;;  %v9548_v5 = vpop.f32.mrb[150].mxu0 }
 0x2ad   : > { %v7948_v46 = vpop.eup %7947  ;;  %v3636_v53 = vsel %vm8698_vm6, %v3330_v44, %v3635_v56  ;;  %v3338_v55 = vor.u32 %v3336_v7, %v3335_v17  ;;  %v3340_v12 = vrot.slane %v3335_v17, 4  ;;  %v6552_v11 = vpack.c.bf16 %v3185_v16, %v3185_v16  ;;  %v9552_v59 = vpop.f32.mrb[151].mxu0 }
 0x2ae   : > { %v7950_v29 = vpop.eup %7949  ;;  %3637 = vst [vmem:[#allocation3 + $0x18] sm:$0xf] %v3636_v53  ;;  %v3629_v20 = vsel %vm8698_vm6, %v3313_v19, %v3628_v1  ;;  %v3321_v32 = vor.u32 %v3319_v10, %v3318_v15  ;;  %v3323_v63 = vrot.slane %v3318_v15, 4  ;;  %v6550_v27 = vpack.c.bf16 %v3183_v24, %v3183_v24 }
 0x2af   : > { %v7952_v8 = vpop.eup %7951  ;;  %3630 = vst [vmem:[#allocation3 + $0xc] sm:$0xf] %v3629_v20  ;;  %v3339_v3 = vsel %vm8693_vm5, %v3331_v37, %v3338_v55  ;;  %v3640_v7 = vsel %vm8704_vm8, %v3340_v12, %v3639_v13  ;;  %v3359_v56 = vshrl.u32 %v6552_v11, 16  ;;  %v3362_v44 = vshll.u32 %v6552_v11, 16  ;;  %v3649_v37 = vld [vmem:[#allocation3 + $0x30] sm:$0xf] }
 0x2b0   : > { %v7954_v17 = vpop.eup %7953  ;;  %3638 = vst [vmem:[#allocation3 + $0x1c] sm:$0xf] %v3339_v3  ;;  %3641 = vst [vmem:[#allocation3 + $0x20] sm:$0x1] %v3640_v7  ;;  %v3322_v16 = vsel %vm8693_vm5, %v3314_v30, %v3321_v32  ;;  %v3633_v10 = vsel %vm8704_vm8, %v3323_v63, %v3632_v23  ;;  %v3342_v1 = vshrl.u32 %v6550_v27, 16  ;;  %v3345_v19 = vshll.u32 %v6550_v27, 16 }
 0x2b1   : > { %3631 = vst [vmem:[#allocation3 + $0x10] sm:$0xf] %v3322_v16  ;;  %3634 = vst [vmem:[#allocation3 + $0x14] sm:$0x1] %v3633_v10  ;;  %v9564_v15 = vrot.slane %v3359_v56, 7  ;;  %v3186_v13 = vmul.f32 %v7946_v31, %v9466_v22  ;;  %v3184_v24 = vmul.f32 %v7948_v46, %v9470_v42  ;;  %v3094_v3 = vadd.f32 1.0, %v9540_v34 }
 0x2b2   : > { %v3344_v53 = vrot.slane %v3342_v1, 7  ;;  %v3092_v55 = vadd.f32 1.0, %v7940_v36  ;;  %v3097_v12 = vadd.f32 1.0, %v7950_v29  ;;  %v3095_v30 = vadd.f32 1.0, %v7952_v8  ;;  %v9569_v11 = vpop.f32.mrb[152].mxu0  ;;  %v7860_v23 = vld [vmem:[#allocation9 + $0x1c0] sm:$0xff]  }
 0x2b3   : > { %v7956_v20 = vpop.eup %7955  ;;  %v3364_v32 = vor.u32 %v3362_v44, %v9564_v15  ;;  %v3365_v63 = vrot.slane %v9564_v15, 4  ;;  %v3642_v27 = vld [vmem:[#allocation3 + $0x24] sm:$0xf]  ;;  %v6553_v7 = vpack.c.bf16 %v3186_v13, %v3186_v13  ;;  %v6551_v56 = vpack.c.bf16 %v3184_v24, %v3184_v24  ;;  %v9573_v22 = vpop.f32.mrb[153].mxu0  ;;  %v7862_v46 = vld [vmem:[#allocation9 + $0x160] sm:$0xff]   ;;  %7387 = vmatprep.subr.bf16.mxu0 %v7860_v23 }
 0x2b4   : > { %v7958_v42 = vpop.eup %7957  ;;  %v3347_v34 = vor.u32 %v3345_v19, %v3344_v53  ;;  %v3348_v31 = vrot.slane %v3344_v53, 4  ;;  %v3189_v36 = vmul.f32 %v7956_v20, %v9481_v38  ;;  %7959 = vrcp.f32 %v3094_v3  ;;  %v9576_v29 = vpop.f32.mrb[154].mxu0  ;;  %7283 = vmatprep.subr.bf16.mxu1 %v7862_v46  ;;  %v3653_v15 = vld [vmem:[#allocation3 + $0x38] sm:$0x1]  ;;  %v3646_v38 = vld [vmem:[#allocation3 + $0x2c] sm:$0x1] }
 0x2b5   : > { %v3650_v8 = vsel %vm8698_vm6, %v3364_v32, %v3649_v37  ;;  %v3367_v44 = vshrl.u32 %v6553_v7, 16  ;;  %v3370_v16 = vshll.u32 %v6553_v7, 16  ;;  %v3350_v10 = vshrl.u32 %v6551_v56, 16  ;;  %v9580_v1 = vpop.f32.mrb[155].mxu0 }
 0x2b6   : > { %10764 = vst [vmem:[#allocation19_spill] sm:$0xff] %v9580_v1  ;;  %3651 = vst [vmem:[#allocation3 + $0x30] sm:$0xf] %v3650_v8  ;;  %v3643_v19 = vsel %vm8698_vm6, %v3347_v34, %v3642_v27  ;;  %v3353_v13 = vshll.u32 %v6551_v56, 16  ;;  %v6556_v24 = vpack.c.bf16 %v3189_v36, %v3189_v36  ;;  %v3187_v3 = vmul.f32 %v7958_v42, %v9485_v54  ;;  %v7861_v8 = vld [vmem:[#allocation9 + $0x180] sm:$0xff]  }
 0x2b7   : > { %3644 = vst [vmem:[#allocation3 + $0x24] sm:$0xf] %v3643_v19  ;;  %v3369_v53 = vrot.slane %v3367_v44, 7  ;;  %v3352_v23 = vrot.slane %v3350_v10, 7  ;;  %7961 = vrcp.f32 %v3092_v55  ;;  %v3098_v37 = vadd.f32 1.0, %v7954_v17  ;;  %v9592_v17 = vld [vmem:[#allocation3 + $0x18] sm:$0xff]  }
 0x2b8   : > { %v3393_v20 = vshrl.u32 %v6556_v24, 16  ;;  %v3396_v32 = vshll.u32 %v6556_v24, 16  ;;  %v6554_v7 = vpack.c.bf16 %v3187_v3, %v3187_v3  ;;  %7963 = vrcp.f32 %v3097_v12  ;;  %v9585_v46 = vld [vmem:[#allocation3 + $0xc] sm:$0xff]   ;;  %v7864_v55 = vld [vmem:[#allocation9 + $0x120] sm:$0xff]  }
 0x2b9   : > { %v3372_v49 = vor.u32 %v3370_v16, %v3369_v53  ;;  %v3374_v27 = vrot.slane %v3369_v53, 4  ;;  %v3355_v34 = vor.u32 %v3353_v13, %v3352_v23  ;;  %v3357_v56 = vrot.slane %v3352_v23, 4  ;;  %5033 = vmatprep.mubr.bf16.mxu0 %v9585_v46  ;;  %v3656_v13 = vld [vmem:[#allocation3 + $0x3c] sm:$0xf]  ;;  %7284 = vmatpush3.bf16.msra.mxu1 %v7864_v55 }
 0x2ba   : > { %v9587_v1 = vrot.slane %v3393_v20, 7  ;;  %v3376_v36 = vshrl.u32 %v6554_v7, 16  ;;  %v3379_v54 = vshll.u32 %v6554_v7, 16  ;;  %7965 = vrcp.f32 %v3095_v30  ;;  %v9589_v42 = vpop.f32.mrb[156].mxu0  ;;  %v3663_v30 = vld [vmem:[#allocation3 + $0x48] sm:$0xf]  ;;  %5034 = vmatmul.mubr.bf16.vlgmr.msra.gmra.mrb[160].mxu0 %v9396_v45 }
 0x2bb   : > { %v3373_v12 = vsel %vm8693_vm5, %v3365_v63, %v3372_v49  ;;  %v3654_v44 = vsel %vm8704_vm8, %v3374_v27, %v3653_v15  ;;  %v3356_v16 = vsel %vm8693_vm5, %v3348_v31, %v3355_v34  ;;  %v3647_v10 = vsel %vm8704_vm8, %v3357_v56, %v3646_v38  ;;  %v9602_v19 = vpop.f32.mrb[157].mxu0  ;;  %5041 = vmatprep.mubr.bf16.mxu0 %v9592_v17 }
 0x2bc   : > { %3652 = vst [vmem:[#allocation3 + $0x34] sm:$0xf] %v3373_v12  ;;  %3655 = vst [vmem:[#allocation3 + $0x38] sm:$0x1] %v3654_v44  ;;  %v3398_v49 = vor.u32 %v3396_v32, %v9587_v1  ;;  %v3399_v63 = vrot.slane %v9587_v1, 4  ;;  %v9607_v15 = vrot.slane %v3376_v36, 7  ;;  %7967 = vrcp.f32 %v3098_v37  ;;  %7388 = vmatpush3.bf16.msra.mxu0 %v7861_v8 }
 0x2bd   : > { %3645 = vst [vmem:[#allocation3 + $0x28] sm:$0xf] %v3356_v16  ;;  %3648 = vst [vmem:[#allocation3 + $0x2c] sm:$0x1] %v3647_v10  ;;  %v9609_v31 = vpop.f32.mrb[158].mxu0  ;;  %7969 = vpow2.f32 %v9525_v48  ;;  %v9615_v45 = vadd.f32 %v9425_v25, %v9532_v0  ;;  %v9619_v38 = vadd.f32 %v9425_v25, %v9538_v6  ;;  %v2860_v24 = vadd.f32 %v9528_v18, %v9374_v21 }
 0x2be   : > { %v9623_v3 = vpop.f32.mrb[159].mxu0  ;;  %v7960_v53 = vpop.eup %7959  ;;  %v3664_v23 = vsel %vm8698_vm6, %v3398_v49, %v3663_v30  ;;  %v3381_v48 = vor.u32 %v3379_v54, %v9607_v15  ;;  %v3382_v37 = vrot.slane %v9607_v15, 4  ;;  %v2852_v0 = vadd.f32 %v9534_v35, %v9368_v9  ;;  %v7870_v54 = vld [vmem:[#allocation9 + $0x168] sm:$0xff]  }
 0x2bf   : > { %3665 = vst [vmem:[#allocation3 + $0x48] sm:$0xf] %v3664_v23  ;;  %v3190_v6 = vmul.f32 %v7960_v53, %v9490_v39  ;;  %v6320_v20 = vmul.f32 -1.442695, %v9615_v45  ;;  %v6318_v21 = vmul.f32 -1.442695, %v9619_v38  ;;  %v2936_v18 = vmul.f32 %v9417_v41, %v2860_v24  ;;  %7285 = vmatprep.subr.bf16.mxu1 %v7870_v54 }
 0x2c0   : > { %v3657_v32 = vsel %vm8698_vm6, %v3381_v48, %v3656_v13  ;;  %v2934_v7 = vmul.f32 %v9417_v41, %v2852_v0  ;;  %v2873_v8 = vadd.f32 %v9542_v28, %v9384_v14  ;;  %v2865_v9 = vadd.f32 %v9545_v33, %v9378_v2  ;;  %v7868_v28 = vld [vmem:[#allocation9 + $0x1c8] sm:$0xff]   ;;  %v3667_v13 = vld [vmem:[#allocation3 + $0x50] sm:$0x1] }
 0x2c1   : > { %v7962_v35 = vpop.eup %7961  ;;  %3658 = vst [vmem:[#allocation3 + $0x3c] sm:$0xf] %v3657_v32  ;;  %v6557_v39 = vpack.c.bf16 %v3190_v6, %v3190_v6  ;;  %7971 = vpow2.f32 %v6320_v20  ;;  %v9643_v27 = vadd.f32 %v9425_v25, %v2936_v18  ;;  %v9647_v34 = vadd.f32 %v9548_v5, %v9386_v4  ;;  %v7869_v33 = vld [vmem:[#allocation9 + $0x188] sm:$0xff]   ;;  %7389 = vmatprep.subr.bf16.mxu0 %v7868_v28 }
 0x2c2   : > { %v7964_v56 = vpop.eup %7963  ;;  %v3188_v36 = vmul.f32 %v7962_v35, %v9494_v47  ;;  %7973 = vpow2.f32 %v6318_v21  ;;  %v9651_v14 = vadd.f32 %v9425_v25, %v2934_v7  ;;  %v2939_v2 = vmul.f32 %v9417_v41, %v2873_v8  ;;  %7390 = vmatpush3.bf16.msra.mxu0 %v7869_v33  ;;  %v3677_v54 = vld [vmem:[#allocation3 + $0x60] sm:$0xf] }
 0x2c3   : > { %v3401_v55 = vshrl.u32 %v6557_v39, 16  ;;  %v3404_v12 = vshll.u32 %v6557_v39, 16  ;;  %v3193_v44 = vmul.f32 %v7964_v56, %v9505_v51  ;;  %v6321_v16 = vmul.f32 -1.442695, %v9643_v27  ;;  %v3660_v56 = vld [vmem:[#allocation3 + $0x44] sm:$0x1] }
 0x2c4   : > { %v7966_v4 = vpop.eup %7965  ;;  %v6555_v5 = vpack.c.bf16 %v3188_v36, %v3188_v36  ;;  %v6319_v10 = vmul.f32 -1.442695, %v9651_v14  ;;  %v9658_v47 = vadd.f32 %v9425_v25, %v2939_v2  ;;  %v2937_v30 = vmul.f32 %v9417_v41, %v2865_v9  ;;  %v7872_v2 = vld [vmem:[#allocation9 + $0x128] sm:$0xff]  }
 0x2c5   : > { %v3403_v49 = vrot.slane %v3401_v55, 7  ;;  %v6560_v24 = vpack.c.bf16 %v3193_v44, %v3193_v44  ;;  %v3191_v53 = vmul.f32 %v7966_v4, %v9509_v60  ;;  %7975 = vpow2.f32 %v6321_v16  ;;  %7286 = vmatpush3.bf16.msra.mxu1 %v7872_v2 }
 0x2c6   : > { %v7968_v51 = vpop.eup %7967  ;;  %v3384_v23 = vshrl.u32 %v6555_v5, 16  ;;  %v3387_v48 = vshll.u32 %v6555_v5, 16  ;;  %7977 = vpow2.f32 %v6319_v10  ;;  %v6324_v0 = vmul.f32 -1.442695, %v9658_v47 }
 0x2c7   : > { %v7970_v6 = vpop.eup %7969  ;;  %v3406_v20 = vor.u32 %v3404_v12, %v3403_v49  ;;  %v3408_v21 = vrot.slane %v3403_v49, 4  ;;  %v3427_v18 = vshrl.u32 %v6560_v24, 16  ;;  %v3430_v32 = vshll.u32 %v6560_v24, 16  ;;  %v3670_v24 = vld [vmem:[#allocation3 + $0x54] sm:$0xf] }
 0x2c8   : > { %v3386_v7 = vrot.slane %v3384_v23, 7  ;;  %v6558_v8 = vpack.c.bf16 %v3191_v53, %v3191_v53  ;;  %v3194_v9 = vmul.f32 %v7968_v51, %v9514_v58  ;;  %v3096_v35 = vadd.f32 1.0, %v7970_v6 }
 0x2c9   : > { %v3407_v60 = vsel %vm8693_vm5, %v3399_v63, %v3406_v20  ;;  %v3668_v39 = vsel %vm8704_vm8, %v3408_v21, %v3667_v13  ;;  %v3429_v36 = vrot.slane %v3427_v18, 7  ;;  %7979 = vpow2.f32 %v6324_v0 }
 0x2ca   : > { %3666 = vst [vmem:[#allocation3 + $0x4c] sm:$0xf] %v3407_v60  ;;  %3669 = vst [vmem:[#allocation3 + $0x50] sm:$0x1] %v3668_v39  ;;  %v3389_v28 = vor.u32 %v3387_v48, %v3386_v7  ;;  %v3391_v33 = vrot.slane %v3386_v7, 4  ;;  %v3410_v55 = vshrl.u32 %v6558_v8, 16  ;;  %v6561_v16 = vpack.c.bf16 %v3194_v9, %v3194_v9 }
 0x2cb   : > { %v3413_v58 = vshll.u32 %v6558_v8, 16  ;;  %v7972_v12 = vpop.eup %7971  ;;  %v3432_v44 = vor.u32 %v3430_v32, %v3429_v36  ;;  %v3433_v1 = vrot.slane %v3429_v36, 4  ;;  %7981 = vrcp.f32 %v3096_v35  ;;  %v3681_v7 = vld [vmem:[#allocation3 + $0x68] sm:$0x1] }
 0x2cc   : > { %v7974_v63 = vpop.eup %7973  ;;  %v3390_v4 = vsel %vm8693_vm5, %v3382_v37, %v3389_v28  ;;  %v3661_v5 = vsel %vm8704_vm8, %v3391_v33, %v3660_v56  ;;  %v9676_v10 = vrot.slane %v3410_v55, 7  ;;  %v3101_v49 = vadd.f32 1.0, %v7972_v12  ;;  %v7876_v36 = vld [vmem:[#allocation9 + $0x1d0] sm:$0xff]  }
 0x2cd   : > { %3659 = vst [vmem:[#allocation3 + $0x40] sm:$0xf] %v3390_v4  ;;  %3662 = vst [vmem:[#allocation3 + $0x44] sm:$0x1] %v3661_v5  ;;  %v3678_v13 = vsel %vm8698_vm6, %v3432_v44, %v3677_v54  ;;  %v3435_v53 = vshrl.u32 %v6561_v16, 16  ;;  %v3438_v51 = vshll.u32 %v6561_v16, 16  ;;  %v9683_v48 = vadd.f32 %v9425_v25, %v2937_v30  ;;  %7391 = vmatprep.subr.bf16.mxu0 %v7876_v36 }
 0x2ce   : > { %v3099_v23 = vadd.f32 1.0, %v7974_v63  ;;  %3679 = vst [vmem:[#allocation3 + $0x60] sm:$0xf] %v3678_v13  ;;  %v3415_v15 = vor.u32 %v3413_v58, %v9676_v10  ;;  %v3416_v37 = vrot.slane %v9676_v10, 4  ;;  %7983 = vrcp.f32 %v3101_v49  ;;  %v7877_v33 = vld [vmem:[#allocation9 + $0x190] sm:$0xff]   ;;  %v10766_v63 = vld [vmem:[#allocation18_spill] sm:$0xff] }
 0x2cf   : > { %v7976_v0 = vpop.eup %7975  ;;  %v3437_v6 = vrot.slane %v3435_v53, 7  ;;  %v2940_v20 = vmul.f32 %v9417_v41, %v9647_v34  ;;  %v2868_v21 = vadd.f32 %v9552_v59, %v9380_v61  ;;  %v6322_v9 = vmul.f32 -1.442695, %v9683_v48  ;;  %v7878_v54 = vld [vmem:[#allocation9 + $0x170] sm:$0xff]   ;;  %7392 = vmatpush3.bf16.msra.mxu0 %v7877_v33 }
 0x2d0   : > { %7985 = vrcp.f32 %v3099_v23  ;;  %v7978_v18 = vpop.eup %7977  ;;  %v3671_v32 = vsel %vm8698_vm6, %v3415_v15, %v3670_v24  ;;  %v3102_v8 = vadd.f32 1.0, %v7976_v0  ;;  %v2889_v30 = vadd.f32 %v9569_v11, %v9400_v26  ;;  %7287 = vmatprep.subr.bf16.mxu1 %v7878_v54  ;;  %v10768_v23 = vld [vmem:[#allocation14_spill] sm:$0xff]  ;;  %v10769_v0 = vld [vmem:[#allocation17_spill] sm:$0xff] }
 0x2d1   : > { %3672 = vst [vmem:[#allocation3 + $0x54] sm:$0xf] %v3671_v32  ;;  %v3440_v35 = vor.u32 %v3438_v51, %v3437_v6  ;;  %v3442_v60 = vrot.slane %v3437_v6, 4  ;;  %v3100_v39 = vadd.f32 1.0, %v7978_v18  ;;  %v9695_v34 = vadd.f32 %v9425_v25, %v2940_v20 }
 0x2d2   : > { %7987 = vrcp.f32 %v3102_v8  ;;  %v2938_v61 = vmul.f32 %v9417_v41, %v2868_v21  ;;  %v2943_v59 = vmul.f32 %v9417_v41, %v2889_v30  ;;  %v2881_v56 = vadd.f32 %v9573_v22, %v9390_v57 }
 0x2d3   : > { %v7980_v2 = vpop.eup %7979  ;;  %v3441_v26 = vsel %vm8693_vm5, %v3433_v1, %v3440_v35  ;;  %v3682_v11 = vsel %vm8704_vm8, %v3442_v60, %v3681_v7  ;;  %7989 = vrcp.f32 %v3100_v39  ;;  %v6325_v28 = vmul.f32 -1.442695, %v9695_v34  ;;  %v10765_v1 = vld [vmem:[#allocation19_spill] sm:$0xff] }
 0x2d4   : > { %3680 = vst [vmem:[#allocation3 + $0x64] sm:$0xf] %v3441_v26  ;;  %3683 = vst [vmem:[#allocation3 + $0x68] sm:$0x1] %v3682_v11  ;;  %v3105_v55 = vadd.f32 1.0, %v7980_v2  ;;  %7991 = vpow2.f32 %v6322_v9  ;;  %v9707_v58 = vadd.f32 %v9425_v25, %v2938_v61  ;;  %v9710_v57 = vadd.f32 %v9425_v25, %v2943_v59 }
 0x2d5   : > { %v7982_v22 = vpop.eup %7981  ;;  %7993 = vpow2.f32 %v6325_v28  ;;  %v2941_v12 = vmul.f32 %v9417_v41, %v2881_v56  ;;  %v2892_v44 = vadd.f32 %v9576_v29, %v9402_v62  ;;  %v2884_v16 = vadd.f32 %v10765_v1, %v9393_v40  ;;  %v10767_v62 = vld [vmem:[#allocation16_spill] sm:$0xff] }
 0x2d6   : > { %v3192_v4 = vmul.f32 %v7982_v22, %v10766_v63  ;;  %7995 = vrcp.f32 %v3105_v55  ;;  %v6323_v5 = vmul.f32 -1.442695, %v9707_v58  ;;  %v6328_v49 = vmul.f32 -1.442695, %v9710_v57  ;;  %v3691_v63 = vld [vmem:[#allocation3 + $0x78] sm:$0xf] }
 0x2d7   : > { %v9721_v13 = vadd.f32 %v9425_v25, %v2941_v12  ;;  %v2944_v24 = vmul.f32 %v9417_v41, %v2892_v44  ;;  %v2942_v53 = vmul.f32 %v9417_v41, %v2884_v16  ;;  %v2905_v29 = vadd.f32 %v9589_v42, %v10767_v62  ;;  %v7880_v42 = vld [vmem:[#allocation9 + $0x130] sm:$0xff]  }
 0x2d8   : > { %v7984_v40 = vpop.eup %7983  ;;  %v6559_v51 = vpack.c.bf16 %v3192_v4, %v3192_v4  ;;  %7997 = vpow2.f32 %v6323_v5  ;;  %v2897_v15 = vadd.f32 %v9602_v19, %v10768_v23  ;;  %v9731_v6 = vadd.f32 %v9609_v31, %v10769_v0  ;;  %7288 = vmatpush3.bf16.msra.mxu1 %v7880_v42  ;;  %v7884_v23 = vld [vmem:[#allocation9 + $0x1d8] sm:$0xff]  }
 0x2d9   : > { %v3197_v21 = vmul.f32 %v7984_v40, %v9615_v45  ;;  %7999 = vpow2.f32 %v6328_v49  ;;  %v6326_v18 = vmul.f32 -1.442695, %v9721_v13  ;;  %v9736_v32 = vadd.f32 %v9425_v25, %v2944_v24  ;;  %v7886_v0 = vld [vmem:[#allocation9 + $0x178] sm:$0xff]   ;;  %7393 = vmatprep.subr.bf16.mxu0 %v7884_v23 }
 0x2da   : > { %v7986_v20 = vpop.eup %7985  ;;  %v3418_v7 = vshrl.u32 %v6559_v51, 16  ;;  %v3421_v8 = vshll.u32 %v6559_v51, 16  ;;  %v9740_v19 = vadd.f32 %v9425_v25, %v2942_v53  ;;  %v9744_v45 = vmul.f32 %v9417_v41, %v2905_v29  ;;  %v3674_v25 = vld [vmem:[#allocation3 + $0x5c] sm:$0x1]  ;;  %v3684_v53 = vld [vmem:[#allocation3 + $0x6c] sm:$0xf]  ;;  %7289 = vmatprep.subr.bf16.mxu1 %v7886_v0 }
 0x2db   : > { %v3195_v9 = vmul.f32 %v7986_v20, %v9619_v38  ;;  %v6564_v30 = vpack.c.bf16 %v3197_v21, %v3197_v21  ;;  %8001 = vpow2.f32 %v6326_v18  ;;  %v6329_v31 = vmul.f32 -1.442695, %v9736_v32 }
 0x2dc   : > { %v7988_v35 = vpop.eup %7987  ;;  %v3420_v60 = vrot.slane %v3418_v7, 7  ;;  %v9747_v61 = vmul.f32 -1.442695, %v9740_v19  ;;  %v9750_v59 = vmul.f32 %v9417_v41, %v2897_v15  ;;  %v7885_v15 = vld [vmem:[#allocation9 + $0x198] sm:$0xff]   ;;  %v3955_v0 = vshll.u32 %v9585_v46, 16 }
 0x2dd   : > { %v6562_v39 = vpack.c.bf16 %v3195_v9, %v3195_v9  ;;  %v7990_v38 = vpop.eup %7989  ;;  %v3461_v56 = vshrl.u32 %v6564_v30, 16  ;;  %v3464_v36 = vshll.u32 %v6564_v30, 16  ;;  %v3198_v2 = vmul.f32 %v7988_v35, %v9643_v27  ;;  %7394 = vmatpush3.bf16.msra.mxu0 %v7885_v15 }
 0x2de   : > { %8003 = vpow2.f32 %v6329_v31  ;;  %v7992_v26 = vpop.eup %7991  ;;  %v3423_v11 = vor.u32 %v3421_v8, %v3420_v60  ;;  %v3425_v28 = vrot.slane %v3420_v60, 4  ;;  %v3196_v44 = vmul.f32 %v7990_v38, %v9651_v14  ;;  %v3695_v8 = vld [vmem:[#allocation3 + $0x80] sm:$0x1] }
 0x2df   : > { %v3444_v33 = vshrl.u32 %v6562_v39, 16  ;;  %v3447_v54 = vshll.u32 %v6562_v39, 16  ;;  %v7994_v55 = vpop.eup %7993  ;;  %v3463_v22 = vrot.slane %v3461_v56, 7  ;;  %v6565_v12 = vpack.c.bf16 %v3198_v2, %v3198_v2 }
 0x2e0   : > { %v3103_v1 = vadd.f32 1.0, %v7992_v26  ;;  %v7996_v41 = vpop.eup %7995  ;;  %v3424_v16 = vsel %vm8693_vm5, %v3416_v37, %v3423_v11  ;;  %v3675_v27 = vsel %vm8704_vm8, %v3425_v28, %v3674_v25  ;;  %v3106_v5 = vadd.f32 1.0, %v7994_v55  ;;  %v3688_v11 = vld [vmem:[#allocation3 + $0x74] sm:$0x1]  ;;  %v3705_v28 = vld [vmem:[#allocation3 + $0x90] sm:$0xf] }
 0x2e1   : > { %v9760_v4 = vrot.slane %v3444_v33, 7  ;;  %3673 = vst [vmem:[#allocation3 + $0x58] sm:$0xf] %v3424_v16  ;;  %3676 = vst [vmem:[#allocation3 + $0x5c] sm:$0x1] %v3675_v27  ;;  %v3466_v49 = vor.u32 %v3464_v36, %v3463_v22  ;;  %v3467_v24 = vrot.slane %v3463_v22, 4  ;;  %v6563_v37 = vpack.c.bf16 %v3196_v44, %v3196_v44 }
 0x2e2   : > { %v3469_v14 = vshrl.u32 %v6565_v12, 16  ;;  %v3472_v62 = vshll.u32 %v6565_v12, 16  ;;  %v7998_v29 = vpop.eup %7997  ;;  %v3201_v51 = vmul.f32 %v7996_v41, %v9658_v47  ;;  %8005 = vrcp.f32 %v3103_v1  ;;  %v8174_v44 = vld [vmem:[%s10734_s3] ss:$0 sm:$0xff] }
 0x2e3   : > { %v3449_v10 = vor.u32 %v3447_v54, %v9760_v4  ;;  %v3450_v40 = vrot.slane %v9760_v4, 4  ;;  %v8000_v20 = vpop.eup %7999  ;;  %v3692_v21 = vsel %vm8698_vm6, %v3466_v49, %v3691_v63  ;;  %v3104_v42 = vadd.f32 1.0, %v7998_v29  ;;  %v8175_v16 = vld [vmem:[%s10733_s2] ss:$0 sm:$0xff]  ;;  %v7888_v4 = vld [vmem:[#allocation9 + $0x138] sm:$0xff]  }
 0x2e4   : > { %v3471_v18 = vrot.slane %v3469_v14, 7  ;;  %3693 = vst [vmem:[#allocation3 + $0x78] sm:$0xf] %v3692_v21  ;;  %v3452_v9 = vshrl.u32 %v6563_v37, 16  ;;  %v3455_v30 = vshll.u32 %v6563_v37, 16  ;;  %v6568_v31 = vpack.c.bf16 %v3201_v51, %v3201_v51  ;;  %7290 = vmatpush3.bf16.msra.mxu1 %v7888_v4  ;;  %v7893_v21 = vld [vmem:[#allocation9 + $0x1a8] sm:$0xff]  }
 0x2e5   : > { %v3685_v7 = vsel %vm8698_vm6, %v3449_v10, %v3684_v53  ;;  %v8002_v47 = vpop.eup %8001  ;;  %8007 = vrcp.f32 %v3106_v5  ;;  %v3109_v39 = vadd.f32 1.0, %v8000_v20  ;;  %v9779_v1 = vadd.f32 %v8174_v44, %v9744_v45  ;;  %v9788_v63 = vld [vmem:[#allocation3 + $0x14] ss:$0 sps:$4 sm:$0x11]   ;;  %v7892_v53 = vld [vmem:[#allocation9 + $0x1e8] sm:$0xff]  }
 0x2e6   : > { %3686 = vst [vmem:[#allocation3 + $0x6c] sm:$0xf] %v3685_v7  ;;  %v3474_v35 = vor.u32 %v3472_v62, %v3471_v18  ;;  %v3476_v60 = vrot.slane %v3471_v18, 4  ;;  %v3454_v38 = vrot.slane %v3452_v9, 7  ;;  %v3495_v25 = vshrl.u32 %v6568_v31, 16 }
 0x2e7   : > { %v3498_v56 = vshll.u32 %v6568_v31, 16  ;;  %8009 = vrcp.f32 %v3104_v42  ;;  %v3107_v33 = vadd.f32 1.0, %v8002_v47  ;;  %v9782_v41 = vadd.f32 %v8174_v44, %v9750_v59  ;;  %v7891_v59 = vld [vmem:[#allocation9 + $0x1a0] sm:$0xff]   ;;  %v9805_v51 = vld [vmem:[#allocation3 + $0x20] ss:$0 sps:$4 sm:$0x11]  }
 0x2e8   : > { %v8004_v36 = vpop.eup %8003  ;;  %v3475_v2 = vsel %vm8693_vm5, %v3467_v24, %v3474_v35  ;;  %v3696_v26 = vsel %vm8704_vm8, %v3476_v60, %v3695_v8  ;;  %8011 = vrcp.f32 %v3109_v39  ;;  %v3457_v54 = vor.u32 %v3455_v30, %v3454_v38  ;;  %v7889_v24 = vld [vmem:[#allocation9 + $0x1e0] sm:$0xff]   ;;  %v3698_v4 = vld [vmem:[#allocation3 + $0x84] sm:$0xf] }
 0x2e9   : > { %3694 = vst [vmem:[#allocation3 + $0x7c] sm:$0xf] %v3475_v2  ;;  %3697 = vst [vmem:[#allocation3 + $0x80] sm:$0x1] %v3696_v26  ;;  %v3459_v55 = vrot.slane %v3454_v38, 4  ;;  %v9773_v22 = vrot.slane %v3495_v25, 7  ;;  %8013 = vrcp.f32 %v3107_v33  ;;  %v2948_v27 = vmul.f32 %v8175_v16, %v9731_v6  ;;  %7395 = vmatprep.subr.bf16.mxu0 %v7889_v24 }
 0x2ea   : > { %v3110_v12 = vadd.f32 1.0, %v8004_v36  ;;  %v3458_v5 = vsel %vm8693_vm5, %v3450_v40, %v3457_v54  ;;  %v6332_v14 = vmul.f32 -1.442695, %v9779_v1  ;;  %v6330_v6 = vmul.f32 -1.442695, %v9782_v41  ;;  %v10770_v40 = vld [vmem:[#allocation15_spill] sm:$0xff]  ;;  %7396 = vmatpush3.bf16.msra.mxu0 %v7891_v59 }
 0x2eb   : > { %v3689_v49 = vsel %vm8704_vm8, %v3459_v55, %v3688_v11  ;;  %v3500_v45 = vor.u32 %v3498_v56, %v9773_v22  ;;  %3687 = vst [vmem:[#allocation3 + $0x70] sm:$0xf] %v3458_v5  ;;  %v9797_v62 = vadd.f32 %v8174_v44, %v2948_v27  ;;  %v3501_v29 = vrot.slane %v9773_v22, 4  ;;  %7397 = vmatprep.subr.bf16.mxu0 %v7892_v53  ;;  %v7894_v36 = vld [vmem:[#allocation9 + $0x1f0] sm:$0xff]  }
 0x2ec   : > { %3690 = vst [vmem:[#allocation3 + $0x74] sm:$0x1] %v3689_v49  ;;  %8015 = vrcp.f32 %v3110_v12  ;;  %v2900_v37 = vadd.f32 %v9623_v3, %v10770_v40  ;;  %v8006_v23 = vpop.eup %8005  ;;  %v3960_v20 = vshll.u32 %v9788_v63, 16  ;;  %v3953_v3 = vshrl.u32 %v9585_v46, 16  ;;  %v7895_v2 = vld [vmem:[#allocation9 + $0x1b0] sm:$0xff]  }
 0x2ed   : > { %v3706_v10 = vsel %vm8698_vm6, %v3500_v45, %v3705_v28  ;;  %8017 = vpow2.f32 %v9747_v61  ;;  %v6333_v15 = vmul.f32 -1.442695, %v9797_v62  ;;  %v3199_v18 = vmul.f32 %v8006_v23, %v9683_v48 }
 0x2ee   : > { %3707 = vst [vmem:[#allocation3 + $0x90] sm:$0xf] %v3706_v10  ;;  %8019 = vpow2.f32 %v6332_v14  ;;  %v2946_v61 = vmul.f32 %v8175_v16, %v2900_v37  ;;  %v3957_v7 = vrot.slane %v3955_v0, 1  ;;  %v3965_v8 = vshrl.u32 %v9592_v17, 16  ;;  %7398 = vmatpush3.bf16.msra.mxu0 %v7893_v21  ;;  %v9825_v16 = vld [vmem:[#allocation9 + $0x200] sm:$0xff]   ;;  %v7897_v14 = vld [vmem:[#allocation9 + $0x1b8] sm:$0xff]  }
 0x2ef   : > { %8021 = vpow2.f32 %v6330_v6  ;;  %v8008_v42 = vpop.eup %8007  ;;  %v3967_v9 = vshll.u32 %v9592_v17, 16  ;;  %v6566_v31 = vpack.c.bf16 %v3199_v18, %v3199_v18  ;;  %v3962_v60 = vrot.slane %v3960_v20, 1  ;;  %7399 = vmatprep.subr.bf16.mxu0 %v7894_v36  ;;  %7571 = vmatprep.subr.bf16.mxu1 %v9825_v16  ;;  %v3709_v0 = vld [vmem:[#allocation3 + $0x98] sm:$0x1] }
 0x2f0   : > { %8023 = vpow2.f32 %v6333_v15  ;;  %v3202_v47 = vmul.f32 %v8008_v42, %v9695_v34  ;;  %v9815_v35 = vadd.f32 %v8174_v44, %v2946_v61  ;;  %v3958_v38 = vor.u32 %v3957_v7, %v3953_v3  ;;  %v7896_v34 = vld [vmem:[#allocation9 + $0x1f8] sm:$0xff]  }
 0x2f1   : > { %v8010_v30 = vpop.eup %8009  ;;  %v3969_v25 = vrot.slane %v3967_v9, 1  ;;  %v3972_v56 = vshll.u32 %v9805_v51, 16  ;;  %v3478_v26 = vshrl.u32 %v6566_v31, 16  ;;  %v4151_v33 = vrot.slane %v9585_v46, 1 }
 0x2f2   : > { %v8012_v48 = vpop.eup %8011  ;;  %v3200_v39 = vmul.f32 %v8010_v30, %v9707_v58  ;;  %v6569_v11 = vpack.c.bf16 %v3202_v47, %v3202_v47  ;;  %v3481_v55 = vshll.u32 %v6566_v31, 16  ;;  %v6331_v44 = vmul.f32 -1.442695, %v9815_v35  ;;  %7400 = vmatpush3.bf16.msra.mxu0 %v7895_v2 }
 0x2f3   : > { %v3205_v28 = vmul.f32 %v8012_v48, %v9710_v57  ;;  %v8014_v54 = vpop.eup %8013  ;;  %v9823_v58 = vsel %vm1204_vm7, %v3958_v38, %v3962_v60  ;;  %v3480_v27 = vrot.slane %v3478_v26, 7  ;;  %v9828_v57 = vor.u32 %v3969_v25, %v3965_v8  ;;  %7401 = vmatprep.subr.bf16.mxu0 %v7896_v34  ;;  %v3702_v8 = vld [vmem:[#allocation3 + $0x8c] sm:$0x1]  ;;  %v3719_v48 = vld [vmem:[#allocation3 + $0xa8] sm:$0xf] }
 0x2f4   : > { %v6567_v12 = vpack.c.bf16 %v3200_v39, %v3200_v39  ;;  %v3503_v5 = vshrl.u32 %v6569_v11, 16  ;;  %4880 = vmatprep.mubr.bf16.mxu1 %v9823_v58  ;;  %v3506_v24 = vshll.u32 %v6569_v11, 16  ;;  %v3203_v53 = vmul.f32 %v8014_v54, %v9721_v13 }
 0x2f5   : > { %v6572_v49 = vpack.c.bf16 %v3205_v28, %v3205_v28  ;;  %8025 = vpow2.f32 %v6331_v44  ;;  %4881 = vmatmul.mubr.bf16.gmra.mrb[132].mxu1 %v9585_v46  ;;  %v3483_v10 = vor.u32 %v3481_v55, %v3480_v27  ;;  %v3484_v31 = vrot.slane %v3480_v27, 4  ;;  %v3712_v28 = vld [vmem:[#allocation3 + $0x9c] sm:$0xf] }
 0x2f6   : > { %v8016_v45 = vpop.eup %8015  ;;  %v3486_v59 = vshrl.u32 %v6567_v12, 16  ;;  %v3505_v40 = vrot.slane %v3503_v5, 7  ;;  %v3489_v37 = vshll.u32 %v6567_v12, 16  ;;  %v6570_v18 = vpack.c.bf16 %v3203_v53, %v3203_v53  ;;  %7402 = vmatpush3.bf16.msra.mxu0 %v7897_v14 }
 0x2f7   : > { %v8018_v6 = vpop.eup %8017  ;;  %v3529_v23 = vshrl.u32 %v6572_v49, 16  ;;  %v3532_v21 = vshll.u32 %v6572_v49, 16  ;;  %v3206_v13 = vmul.f32 %v8016_v45, %v9736_v32  ;;  %v3699_v3 = vsel %vm8698_vm6, %v3483_v10, %v3698_v4  ;;  %v9855_v4 = vld [vmem:[#allocation3 + $0x24] sm:$0xff]   ;;  %v3723_v10 = vld [vmem:[#allocation3 + $0xb0] sm:$0x1] }
 0x2f8   : > { %v8020_v15 = vpop.eup %8019  ;;  %v3488_v20 = vrot.slane %v3486_v59, 7  ;;  %v3508_v42 = vor.u32 %v3506_v24, %v3505_v40  ;;  %v3510_v7 = vrot.slane %v3505_v40, 4  ;;  %3700 = vst [vmem:[#allocation3 + $0x84] sm:$0xf] %v3699_v3  ;;  %v3512_v39 = vshrl.u32 %v6570_v18, 16  ;;  %v9862_v40 = vld [vmem:[#allocation3 + $0x30] sm:$0xff]  }
 0x2f9   : > { %v8022_v61 = vpop.eup %8021  ;;  %v9836_v9 = vrot.slane %v3529_v23, 7  ;;  %v3515_v36 = vshll.u32 %v6570_v18, 16  ;;  %v6573_v22 = vpack.c.bf16 %v3206_v13, %v3206_v13  ;;  %v3108_v34 = vadd.f32 1.0, %v8018_v6  ;;  %v7843_v24 = vld [vmem:[#allocation3 + $0x2c] ss:$0 sps:$4 sm:$0x11]  }
 0x2fa   : > { %v8024_v30 = vpop.eup %8023  ;;  %v3491_v47 = vor.u32 %v3489_v37, %v3488_v20  ;;  %v3493_v60 = vrot.slane %v3488_v20, 4  ;;  %v3509_v32 = vsel %vm8693_vm5, %v3501_v29, %v3508_v42  ;;  %v3710_v38 = vsel %vm8704_vm8, %v3510_v7, %v3709_v0  ;;  %v9884_v18 = vld [vmem:[#allocation3 + $0x44] ss:$0 sps:$4 sm:$0x11]  }
 0x2fb   : > { %v3534_v25 = vor.u32 %v3532_v21, %v9836_v9  ;;  %3708 = vst [vmem:[#allocation3 + $0x94] sm:$0xf] %v3509_v32  ;;  %3711 = vst [vmem:[#allocation3 + $0x98] sm:$0x1] %v3710_v38  ;;  %v9849_v11 = vrot.slane %v3512_v39, 7  ;;  %v3113_v54 = vadd.f32 1.0, %v8020_v15  ;;  %8027 = vrcp.f32 %v3108_v34 }
 0x2fc   : > { %v3492_v2 = vsel %vm8693_vm5, %v3484_v31, %v3491_v47  ;;  %v3703_v26 = vsel %vm8704_vm8, %v3493_v60, %v3702_v8  ;;  %v3111_v55 = vadd.f32 1.0, %v8022_v61  ;;  %v3535_v12 = vrot.slane %v9836_v9, 4  ;;  %v9882_v21 = vld [vmem:[#allocation3 + $0x3c] sm:$0xff]   ;;  %v9896_v39 = vld [vmem:[#allocation3 + $0x48] sm:$0xff]  }
 0x2fd   : > { %3701 = vst [vmem:[#allocation3 + $0x88] sm:$0xf] %v3492_v2  ;;  %3704 = vst [vmem:[#allocation3 + $0x8c] sm:$0x1] %v3703_v26  ;;  %v3720_v29 = vsel %vm8698_vm6, %v3534_v25, %v3719_v48  ;;  %v3517_v44 = vor.u32 %v3515_v36, %v9849_v11  ;;  %v3537_v27 = vshrl.u32 %v6573_v22, 16  ;;  %v3114_v5 = vadd.f32 1.0, %v8024_v30 }
 0x2fe   : > { %3721 = vst [vmem:[#allocation3 + $0xa8] sm:$0xf] %v3720_v29  ;;  %v3974_v49 = vrot.slane %v3972_v56, 1  ;;  %v4152_v45 = vrot.slane %v9788_v63, 1  ;;  %v3540_v6 = vshll.u32 %v6573_v22, 16  ;;  %8029 = vrcp.f32 %v3113_v54 }
 0x2ff   : > { %v8026_v59 = vpop.eup %8025  ;;  %v3713_v53 = vsel %vm8698_vm6, %v3517_v44, %v3712_v28  ;;  %v3539_v14 = vrot.slane %v3537_v27, 7  ;;  %8031 = vrcp.f32 %v3111_v55  ;;  %v9873_v56 = vld [vmem:[#allocation3 + $0x38] ss:$0 sps:$4 sm:$0x11]   ;;  %v3979_v20 = vshll.u32 %v9855_v4, 16 }
 0x300   : > { %3714 = vst [vmem:[#allocation3 + $0x9c] sm:$0xf] %v3713_v53  ;;  %v3112_v37 = vadd.f32 1.0, %v8026_v59  ;;  %v9866_v23 = vsel %vm1204_vm7, %v9828_v57, %v3974_v49  ;;  %v9871_v63 = vsel %vm1413_vm9, %v4151_v33, %v4152_v45  ;;  %8033 = vrcp.f32 %v3114_v5  ;;  %v9913_v55 = vld [vmem:[#allocation3 + $0x50] ss:$0 sps:$4 sm:$0x11]  }
 0x301   : > { %v3542_v15 = vor.u32 %v3540_v6, %v3539_v14  ;;  %v3544_v0 = vrot.slane %v3539_v14, 4  ;;  %4888 = vmatprep.mubr.bf16.mxu1 %v9866_v23  ;;  %5042 = vmatmul.mubr.bf16.gmra.mrb[164].mxu0 %v9871_v63  ;;  %v3977_v46 = vshrl.u32 %v9855_v4, 16  ;;  %v3984_v33 = vshll.u32 %v7843_v24, 16 }
 0x302   : > { %8035 = vrcp.f32 %v3112_v37  ;;  %5049 = vmatprep.mubr.bf16.mxu0 %v9855_v4  ;;  %4889 = vmatmul.mubr.bf16.gmra.mrb[136].mxu1 %v9592_v17  ;;  %v4154_v57 = vrot.slane %v9592_v17, 1  ;;  %v3981_v3 = vrot.slane %v3979_v20, 1  ;;  %v4155_v42 = vrot.slane %v9805_v51, 1 }
 0x303   : > { %v3543_v13 = vsel %vm8693_vm5, %v3535_v12, %v3542_v15  ;;  %v3724_v61 = vsel %vm8704_vm8, %v3544_v0, %v3723_v10  ;;  %v3991_v7 = vshll.u32 %v9862_v40, 16  ;;  %v3996_v8 = vshll.u32 %v9873_v56, 16 }
 0x304   : > { %3722 = vst [vmem:[#allocation3 + $0xac] sm:$0xf] %v3543_v13  ;;  %3725 = vst [vmem:[#allocation3 + $0xb0] sm:$0x1] %v3724_v61  ;;  %v3982_v17 = vor.u32 %v3981_v3, %v3977_v46  ;;  %v3986_v9 = vrot.slane %v3984_v33, 1  ;;  %v4157_v30 = vrot.slane %v9855_v4, 1  ;;  %v9902_v32 = vsel %vm1413_vm9, %v4154_v57, %v4155_v42 }
 0x305   : > { %v4158_v31 = vrot.slane %v7843_v24, 1  ;;  %v3989_v47 = vshrl.u32 %v9862_v40, 16  ;;  %v3993_v60 = vrot.slane %v3991_v7, 1  ;;  %v4003_v48 = vshll.u32 %v9882_v21, 16  ;;  %v8028_v25 = vpop.eup %8027 }
 0x306   : > { %v9899_v51 = vsel %vm1204_vm7, %v3982_v17, %v3986_v9  ;;  %v4001_v38 = vshrl.u32 %v9882_v21, 16  ;;  %v3998_v2 = vrot.slane %v3996_v8, 1  ;;  %v4008_v22 = vshll.u32 %v9884_v18, 16 }
 0x307   : > { %4896 = vmatprep.mubr.bf16.mxu1 %v9899_v51  ;;  %v3994_v36 = vor.u32 %v3993_v60, %v3989_v47  ;;  %v4005_v26 = vrot.slane %v4003_v48, 1  ;;  %v3518_v28 = vrot.slane %v9849_v11, 4  ;;  %v3204_v34 = vmul.f32 %v8028_v25, %v9740_v19  ;;  %v9934_v48 = vld [vmem:[#allocation3 + $0x54] sm:$0xff]  }
 0x308   : > { %v8030_v29 = vpop.eup %8029  ;;  %v9911_v54 = vsel %vm1413_vm9, %v4157_v30, %v4158_v31  ;;  %v4015_v19 = vshll.u32 %v9896_v39, 16  ;;  %v4160_v24 = vrot.slane %v9862_v40, 1  ;;  %v4010_v6 = vrot.slane %v4008_v22, 1 }
 0x309   : > { %5050 = vmatmul.mubr.bf16.gmra.mrb[168].mxu0 %v9902_v32  ;;  %v8032_v12 = vpop.eup %8031  ;;  %v3209_v44 = vmul.f32 %v8030_v29, %v9779_v1  ;;  %v9919_v27 = vsel %vm1204_vm7, %v3994_v36, %v3998_v2  ;;  %v4006_v11 = vor.u32 %v4005_v26, %v4001_v38  ;;  %v6571_v49 = vpack.c.bf16 %v3204_v34, %v3204_v34  ;;  %v3726_v36 = vld [vmem:[#allocation3 + $0xb4] sm:$0xf] }
 0x30a   : > { %5057 = vmatprep.mubr.bf16.mxu0 %v9862_v40  ;;  %4897 = vmatmul.mubr.bf16.gmra.mrb[140].mxu1 %v9855_v4  ;;  %v8034_v5 = vpop.eup %8033  ;;  %v3207_v45 = vmul.f32 %v8032_v12, %v9782_v41  ;;  %v4161_v1 = vrot.slane %v9873_v56, 1  ;;  %v4013_v10 = vshrl.u32 %v9896_v39, 16  ;;  %v4020_v20 = vshll.u32 %v9913_v55, 16  ;;  %v3737_v12 = vld [vmem:[#allocation3 + $0xc8] sm:$0x1]  ;;  %v9969_v56 = vld [vmem:[#allocation3 + $0x60] sm:$0xff]  }
 0x30b   : > { %4904 = vmatprep.mubr.bf16.mxu1 %v9919_v27  ;;  %v6576_v53 = vpack.c.bf16 %v3209_v44, %v3209_v44  ;;  %v3210_v14 = vmul.f32 %v8034_v5, %v9797_v62  ;;  %v3520_v37 = vshrl.u32 %v6571_v49, 16  ;;  %v9931_v33 = vsel %vm1204_vm7, %v4006_v11, %v4010_v6  ;;  %v3716_v62 = vld [vmem:[#allocation3 + $0xa4] sm:$0x1] }
 0x30c   : > { %v8036_v59 = vpop.eup %8035  ;;  %v6574_v15 = vpack.c.bf16 %v3207_v45, %v3207_v45  ;;  %v4017_v57 = vrot.slane %v4015_v19, 1  ;;  %v3523_v61 = vshll.u32 %v6571_v49, 16 }
 0x30d   : > { %v3208_v0 = vmul.f32 %v8036_v59, %v9815_v35  ;;  %v3563_v41 = vshrl.u32 %v6576_v53, 16  ;;  %v6577_v46 = vpack.c.bf16 %v3210_v14, %v3210_v14  ;;  %v3522_v13 = vrot.slane %v3520_v37, 7  ;;  %v3733_v35 = vld [vmem:[#allocation3 + $0xc0] sm:$0xf]  ;;  %v3730_v59 = vld [vmem:[#allocation3 + $0xbc] sm:$0x1] }
 0x30e   : > { %v3546_v3 = vshrl.u32 %v6574_v15, 16  ;;  %v3566_v8 = vshll.u32 %v6576_v53, 16  ;;  %v3549_v17 = vshll.u32 %v6574_v15, 16  ;;  %v4018_v53 = vor.u32 %v4017_v57, %v4013_v10  ;;  %v7855_v57 = vld [vmem:[#allocation3 + $0x5c] ss:$0 sps:$4 sm:$0x11]  }
 0x30f   : > { %v6575_v42 = vpack.c.bf16 %v3208_v0, %v3208_v0  ;;  %v3565_v7 = vrot.slane %v3563_v41, 7  ;;  %v3571_v9 = vshrl.u32 %v6577_v46, 16  ;;  %v3525_v30 = vor.u32 %v3523_v61, %v3522_v13 }
 0x310   : > { %v3527_v31 = vrot.slane %v3522_v13, 4  ;;  %v3548_v47 = vrot.slane %v3546_v3, 7  ;;  %v3574_v26 = vshll.u32 %v6577_v46, 16  ;;  %v4027_v14 = vshll.u32 %v9934_v48, 16 }
 0x311   : > { %v3554_v60 = vshrl.u32 %v6575_v42, 16  ;;  %5058 = vmatmul.mubr.bf16.gmra.mrb[172].mxu0 %v9911_v54  ;;  %v3568_v38 = vor.u32 %v3566_v8, %v3565_v7  ;;  %v3569_v25 = vrot.slane %v3565_v7, 4  ;;  %v3573_v2 = vrot.slane %v3571_v9, 7  ;;  %v7858_v7 = vld [vmem:[#allocation3 + $0x68] ss:$0 sps:$4 sm:$0x11]  }
 0x312   : > { %5065 = vmatprep.mubr.bf16.mxu0 %v9882_v21  ;;  %4905 = vmatmul.mubr.bf16.gmra.mrb[144].mxu1 %v9862_v40  ;;  %v3526_v22 = vsel %vm8693_vm5, %v3518_v28, %v3525_v30  ;;  %v3717_v29 = vsel %vm8704_vm8, %v3527_v31, %v3716_v62  ;;  %v3551_v34 = vor.u32 %v3549_v17, %v3548_v47  ;;  %v3557_v44 = vshll.u32 %v6575_v42, 16  ;;  %v9985_v17 = vld [vmem:[#allocation3 + $0x6c] sm:$0xff]  }
 0x313   : > { %4912 = vmatprep.mubr.bf16.mxu1 %v9931_v33  ;;  %3715 = vst [vmem:[#allocation3 + $0xa0] sm:$0xf] %v3526_v22  ;;  %3718 = vst [vmem:[#allocation3 + $0xa4] sm:$0x1] %v3717_v29  ;;  %v3734_v11 = vsel %vm8698_vm6, %v3568_v38, %v3733_v35  ;;  %v3576_v19 = vor.u32 %v3574_v26, %v3573_v2  ;;  %v3578_v5 = vrot.slane %v3573_v2, 4  ;;  %v3556_v49 = vrot.slane %v3554_v60, 7 }
 0x314   : > { %3735 = vst [vmem:[#allocation3 + $0xc0] sm:$0xf] %v3734_v11  ;;  %v3552_v45 = vrot.slane %v3548_v47, 4  ;;  %v3727_v28 = vsel %vm8698_vm6, %v3551_v34, %v3726_v36  ;;  %v9961_v10 = vsel %vm1413_vm9, %v4160_v24, %v4161_v1  ;;  %v4022_v46 = vrot.slane %v4020_v20, 1  ;;  %v10001_v26 = vld [vmem:[#allocation3 + $0x78] sm:$0xff]  }
 0x315   : > { %3728 = vst [vmem:[#allocation3 + $0xb4] sm:$0xf] %v3727_v28  ;;  %v3577_v6 = vsel %vm8693_vm5, %v3569_v25, %v3576_v19  ;;  %v3738_v37 = vsel %vm8704_vm8, %v3578_v5, %v3737_v12  ;;  %v3559_v15 = vor.u32 %v3557_v44, %v3556_v49  ;;  %v3561_v0 = vrot.slane %v3556_v49, 4  ;;  %v7863_v36 = vld [vmem:[#allocation3 + $0x74] ss:$0 sps:$4 sm:$0x11]  }
 0x316   : > { %3736 = vst [vmem:[#allocation3 + $0xc4] sm:$0xf] %v3577_v6  ;;  %3739 = vst [vmem:[#allocation3 + $0xc8] sm:$0x1] %v3738_v37  ;;  %v9967_v43 = vsel %vm1204_vm7, %v4018_v53, %v4022_v46  ;;  %v4029_v52 = vrot.slane %v4027_v14, 1  ;;  %v4163_v24 = vrot.slane %v9882_v21, 1 }
 0x317   : > { %v3560_v41 = vsel %vm8693_vm5, %v3552_v45, %v3559_v15  ;;  %v3731_v50 = vsel %vm8704_vm8, %v3561_v0, %v3730_v59  ;;  %v4164_v1 = vrot.slane %v9884_v18, 1  ;;  %v4025_v20 = vshrl.u32 %v9934_v48, 16  ;;  %v7866_v49 = vld [vmem:[#allocation3 + $0x80] ss:$0 sps:$4 sm:$0x11]   ;;  %v10016_v59 = vld [vmem:[#allocation3 + $0x84] sm:$0xff]  }
 0x318   : > { %3729 = vst [vmem:[#allocation3 + $0xb8] sm:$0xf] %v3560_v41  ;;  %3732 = vst [vmem:[#allocation3 + $0xbc] sm:$0x1] %v3731_v50  ;;  %v4032_v13 = vshll.u32 %v7855_v57, 16  ;;  %v4039_v3 = vshll.u32 %v9969_v56, 16 }
 0x319   : > { %5066 = vmatmul.mubr.bf16.gmra.mrb[176].mxu0 %v9961_v10  ;;  %v4030_v61 = vor.u32 %v4029_v52, %v4025_v20  ;;  %v9977_v42 = vsel %vm1413_vm9, %v4163_v24, %v4164_v1  ;;  %v4166_v9 = vrot.slane %v9896_v39, 1  ;;  %v4167_v30 = vrot.slane %v9913_v55, 1  ;;  %v7871_v46 = vld [vmem:[#allocation3 + $0x8c] ss:$0 sps:$4 sm:$0x11]   ;;  %v10031_v24 = vld [vmem:[#allocation3 + $0x90] sm:$0xff]  }
 0x31a   : > { %5073 = vmatprep.mubr.bf16.mxu0 %v9896_v39  ;;  %4913 = vmatmul.mubr.bf16.gmra.mrb[148].mxu1 %v9882_v21  ;;  %v4034_v62 = vrot.slane %v4032_v13, 1  ;;  %v4041_v18 = vrot.slane %v4039_v3, 1  ;;  %v4037_v31 = vshrl.u32 %v9969_v56, 16  ;;  %v4044_v35 = vshll.u32 %v7858_v7, 16 }
 0x31b   : > { %4920 = vmatprep.mubr.bf16.mxu1 %v9967_v43  ;;  %v4051_v60 = vshll.u32 %v9985_v17, 16  ;;  %v9993_v38 = vsel %vm1413_vm9, %v4166_v9, %v4167_v30  ;;  %v4169_v22 = vrot.slane %v9934_v48, 1  ;;  %v4170_v29 = vrot.slane %v7855_v57, 1  ;;  %v7874_v9 = vld [vmem:[#allocation3 + $0x98] ss:$0 sps:$4 sm:$0x11]  }
 0x31c   : > { %v9983_v8 = vsel %vm1204_vm7, %v4030_v61, %v4034_v62  ;;  %v4042_v47 = vor.u32 %v4041_v18, %v4037_v31  ;;  %v4046_v25 = vrot.slane %v4044_v35, 1  ;;  %v4049_v34 = vshrl.u32 %v9985_v17, 16  ;;  %v10046_v35 = vld [vmem:[#allocation3 + $0x9c] sm:$0xff]  }
 0x31d   : > { %v4053_v55 = vrot.slane %v4051_v60, 1  ;;  %v4056_v12 = vshll.u32 %v7863_v36, 16  ;;  %v4063_v11 = vshll.u32 %v10001_v26, 16  ;;  %v10008_v19 = vsel %vm1413_vm9, %v4169_v22, %v4170_v29 }
 0x31e   : > { %v9999_v2 = vsel %vm1204_vm7, %v4042_v47, %v4046_v25  ;;  %v4172_v53 = vrot.slane %v9969_v56, 1  ;;  %v4173_v14 = vrot.slane %v7858_v7, 1  ;;  %v4061_v6 = vshrl.u32 %v10001_v26, 16 }
 0x31f   : > { %v4054_v44 = vor.u32 %v4053_v55, %v4049_v34  ;;  %v4058_v5 = vrot.slane %v4056_v12, 1  ;;  %v4065_v28 = vrot.slane %v4063_v11, 1  ;;  %v4068_v37 = vshll.u32 %v7866_v49, 16 }
 0x320   : > { %v4075_v0 = vshll.u32 %v10016_v59, 16  ;;  %v10023_v41 = vsel %vm1413_vm9, %v4172_v53, %v4173_v14  ;;  %v4175_v1 = vrot.slane %v9985_v17, 1  ;;  %v4176_v20 = vrot.slane %v7863_v36, 1 }
 0x321   : > { %5074 = vmatmul.mubr.bf16.gmra.mrb[180].mxu0 %v9977_v42  ;;  %v10014_v45 = vsel %vm1204_vm7, %v4054_v44, %v4058_v5  ;;  %v4066_v15 = vor.u32 %v4065_v28, %v4061_v6  ;;  %v4070_v50 = vrot.slane %v4068_v37, 1  ;;  %v4073_v13 = vshrl.u32 %v10016_v59, 16  ;;  %v7879_v44 = vld [vmem:[#allocation3 + $0xa4] ss:$0 sps:$4 sm:$0x11]   ;;  %v10061_v28 = vld [vmem:[#allocation3 + $0xa8] sm:$0xff]  }
 0x322   : > { %5081 = vmatprep.mubr.bf16.mxu0 %v9934_v48  ;;  %4921 = vmatmul.mubr.bf16.gmra.mrb[152].mxu1 %v9896_v39  ;;  %v4077_v52 = vrot.slane %v4075_v0, 1  ;;  %v4080_v61 = vshll.u32 %v7871_v46, 16  ;;  %v4087_v62 = vshll.u32 %v10031_v24, 16  ;;  %v10038_v7 = vsel %vm1413_vm9, %v4175_v1, %v4176_v20 }
 0x323   : > { %4928 = vmatprep.mubr.bf16.mxu1 %v9983_v8  ;;  %v10029_v57 = vsel %vm1204_vm7, %v4066_v15, %v4070_v50  ;;  %v4178_v60 = vrot.slane %v10001_v26, 1  ;;  %v4179_v25 = vrot.slane %v7866_v49, 1  ;;  %v4085_v36 = vshrl.u32 %v10031_v24, 16 }
 0x324   : > { %v4078_v3 = vor.u32 %v4077_v52, %v4073_v13  ;;  %v4082_v18 = vrot.slane %v4080_v61, 1  ;;  %v4089_v31 = vrot.slane %v4087_v62, 1  ;;  %v4092_v55 = vshll.u32 %v7874_v9, 16 }
 0x325   : > { %v4099_v29 = vshll.u32 %v10046_v35, 16  ;;  %v10053_v34 = vsel %vm1413_vm9, %v4178_v60, %v4179_v25  ;;  %v4181_v6 = vrot.slane %v10016_v59, 1  ;;  %v4182_v15 = vrot.slane %v7871_v46, 1 }
 0x326   : > { %v10044_v30 = vsel %vm1204_vm7, %v4078_v3, %v4082_v18  ;;  %v4090_v22 = vor.u32 %v4089_v31, %v4085_v36  ;;  %v4094_v12 = vrot.slane %v4092_v55, 1  ;;  %v4097_v0 = vshrl.u32 %v10046_v35, 16  ;;  %v7882_v3 = vld [vmem:[#allocation3 + $0xb0] ss:$0 sps:$4 sm:$0x11]   ;;  %v10080_v18 = vld [vmem:[#allocation3 + $0xb4] sm:$0xff]  }
 0x327   : > { %v4101_v49 = vrot.slane %v4099_v29, 1  ;;  %v4104_v50 = vshll.u32 %v7879_v44, 16  ;;  %v4111_v20 = vshll.u32 %v10061_v28, 16  ;;  %v10072_v13 = vsel %vm1413_vm9, %v4181_v6, %v4182_v15 }
 0x328   : > { %v10059_v5 = vsel %vm1204_vm7, %v4090_v22, %v4094_v12  ;;  %v4184_v31 = vrot.slane %v10031_v24, 1  ;;  %v4109_v60 = vshrl.u32 %v10061_v28, 16  ;;  %v4116_v25 = vshll.u32 %v7882_v3, 16  ;;  %v7887_v12 = vld [vmem:[#allocation3 + $0xbc] ss:$0 sps:$4 sm:$0x11]  }
 0x329   : > { %5082 = vmatmul.mubr.bf16.gmra.mrb[184].mxu0 %v9993_v38  ;;  %v4102_v1 = vor.u32 %v4101_v49, %v4097_v0  ;;  %v4106_v61 = vrot.slane %v4104_v50, 1  ;;  %v4113_v62 = vrot.slane %v4111_v20, 1  ;;  %v4123_v55 = vshll.u32 %v10080_v18, 16 }
 0x32a   : > { %5089 = vmatprep.mubr.bf16.mxu0 %v9969_v56  ;;  %4929 = vmatmul.mubr.bf16.gmra.mrb[156].mxu1 %v9934_v48  ;;  %v4118_v29 = vrot.slane %v4116_v25, 1  ;;  %v4187_v49 = vrot.slane %v10046_v35, 1  ;;  %v4121_v6 = vshrl.u32 %v10080_v18, 16  ;;  %v4191_v20 = vrot.slane %v7882_v3, 1  ;;  %v7899_v3 = vld [vmem:[#allocation9 + $0x208] sm:$0xff]   ;;  %v7900_v25 = vld [vmem:[#allocation9 + $0x210] sm:$0xff]  }
 0x32b   : > { %4936 = vmatprep.mubr.bf16.mxu1 %v9999_v2  ;;  %v10078_v46 = vsel %vm1204_vm7, %v4102_v1, %v4106_v61  ;;  %v4114_v36 = vor.u32 %v4113_v62, %v4109_v60  ;;  %v10112_v62 = vld [vmem:[#allocation3 + $0xc0] sm:$0xff]  }
 0x331   : > { %5090 = vmatmul.mubr.bf16.gmra.mrb[188].mxu0 %v10008_v19 }
 0x332   : > { %5097 = vmatprep.mubr.bf16.mxu0 %v9985_v17  ;;  %4937 = vmatmul.mubr.bf16.gmra.mrb[160].mxu1 %v9969_v56 }
 0x333   : > { %4944 = vmatprep.mubr.bf16.mxu1 %v10014_v45 }
 0x339   : > { %5098 = vmatmul.mubr.bf16.gmra.mrb[192].mxu0 %v10023_v41  ;;  %v7067_v47 = vpop.f32.mrb[128].mxu1 }
 0x33a   : > { %5105 = vmatprep.mubr.bf16.mxu0 %v10001_v26  ;;  %4945 = vmatmul.mubr.bf16.gmra.mrb[164].mxu1 %v9985_v17  ;;  %v7068_v11 = vpop.f32.mrb[129].mxu1 }
 0x33b   : > { %4952 = vmatprep.mubr.bf16.mxu1 %v10029_v57  ;;  %v10063_v53 = vadd.f32 %v7068_v11, %v7067_v47  ;;  %v7070_v14 = vpop.f32.mrb[130].mxu1  ;;  %v4185_v47 = vrot.slane %v7874_v9, 1  ;;  %v10093_v11 = vsel %vm1204_vm7, %v4114_v36, %v4118_v29  ;;  %v4125_v9 = vrot.slane %v4123_v55, 1  ;;  %v8176_v36 = vld [vmem:[#allocation3 + $0x18] sm:$0xff]   ;;  %v7903_v55 = vld [vmem:[#allocation9 + $0x228] sm:$0xff]  }
 0x33c   : > { %v7071_v37 = vpop.f32.mrb[131].mxu1 }
 0x33d   : > { %v10068_v52 = vadd.f32 %v7071_v37, %v7070_v14  ;;  %v10087_v22 = vsel %vm1413_vm9, %v4184_v31, %v4185_v47  ;;  %v4188_v14 = vrot.slane %v7879_v44, 1  ;;  %v4128_v37 = vshll.u32 %v7887_v12, 16 }
 0x33e   : > { %v4126_v15 = vor.u32 %v4125_v9, %v4121_v6  ;;  %v4190_v44 = vrot.slane %v10061_v28, 1  ;;  %v4193_v31 = vrot.slane %v10080_v18, 1  ;;  %v4194_v47 = vrot.slane %v7887_v12, 1 }
 0x33f   : > { %v10099_v0 = vsel %vm1413_vm9, %v4187_v49, %v4188_v14  ;;  %v4130_v50 = vrot.slane %v4128_v37, 1 }
 0x340   : > { %v10110_v61 = vsel %vm1413_vm9, %v4190_v44, %v4191_v20  ;;  %v10120_v60 = vsel %vm1413_vm9, %v4193_v31, %v4194_v47  ;;  %v4222_v44 = vshrl.u32 %v10112_v62, 16  ;;  %v10192_v20 = vld [vmem:[#allocation3 + $0xd4] ss:$0 sps:$4 sm:$0x11]  }
 0x341   : > { %5106 = vmatmul.mubr.bf16.gmra.mrb[196].mxu0 %v10038_v7  ;;  %v10105_v1 = vsel %vm1204_vm7, %v4126_v15, %v4130_v50 }
 0x342   : > { %5113 = vmatprep.mubr.bf16.mxu0 %v10016_v59  ;;  %4953 = vmatmul.mubr.bf16.gmra.mrb[168].mxu1 %v10001_v26 }
 0x343   : > { %4960 = vmatprep.mubr.bf16.mxu1 %v10044_v30 }
 0x349   : > { %5114 = vmatmul.mubr.bf16.gmra.mrb[200].mxu0 %v10053_v34 }
 0x34a   : > { %5121 = vmatprep.mubr.bf16.mxu0 %v10031_v24  ;;  %4961 = vmatmul.mubr.bf16.gmra.mrb[172].mxu1 %v10016_v59 }
 0x34b   : > { %4968 = vmatprep.mubr.bf16.mxu1 %v10059_v5 }
 0x351   : > { %5122 = vmatmul.mubr.bf16.gmra.mrb[204].mxu0 %v10072_v13 }
 0x352   : > { %5129 = vmatprep.mubr.bf16.mxu0 %v10046_v35  ;;  %4969 = vmatmul.mubr.bf16.gmra.mrb[176].mxu1 %v10031_v24 }
 0x353   : > { %4976 = vmatprep.mubr.bf16.mxu1 %v10078_v46 }
 0x359   : > { %5130 = vmatmul.mubr.bf16.gmra.mrb[208].mxu0 %v10087_v22 }
 0x35a   : > { %5137 = vmatprep.mubr.bf16.mxu0 %v10061_v28  ;;  %4977 = vmatmul.mubr.bf16.gmra.mrb[180].mxu1 %v10046_v35 }
 0x35b   : > { %4984 = vmatprep.mubr.bf16.mxu1 %v10093_v11 }
 0x361   : > { %5138 = vmatmul.mubr.bf16.gmra.mrb[212].mxu0 %v10099_v0 }
 0x362   : > { %5145 = vmatprep.mubr.bf16.mxu0 %v10080_v18  ;;  %4985 = vmatmul.mubr.bf16.gmra.mrb[184].mxu1 %v10061_v28 }
 0x363   : > { %4992 = vmatprep.mubr.bf16.mxu1 %v10105_v1 }
 0x369   : > { %5146 = vmatmul.mubr.bf16.gmra.mrb[216].mxu0 %v10110_v61 }
 0x36a   : > { %5153 = vmatprep.mubr.bf16.mxu0 %v10112_v62  ;;  %4993 = vmatmul.mubr.bf16.gmra.mrb[188].mxu1 %v10080_v18 }
 0x36b   : > { %5194 = vmatprep.mubr.bf16.mxu1 %v9871_v63  ;;  %v7901_v63 = vld [vmem:[#allocation9 + $0x218] sm:$0xff]  }
 0x371   : > { %5154 = vmatmul.mubr.bf16.gmra.mrb[220].mxu0 %v10120_v60 }
 0x372   : > { %5355 = vmatprep.mubr.bf16.mxu0 %v9866_v23  ;;  %5195 = vmatmul.mubr.bf16.vlgmr.msra.gmra.mrb[192].mxu1 %v9823_v58  ;;  %v7902_v58 = vld [vmem:[#allocation9 + $0x220] sm:$0xff]  }
 0x373   : > { %5202 = vmatprep.mubr.bf16.mxu1 %v9902_v32  ;;  %7572 = vmatpush3.bf16.msra.mxu1 %v9825_v16  ;;  %v7904_v16 = vld [vmem:[#allocation9 + $0x230] sm:$0xff]  }
 0x374   : > { %7573 = vmatprep.subr.bf16.mxu1 %v7899_v3 }
 0x377   : > { %7574 = vmatpush3.bf16.msra.mxu1 %v7899_v3 }
 0x378   : > { %7575 = vmatprep.subr.bf16.mxu1 %v7900_v25 }
 0x379   : > { %5356 = vmatmul.mubr.bf16.vlgmr.msra.gmra.mrb[224].mxu0 %v8176_v36 }
 0x37a   : > { %5363 = vmatprep.mubr.bf16.mxu0 %v9899_v51  ;;  %5203 = vmatmul.mubr.bf16.gmra.mrb[196].mxu1 %v9866_v23  ;;  %v7906_v23 = vld [vmem:[#allocation9 + $0x238] sm:$0xff]  }
 0x37b   : > { %5210 = vmatprep.mubr.bf16.mxu1 %v9911_v54  ;;  %7576 = vmatpush3.bf16.msra.mxu1 %v7900_v25 }
 0x37c   : > { %7577 = vmatprep.subr.bf16.mxu1 %v7901_v63 }
 0x37f   : > { %7578 = vmatpush3.bf16.msra.mxu1 %v7901_v63 }
 0x380   : > { %7579 = vmatprep.subr.bf16.mxu1 %v7902_v58 }
 0x381   : > { %5364 = vmatmul.mubr.bf16.gmra.mrb[228].mxu0 %v9855_v4 }
 0x382   : > { %5371 = vmatprep.mubr.bf16.mxu0 %v9919_v27  ;;  %5211 = vmatmul.mubr.bf16.gmra.mrb[200].mxu1 %v9899_v51 }
 0x383   : > { %5218 = vmatprep.mubr.bf16.mxu1 %v9961_v10  ;;  %7580 = vmatpush3.bf16.msra.mxu1 %v7902_v58 }
 0x384   : > { %7581 = vmatprep.subr.bf16.mxu1 %v7903_v55 }
 0x387   : > { %7582 = vmatpush3.bf16.msra.mxu1 %v7903_v55 }
 0x388   : > { %7583 = vmatprep.subr.bf16.mxu1 %v7904_v16 }
 0x389   : > { %5372 = vmatmul.mubr.bf16.gmra.mrb[232].mxu0 %v9862_v40 }
 0x38a   : > { %5379 = vmatprep.mubr.bf16.mxu0 %v9931_v33  ;;  %5219 = vmatmul.mubr.bf16.gmra.mrb[204].mxu1 %v9919_v27 }
 0x38b   : > { %5226 = vmatprep.mubr.bf16.mxu1 %v9977_v42  ;;  %7584 = vmatpush3.bf16.msra.mxu1 %v7904_v16  ;;  %v4234_v16 = vrot.slane %v10112_v62, 1 }
 0x38c   : > { %7585 = vmatprep.subr.bf16.mxu1 %v7906_v23 }
 0x38d   : > { %v7179_v4 = vpop.f32.mrb[160].mxu0 }
 0x38e   : > { %v7180_v51 = vpop.f32.mrb[161].mxu0 }
 0x38f   : > { %7586 = vmatpush3.bf16.msra.mxu1 %v7906_v23  ;;  %v7181_v29 = vadd.f32 %v7180_v51, %v7179_v4  ;;  %v7182_v12 = vpop.f32.mrb[162].mxu0 }
 0x390   : > { %v7183_v9 = vpop.f32.mrb[163].mxu0 }
 0x391   : > { %5380 = vmatmul.mubr.bf16.gmra.mrb[236].mxu0 %v9882_v21  ;;  %v10142_v40 = vadd.f32 %v7181_v29, %v10063_v53  ;;  %v7184_v27 = vadd.f32 %v7183_v9, %v7182_v12  ;;  %v4255_v9 = vshll.u32 %v10192_v20, 16 }
 0x392   : > { %5387 = vmatprep.mubr.bf16.mxu0 %v9967_v43  ;;  %5227 = vmatmul.mubr.bf16.gmra.mrb[208].mxu1 %v9931_v33 }
 0x393   : > { %5234 = vmatprep.mubr.bf16.mxu1 %v9993_v38  ;;  %v10146_v49 = vadd.f32 %v7184_v27, %v10068_v52  ;;  %v10181_v52 = vld [vmem:[#allocation3 + $0xcc] sm:$0xff]  }
 0x394   : > { %v4250_v31 = vshll.u32 %v10181_v52, 16  ;;  %v4248_v29 = vshrl.u32 %v10181_v52, 16 }
 0x396   : > { %v4252_v12 = vrot.slane %v4250_v31, 1 }
 0x399   : > { %5388 = vmatmul.mubr.bf16.gmra.mrb[240].mxu0 %v9896_v39 }
 0x39a   : > { %5395 = vmatprep.mubr.bf16.mxu0 %v9983_v8  ;;  %5235 = vmatmul.mubr.bf16.gmra.mrb[212].mxu1 %v9967_v43 }
 0x39b   : > { %5242 = vmatprep.mubr.bf16.mxu1 %v10008_v19 }
 0x3a1   : > { %5396 = vmatmul.mubr.bf16.gmra.mrb[244].mxu0 %v9934_v48 }
 0x3a2   : > { %5403 = vmatprep.mubr.bf16.mxu0 %v9999_v2  ;;  %5243 = vmatmul.mubr.bf16.gmra.mrb[216].mxu1 %v9983_v8 }
 0x3a3   : > { %5250 = vmatprep.mubr.bf16.mxu1 %v10023_v41 }
 0x3a9   : > { %5404 = vmatmul.mubr.bf16.gmra.mrb[248].mxu0 %v9969_v56 }
 0x3aa   : > { %5411 = vmatprep.mubr.bf16.mxu0 %v10014_v45  ;;  %5251 = vmatmul.mubr.bf16.gmra.mrb[220].mxu1 %v9999_v2 }
 0x3ab   : > { %5258 = vmatprep.mubr.bf16.mxu1 %v10038_v7 }
 0x3b1   : > { %5412 = vmatmul.mubr.bf16.gmra.mrb[252].mxu0 %v9985_v17 }
 0x3b2   : > { %5419 = vmatprep.mubr.bf16.mxu0 %v10029_v57  ;;  %5259 = vmatmul.mubr.bf16.gmra.mrb[224].mxu1 %v10014_v45 }
 0x3b3   : > { %5266 = vmatprep.mubr.bf16.mxu1 %v10053_v34 }
 0x3b9   : > { %5420 = vmatmul.mubr.bf16.gmra.mrb[0].mxu0 %v10001_v26  ;;  %v4224_v26 = vshll.u32 %v10112_v62, 16 }
 0x3ba   : > { %5427 = vmatprep.mubr.bf16.mxu0 %v10044_v30  ;;  %5267 = vmatmul.mubr.bf16.gmra.mrb[228].mxu1 %v10029_v57 }
 0x3bb   : > { %5274 = vmatprep.mubr.bf16.mxu1 %v10072_v13  ;;  %v4226_v37 = vrot.slane %v4224_v26, 1 }
 0x3c1   : > { %5428 = vmatmul.mubr.bf16.gmra.mrb[4].mxu0 %v10016_v59 }
 0x3c2   : > { %5435 = vmatprep.mubr.bf16.mxu0 %v10059_v5  ;;  %5275 = vmatmul.mubr.bf16.gmra.mrb[232].mxu1 %v10044_v30 }
 0x3c3   : > { %5282 = vmatprep.mubr.bf16.mxu1 %v10087_v22 }
 0x3c8   : > { %v7073_v21 = vpop.f32.mrb[132].mxu1 }
 0x3c9   : > { %5436 = vmatmul.mubr.bf16.gmra.mrb[8].mxu0 %v10031_v24  ;;  %v7074_v39 = vpop.f32.mrb[133].mxu1  ;;  %v7905_v24 = vld [vmem:[#allocation3 + $0xc8] ss:$0 sps:$4 sm:$0x11]  }
 0x3ca   : > { %5443 = vmatprep.mubr.bf16.mxu0 %v10078_v46  ;;  %5283 = vmatmul.mubr.bf16.gmra.mrb[236].mxu1 %v10059_v5  ;;  %v7075_v33 = vadd.f32 %v7074_v39, %v7073_v21  ;;  %v7076_v48 = vpop.f32.mrb[134].mxu1  ;;  %v4229_v50 = vshll.u32 %v7905_v24, 16 }
 0x3cb   : > { %5290 = vmatprep.mubr.bf16.mxu1 %v10099_v0  ;;  %v7077_v43 = vpop.f32.mrb[135].mxu1 }
 0x3cc   : > { %v7078_v56 = vadd.f32 %v7077_v43, %v7076_v48  ;;  %v4231_v58 = vrot.slane %v4229_v50, 1 }
 0x3d1   : > { %5444 = vmatmul.mubr.bf16.gmra.mrb[12].mxu0 %v10046_v35 }
 0x3d2   : > { %5451 = vmatprep.mubr.bf16.mxu0 %v10093_v11  ;;  %5291 = vmatmul.mubr.bf16.gmra.mrb[240].mxu1 %v10078_v46 }
 0x3d3   : > { %5298 = vmatprep.mubr.bf16.mxu1 %v10110_v61 }
 0x3d4   : > { %v7185_v8 = vpop.f32.mrb[164].mxu0 }
 0x3d5   : > { %v7186_v17 = vpop.f32.mrb[165].mxu0  ;;  %v7079_v2 = vpop.f32.mrb[136].mxu1 }
 0x3d6   : > { %v7187_v45 = vadd.f32 %v7186_v17, %v7185_v8  ;;  %v7188_v59 = vpop.f32.mrb[166].mxu0  ;;  %v7080_v57 = vpop.f32.mrb[137].mxu1  ;;  %v4253_v8 = vor.u32 %v4252_v12, %v4248_v29  ;;  %v4257_v17 = vrot.slane %v4255_v9, 1 }
 0x3d7   : > { %v7189_v30 = vpop.f32.mrb[167].mxu0  ;;  %v7081_v5 = vadd.f32 %v7080_v57, %v7079_v2  ;;  %v7082_v53 = vpop.f32.mrb[138].mxu1 }
 0x3d8   : > { %v10183_v35 = vadd.f32 %v7187_v45, %v7075_v33  ;;  %v7190_v14 = vadd.f32 %v7189_v30, %v7188_v59  ;;  %v7083_v46 = vpop.f32.mrb[139].mxu1 }
 0x3d9   : > { %5452 = vmatmul.mubr.bf16.gmra.mrb[16].mxu0 %v10061_v28  ;;  %v7084_v6 = vadd.f32 %v7083_v46, %v7082_v53  ;;  %v4227_v28 = vor.u32 %v4226_v37, %v4222_v44  ;;  %v4258_v53 = vsel %vm1204_vm7, %v4253_v8, %v4257_v17 }
 0x3da   : > { %v10186_v15 = vadd.f32 %v7190_v14, %v7078_v56  ;;  %5459 = vmatprep.mubr.bf16.mxu0 %v10105_v1  ;;  %5299 = vmatmul.mubr.bf16.gmra.mrb[244].mxu1 %v10093_v11  ;;  %v4235_v11 = vrot.slane %v7905_v24, 1 }
 0x3db   : > { %5306 = vmatprep.mubr.bf16.mxu1 %v10120_v60  ;;  %v4232_v33 = vsel %vm1204_vm7, %v4227_v28, %v4231_v58 }
 0x3dc   : > { %v7191_v47 = vpop.f32.mrb[168].mxu0  ;;  %v10206_v56 = vsel %vm1413_vm9, %v4234_v16, %v4235_v11 }
 0x3dd   : > { %v7192_v3 = vpop.f32.mrb[169].mxu0  ;;  %v7085_v25 = vpop.f32.mrb[140].mxu1 }
 0x3de   : > { %v7193_v63 = vadd.f32 %v7192_v3, %v7191_v47  ;;  %v7194_v36 = vpop.f32.mrb[170].mxu0  ;;  %v7086_v55 = vpop.f32.mrb[141].mxu1 }
 0x3df   : > { %v7195_v23 = vpop.f32.mrb[171].mxu0  ;;  %v7087_v4 = vadd.f32 %v7086_v55, %v7085_v25  ;;  %v7088_v51 = vpop.f32.mrb[142].mxu1 }
 0x3e0   : > { %v10198_v27 = vadd.f32 %v7193_v63, %v7081_v5  ;;  %v7196_v21 = vadd.f32 %v7195_v23, %v7194_v36  ;;  %v7089_v39 = vpop.f32.mrb[143].mxu1 }
 0x3e1   : > { %5460 = vmatmul.mubr.bf16.gmra.mrb[20].mxu0 %v10080_v18  ;;  %v7090_v48 = vadd.f32 %v7089_v39, %v7088_v51 }
 0x3e2   : > { %v10202_v43 = vadd.f32 %v7196_v21, %v7084_v6  ;;  %5467 = vmatprep.mubr.bf16.mxu0 %v4232_v33  ;;  %5307 = vmatmul.mubr.bf16.gmra.mrb[248].mxu1 %v10105_v1 }
 0x3e3   : > { %5314 = vmatprep.mubr.bf16.mxu1 %v10206_v56 }
 0x3e4   : > { %v7197_v2 = vpop.f32.mrb[172].mxu0 }
 0x3e5   : > { %v7198_v26 = vpop.f32.mrb[173].mxu0  ;;  %v7091_v45 = vpop.f32.mrb[144].mxu1 }
 0x3e6   : > { %v7199_v59 = vadd.f32 %v7198_v26, %v7197_v2  ;;  %v7200_v18 = vpop.f32.mrb[174].mxu0  ;;  %v7092_v57 = vpop.f32.mrb[145].mxu1 }
 0x3e7   : > { %v7201_v24 = vpop.f32.mrb[175].mxu0  ;;  %v7093_v30 = vadd.f32 %v7092_v57, %v7091_v45  ;;  %v7094_v5 = vpop.f32.mrb[146].mxu1 }
 0x3e8   : > { %v10210_v14 = vadd.f32 %v7199_v59, %v7087_v4  ;;  %v7202_v1 = vadd.f32 %v7201_v24, %v7200_v18  ;;  %v7095_v46 = vpop.f32.mrb[147].mxu1 }
 0x3e9   : > { %5468 = vmatmul.mubr.bf16.gmra.mrb[24].mxu0 %v10112_v62  ;;  %v7096_v6 = vadd.f32 %v7095_v46, %v7094_v5 }
 0x3ea   : > { %v10213_v37 = vadd.f32 %v7202_v1, %v7090_v48  ;;  %5315 = vmatmul.mubr.bf16.gmra.mrb[252].mxu1 %v4232_v33  ;;  %5475 = vmatprep.mubr.bf16.mxu0 %v4258_v53 }
 0x3eb   : > { %7587 = vmatprep.mubr.bf16.mxu1 %v9902_v32 }
 0x3ec   : > { %v7203_v50 = vpop.f32.mrb[176].mxu0 }
 0x3ed   : > { %v7204_v44 = vpop.f32.mrb[177].mxu0  ;;  %v7097_v31 = vpop.f32.mrb[148].mxu1 }
 0x3ee   : > { %v7205_v47 = vadd.f32 %v7204_v44, %v7203_v50  ;;  %v7206_v3 = vpop.f32.mrb[178].mxu0  ;;  %v7098_v28 = vpop.f32.mrb[149].mxu1 }
 0x3ef   : > { %v7207_v25 = vpop.f32.mrb[179].mxu0  ;;  %v7099_v63 = vadd.f32 %v7098_v28, %v7097_v31  ;;  %v7100_v36 = vpop.f32.mrb[150].mxu1 }
 0x3f0   : > { %v10216_v58 = vadd.f32 %v7205_v47, %v7093_v30  ;;  %v7208_v55 = vadd.f32 %v7207_v25, %v7206_v3  ;;  %v7101_v62 = vpop.f32.mrb[151].mxu1 }
 0x3f1   : > { %5476 = vmatmul.mubr.bf16.gmra.mrb[28].mxu0 %v10181_v52  ;;  %v7102_v16 = vadd.f32 %v7101_v62, %v7100_v36 }
 0x3f2   : > { %v10219_v11 = vadd.f32 %v7208_v55, %v7096_v6  ;;  %7588 = vmatmul.mubr.bf16.vlgmr.msra.gmra.mrb[0].mxu1 %v9911_v54 }
 0x3f3   : > { %7591 = vmatprep.mubr.bf16.mxu1 %v9961_v10 }
 0x3f4   : > { %v7209_v32 = vpop.f32.mrb[180].mxu0 }
 0x3f5   : > { %v7210_v23 = vpop.f32.mrb[181].mxu0  ;;  %v7103_v4 = vpop.f32.mrb[152].mxu1 }
 0x3f6   : > { %v7211_v51 = vadd.f32 %v7210_v23, %v7209_v32  ;;  %v7212_v29 = vpop.f32.mrb[182].mxu0  ;;  %v7104_v12 = vpop.f32.mrb[153].mxu1 }
 0x3f7   : > { %v7213_v9 = vpop.f32.mrb[183].mxu0  ;;  %v7105_v21 = vadd.f32 %v7104_v12, %v7103_v4  ;;  %v7106_v39 = vpop.f32.mrb[154].mxu1 }
 0x3f8   : > { %v10223_v33 = vadd.f32 %v7211_v51, %v7099_v63  ;;  %v7214_v48 = vadd.f32 %v7213_v9, %v7212_v29  ;;  %v7107_v8 = vpop.f32.mrb[155].mxu1 }
 0x3f9   : > { %v7108_v17 = vadd.f32 %v7107_v8, %v7106_v39 }
 0x3fa   : > { %v10225_v2 = vadd.f32 %v7214_v48, %v7102_v16  ;;  %7592 = vmatmul.mubr.bf16.gmra.mrb[4].mxu1 %v9977_v42 }
 0x3fb   : > { %7595 = vmatprep.mubr.bf16.mxu1 %v9993_v38 }
 0x3fc   : > { %v7215_v54 = vpop.f32.mrb[184].mxu0 }
 0x3fd   : > { %v7216_v10 = vpop.f32.mrb[185].mxu0  ;;  %v7109_v26 = vpop.f32.mrb[156].mxu1 }
 0x3fe   : > { %v7217_v45 = vadd.f32 %v7216_v10, %v7215_v54  ;;  %v7218_v59 = vpop.f32.mrb[186].mxu0  ;;  %v7110_v18 = vpop.f32.mrb[157].mxu1 }
 0x3ff   : > { %v7219_v57 = vpop.f32.mrb[187].mxu0  ;;  %v7111_v24 = vadd.f32 %v7110_v18, %v7109_v26  ;;  %v7112_v30 = vpop.f32.mrb[158].mxu1 }
 0x400   : > { %v10229_v5 = vadd.f32 %v7217_v45, %v7105_v21  ;;  %v7220_v53 = vadd.f32 %v7219_v57, %v7218_v59  ;;  %v7113_v1 = vpop.f32.mrb[159].mxu1 }
 0x401   : > { %v7114_v46 = vadd.f32 %v7113_v1, %v7112_v30 }
 0x402   : > { %v10231_v6 = vadd.f32 %v7220_v53, %v7108_v17  ;;  %7596 = vmatmul.mubr.bf16.gmra.mrb[8].mxu1 %v10008_v19 }
 0x403   : > { %7599 = vmatprep.mubr.bf16.mxu1 %v10023_v41 }
 0x404   : > { %v7221_v42 = vpop.f32.mrb[188].mxu0 }
 0x405   : > { %v7222_v38 = vpop.f32.mrb[189].mxu0  ;;  %v7115_v50 = vpop.f32.mrb[160].mxu1 }
 0x406   : > { %v7223_v44 = vadd.f32 %v7222_v38, %v7221_v42  ;;  %v7224_v31 = vpop.f32.mrb[190].mxu0  ;;  %v7116_v47 = vpop.f32.mrb[161].mxu1 }
 0x407   : > { %v7225_v3 = vpop.f32.mrb[191].mxu0  ;;  %v7117_v28 = vadd.f32 %v7116_v47, %v7115_v50  ;;  %v7118_v25 = vpop.f32.mrb[162].mxu1 }
 0x408   : > { %v10235_v63 = vadd.f32 %v7223_v44, %v7111_v24  ;;  %v7226_v36 = vadd.f32 %v7225_v3, %v7224_v31  ;;  %v7119_v55 = vpop.f32.mrb[163].mxu1 }
 0x409   : > { %v7120_v62 = vadd.f32 %v7119_v55, %v7118_v25 }
 0x40a   : > { %v10237_v16 = vadd.f32 %v7226_v36, %v7114_v46  ;;  %7600 = vmatmul.mubr.bf16.gmra.mrb[12].mxu1 %v10038_v7 }
 0x40b   : > { %7603 = vmatprep.mubr.bf16.mxu1 %v10053_v34 }
 0x40c   : > { %v7227_v19 = vpop.f32.mrb[192].mxu0 }
 0x40d   : > { %v7228_v41 = vpop.f32.mrb[193].mxu0  ;;  %v7121_v32 = vpop.f32.mrb[164].mxu1 }
 0x40e   : > { %v7229_v23 = vadd.f32 %v7228_v41, %v7227_v19  ;;  %v7230_v4 = vpop.f32.mrb[194].mxu0  ;;  %v7122_v51 = vpop.f32.mrb[165].mxu1 }
 0x40f   : > { %v7231_v29 = vpop.f32.mrb[195].mxu0  ;;  %v7123_v12 = vadd.f32 %v7122_v51, %v7121_v32  ;;  %v7124_v9 = vpop.f32.mrb[166].mxu1 }
 0x410   : > { %v10241_v21 = vadd.f32 %v7229_v23, %v7117_v28  ;;  %v7232_v39 = vadd.f32 %v7231_v29, %v7230_v4  ;;  %v7125_v48 = vpop.f32.mrb[167].mxu1 }
 0x411   : > { %v7126_v8 = vadd.f32 %v7125_v48, %v7124_v9 }
 0x412   : > { %v10243_v17 = vadd.f32 %v7232_v39, %v7120_v62  ;;  %7604 = vmatmul.mubr.bf16.gmra.mrb[16].mxu1 %v10072_v13 }
 0x413   : > { %7607 = vmatprep.mubr.bf16.mxu1 %v10087_v22 }
 0x414   : > { %v7233_v7 = vpop.f32.mrb[196].mxu0 }
 0x415   : > { %v7234_v34 = vpop.f32.mrb[197].mxu0  ;;  %v7127_v54 = vpop.f32.mrb[168].mxu1 }
 0x416   : > { %v7235_v10 = vadd.f32 %v7234_v34, %v7233_v7  ;;  %v7236_v26 = vpop.f32.mrb[198].mxu0  ;;  %v7128_v45 = vpop.f32.mrb[169].mxu1 }
 0x417   : > { %v7237_v59 = vpop.f32.mrb[199].mxu0  ;;  %v7129_v18 = vadd.f32 %v7128_v45, %v7127_v54  ;;  %v7130_v57 = vpop.f32.mrb[170].mxu1 }
 0x418   : > { %v10247_v24 = vadd.f32 %v7235_v10, %v7123_v12  ;;  %v7238_v30 = vadd.f32 %v7237_v59, %v7236_v26  ;;  %v7131_v53 = vpop.f32.mrb[171].mxu1 }
 0x419   : > { %v7132_v1 = vadd.f32 %v7131_v53, %v7130_v57 }
 0x41a   : > { %v10249_v46 = vadd.f32 %v7238_v30, %v7126_v8  ;;  %7608 = vmatmul.mubr.bf16.gmra.mrb[20].mxu1 %v10099_v0  ;;  %v4261_v0 = vrot.slane %v10192_v20, 1 }
 0x41b   : > { %7611 = vmatprep.mubr.bf16.mxu1 %v10110_v61  ;;  %v4260_v61 = vrot.slane %v10181_v52, 1 }
 0x41c   : > { %v7239_v13 = vpop.f32.mrb[200].mxu0 }
 0x41d   : > { %v7240_v22 = vpop.f32.mrb[201].mxu0  ;;  %v7133_v42 = vpop.f32.mrb[172].mxu1  ;;  %v4262_v39 = vsel %vm1413_vm9, %v4260_v61, %v4261_v0 }
 0x41e   : > { %v7241_v38 = vadd.f32 %v7240_v22, %v7239_v13  ;;  %v7242_v50 = vpop.f32.mrb[202].mxu0  ;;  %v7134_v44 = vpop.f32.mrb[173].mxu1 }
 0x41f   : > { %v7243_v31 = vpop.f32.mrb[203].mxu0  ;;  %v7135_v47 = vadd.f32 %v7134_v44, %v7133_v42  ;;  %v7136_v3 = vpop.f32.mrb[174].mxu1 }
 0x420   : > { %v10253_v28 = vadd.f32 %v7241_v38, %v7129_v18  ;;  %v7244_v25 = vadd.f32 %v7243_v31, %v7242_v50  ;;  %v7137_v36 = vpop.f32.mrb[175].mxu1 }
 0x421   : > { %v7138_v55 = vadd.f32 %v7137_v36, %v7136_v3 }
 0x422   : > { %v10255_v62 = vadd.f32 %v7244_v25, %v7132_v1  ;;  %7612 = vmatmul.mubr.bf16.gmra.mrb[24].mxu1 %v10120_v60 }
 0x423   : > { %7615 = vmatprep.mubr.bf16.mxu1 %v10206_v56 }
 0x424   : > { %v7245_v19 = vpop.f32.mrb[204].mxu0 }
 0x425   : > { %v7246_v41 = vpop.f32.mrb[205].mxu0  ;;  %v7139_v32 = vpop.f32.mrb[176].mxu1 }
 0x426   : > { %v7247_v23 = vadd.f32 %v7246_v41, %v7245_v19  ;;  %v7248_v4 = vpop.f32.mrb[206].mxu0  ;;  %v7140_v51 = vpop.f32.mrb[177].mxu1 }
 0x427   : > { %v7249_v29 = vpop.f32.mrb[207].mxu0  ;;  %v7141_v12 = vadd.f32 %v7140_v51, %v7139_v32  ;;  %v7142_v9 = vpop.f32.mrb[178].mxu1 }
 0x428   : > { %v10262_v48 = vadd.f32 %v7247_v23, %v7135_v47  ;;  %v7250_v60 = vadd.f32 %v7249_v29, %v7248_v4  ;;  %v7143_v8 = vpop.f32.mrb[179].mxu1 }
 0x429   : > { %v7144_v20 = vadd.f32 %v7143_v8, %v7142_v9 }
 0x42a   : > { %v10264_v7 = vadd.f32 %v7250_v60, %v7138_v55  ;;  %7616 = vmatmul.mubr.bf16.gmra.mrb[28].mxu1 %v4262_v39 }
 0x42c   : > { %v7251_v52 = vpop.f32.mrb[208].mxu0 }
 0x42d   : > { %v7252_v56 = vpop.f32.mrb[209].mxu0  ;;  %v7145_v34 = vpop.f32.mrb[180].mxu1 }
 0x42e   : > { %v7253_v54 = vadd.f32 %v7252_v56, %v7251_v52  ;;  %v7254_v10 = vpop.f32.mrb[210].mxu0  ;;  %v7146_v26 = vpop.f32.mrb[181].mxu1 }
 0x42f   : > { %v7255_v45 = vpop.f32.mrb[211].mxu0  ;;  %v7147_v59 = vadd.f32 %v7146_v26, %v7145_v34  ;;  %v7148_v18 = vpop.f32.mrb[182].mxu1 }
 0x430   : > { %v10266_v57 = vadd.f32 %v7253_v54, %v7141_v12  ;;  %v7256_v30 = vadd.f32 %v7255_v45, %v7254_v10  ;;  %v7149_v53 = vpop.f32.mrb[183].mxu1 }
 0x431   : > { %v7150_v1 = vadd.f32 %v7149_v53, %v7148_v18 }
 0x432   : > { %v10268_v13 = vadd.f32 %v7256_v30, %v7144_v20 }
 0x434   : > { %v7257_v22 = vpop.f32.mrb[212].mxu0 }
 0x435   : > { %v7258_v42 = vpop.f32.mrb[213].mxu0  ;;  %v7151_v38 = vpop.f32.mrb[184].mxu1 }
 0x436   : > { %v7259_v50 = vadd.f32 %v7258_v42, %v7257_v22  ;;  %v7260_v44 = vpop.f32.mrb[214].mxu0  ;;  %v7152_v31 = vpop.f32.mrb[185].mxu1 }
 0x437   : > { %v7261_v47 = vpop.f32.mrb[215].mxu0  ;;  %v7153_v3 = vadd.f32 %v7152_v31, %v7151_v38  ;;  %v7154_v25 = vpop.f32.mrb[186].mxu1 }
 0x438   : > { %v10270_v36 = vadd.f32 %v7259_v50, %v7147_v59  ;;  %v7262_v55 = vadd.f32 %v7261_v47, %v7260_v44  ;;  %v7155_v0 = vpop.f32.mrb[187].mxu1 }
 0x439   : > { %v7156_v61 = vadd.f32 %v7155_v0, %v7154_v25 }
 0x43a   : > { %v10272_v19 = vadd.f32 %v7262_v55, %v7150_v1 }
 0x43c   : > { %v7263_v41 = vpop.f32.mrb[216].mxu0 }
 0x43d   : > { %v7264_v32 = vpop.f32.mrb[217].mxu0  ;;  %v7157_v23 = vpop.f32.mrb[188].mxu1 }
 0x43e   : > { %v7265_v4 = vadd.f32 %v7264_v32, %v7263_v41  ;;  %v7266_v51 = vpop.f32.mrb[218].mxu0  ;;  %v7158_v29 = vpop.f32.mrb[189].mxu1 }
 0x43f   : > { %v7267_v12 = vpop.f32.mrb[219].mxu0  ;;  %v7159_v9 = vadd.f32 %v7158_v29, %v7157_v23  ;;  %v7160_v39 = vpop.f32.mrb[190].mxu1 }
 0x440   : > { %v10274_v60 = vadd.f32 %v7265_v4, %v7153_v3  ;;  %v7268_v8 = vadd.f32 %v7267_v12, %v7266_v51  ;;  %v7161_v20 = vpop.f32.mrb[191].mxu1 }
 0x441   : > { %v7162_v52 = vadd.f32 %v7161_v20, %v7160_v39 }
 0x442   : > { %v10276_v56 = vadd.f32 %v7268_v8, %v7156_v61 }
 0x444   : > { %v7269_v34 = vpop.f32.mrb[220].mxu0 }
 0x445   : > { %v7270_v54 = vpop.f32.mrb[221].mxu0  ;;  %v7291_v10 = vpop.f32.mrb[192].mxu1 }
 0x446   : > { %v7271_v26 = vadd.f32 %v7270_v54, %v7269_v34  ;;  %v7272_v45 = vpop.f32.mrb[222].mxu0  ;;  %v7292_v59 = vpop.f32.mrb[193].mxu1 }
 0x447   : > { %v7273_v18 = vpop.f32.mrb[223].mxu0  ;;  %v7293_v30 = vadd.f32 %v7292_v59, %v7291_v10  ;;  %v7294_v53 = vpop.f32.mrb[194].mxu1 }
 0x448   : > { %v10278_v1 = vadd.f32 %v7271_v26, %v7159_v9  ;;  %v7274_v22 = vadd.f32 %v7273_v18, %v7272_v45  ;;  %v7295_v42 = vpop.f32.mrb[195].mxu1 }
 0x449   : > { %v5197_v38 = vadd.f32 %v7293_v30, %v10142_v40  ;;  %v7296_v50 = vadd.f32 %v7295_v42, %v7294_v53 }
 0x44a   : > { %v10281_v44 = vadd.f32 %v7274_v22, %v7162_v52 }
 0x44b   : > { %v5200_v31 = vadd.f32 %v7296_v50, %v10146_v49 }
 0x44c   : > { %v7403_v47 = vpop.f32.mrb[224].mxu0 }
 0x44d   : > { %v7404_v3 = vpop.f32.mrb[225].mxu0  ;;  %v7297_v25 = vpop.f32.mrb[196].mxu1 }
 0x44e   : > { %v7405_v55 = vadd.f32 %v7404_v3, %v7403_v47  ;;  %v7406_v0 = vpop.f32.mrb[226].mxu0  ;;  %v7298_v61 = vpop.f32.mrb[197].mxu1 }
 0x44f   : > { %v7407_v41 = vpop.f32.mrb[227].mxu0  ;;  %v7299_v32 = vadd.f32 %v7298_v61, %v7297_v25  ;;  %v7300_v23 = vpop.f32.mrb[198].mxu1 }
 0x450   : > { %v7408_v4 = vadd.f32 %v7407_v41, %v7406_v0  ;;  %v7301_v51 = vpop.f32.mrb[199].mxu1  ;;  %v10284_v29 = vadd.f32 %v7405_v55, %v5197_v38 }
 0x451   : > { %v5205_v40 = vadd.f32 %v7299_v32, %v10183_v35  ;;  %v7302_v12 = vadd.f32 %v7301_v51, %v7300_v23 }
 0x452   : > { %v10287_v9 = vadd.f32 %v7408_v4, %v5200_v31 }
 0x453   : > { %v5208_v49 = vadd.f32 %v7302_v12, %v10186_v15 }
 0x454   : > { %v7409_v39 = vpop.f32.mrb[228].mxu0 }
 0x455   : > { %v7410_v8 = vpop.f32.mrb[229].mxu0  ;;  %v7303_v20 = vpop.f32.mrb[200].mxu1 }
 0x456   : > { %v7411_v52 = vadd.f32 %v7410_v8, %v7409_v39  ;;  %v7412_v34 = vpop.f32.mrb[230].mxu0  ;;  %v7304_v54 = vpop.f32.mrb[201].mxu1 }
 0x457   : > { %v7413_v10 = vpop.f32.mrb[231].mxu0  ;;  %v7305_v26 = vadd.f32 %v7304_v54, %v7303_v20  ;;  %v7306_v45 = vpop.f32.mrb[202].mxu1 }
 0x458   : > { %v7414_v59 = vadd.f32 %v7413_v10, %v7412_v34  ;;  %v7307_v18 = vpop.f32.mrb[203].mxu1  ;;  %v10290_v30 = vadd.f32 %v7411_v52, %v5205_v40 }
 0x459   : > { %v5213_v35 = vadd.f32 %v7305_v26, %v10198_v27  ;;  %v7308_v53 = vadd.f32 %v7307_v18, %v7306_v45 }
 0x45a   : > { %v10293_v22 = vadd.f32 %v7414_v59, %v5208_v49 }
 0x45b   : > { %v5216_v15 = vadd.f32 %v7308_v53, %v10202_v43 }
 0x45c   : > { %v7415_v42 = vpop.f32.mrb[232].mxu0 }
 0x45d   : > { %v7416_v38 = vpop.f32.mrb[233].mxu0  ;;  %v7309_v50 = vpop.f32.mrb[204].mxu1 }
 0x45e   : > { %v7417_v31 = vadd.f32 %v7416_v38, %v7415_v42  ;;  %v7418_v47 = vpop.f32.mrb[234].mxu0  ;;  %v7310_v3 = vpop.f32.mrb[205].mxu1 }
 0x45f   : > { %v7419_v25 = vpop.f32.mrb[235].mxu0  ;;  %v7311_v55 = vadd.f32 %v7310_v3, %v7309_v50  ;;  %v7312_v0 = vpop.f32.mrb[206].mxu1 }
 0x460   : > { %v7420_v61 = vadd.f32 %v7419_v25, %v7418_v47  ;;  %v7313_v41 = vpop.f32.mrb[207].mxu1  ;;  %v10296_v32 = vadd.f32 %v7417_v31, %v5213_v35 }
 0x461   : > { %v5221_v27 = vadd.f32 %v7311_v55, %v10210_v14  ;;  %v7314_v23 = vadd.f32 %v7313_v41, %v7312_v0 }
 0x462   : > { %v10299_v4 = vadd.f32 %v7420_v61, %v5216_v15 }
 0x463   : > { %v5224_v43 = vadd.f32 %v7314_v23, %v10213_v37 }
 0x464   : > { %v7421_v51 = vpop.f32.mrb[236].mxu0 }
 0x465   : > { %v7422_v40 = vpop.f32.mrb[237].mxu0  ;;  %v7315_v12 = vpop.f32.mrb[208].mxu1 }
 0x466   : > { %v7423_v49 = vadd.f32 %v7422_v40, %v7421_v51  ;;  %v7424_v39 = vpop.f32.mrb[238].mxu0  ;;  %v7316_v8 = vpop.f32.mrb[209].mxu1 }
 0x467   : > { %v7425_v20 = vpop.f32.mrb[239].mxu0  ;;  %v7317_v52 = vadd.f32 %v7316_v8, %v7315_v12  ;;  %v7318_v34 = vpop.f32.mrb[210].mxu1 }
 0x468   : > { %v7426_v54 = vadd.f32 %v7425_v20, %v7424_v39  ;;  %v7319_v10 = vpop.f32.mrb[211].mxu1  ;;  %v10302_v26 = vadd.f32 %v7423_v49, %v5221_v27 }
 0x469   : > { %v5229_v14 = vadd.f32 %v7317_v52, %v10216_v58  ;;  %v7320_v45 = vadd.f32 %v7319_v10, %v7318_v34 }
 0x46a   : > { %v10305_v59 = vadd.f32 %v7426_v54, %v5224_v43 }
 0x46b   : > { %v5232_v37 = vadd.f32 %v7320_v45, %v10219_v11 }
 0x46c   : > { %v7427_v18 = vpop.f32.mrb[240].mxu0 }
 0x46d   : > { %v7428_v35 = vpop.f32.mrb[241].mxu0  ;;  %v7321_v53 = vpop.f32.mrb[212].mxu1 }
 0x46e   : > { %v7429_v15 = vadd.f32 %v7428_v35, %v7427_v18  ;;  %v7430_v42 = vpop.f32.mrb[242].mxu0  ;;  %v7322_v38 = vpop.f32.mrb[213].mxu1 }
 0x46f   : > { %v7431_v50 = vpop.f32.mrb[243].mxu0  ;;  %v7323_v31 = vadd.f32 %v7322_v38, %v7321_v53  ;;  %v7324_v47 = vpop.f32.mrb[214].mxu1 }
 0x470   : > { %v7432_v3 = vadd.f32 %v7431_v50, %v7430_v42  ;;  %v7325_v25 = vpop.f32.mrb[215].mxu1  ;;  %v10308_v55 = vadd.f32 %v7429_v15, %v5229_v14 }
 0x471   : > { %v5237_v58 = vadd.f32 %v7323_v31, %v10223_v33  ;;  %v7326_v0 = vadd.f32 %v7325_v25, %v7324_v47 }
 0x472   : > { %v10311_v61 = vadd.f32 %v7432_v3, %v5232_v37 }
 0x473   : > { %v5240_v11 = vadd.f32 %v7326_v0, %v10225_v2 }
 0x474   : > { %v7433_v41 = vpop.f32.mrb[244].mxu0 }
 0x475   : > { %v7434_v27 = vpop.f32.mrb[245].mxu0  ;;  %v7327_v23 = vpop.f32.mrb[216].mxu1 }
 0x476   : > { %v7435_v43 = vadd.f32 %v7434_v27, %v7433_v41  ;;  %v7436_v51 = vpop.f32.mrb[246].mxu0  ;;  %v7328_v40 = vpop.f32.mrb[217].mxu1 }
 0x477   : > { %v7437_v12 = vpop.f32.mrb[247].mxu0  ;;  %v7329_v49 = vadd.f32 %v7328_v40, %v7327_v23  ;;  %v7330_v39 = vpop.f32.mrb[218].mxu1 }
 0x478   : > { %v7438_v8 = vadd.f32 %v7437_v12, %v7436_v51  ;;  %v7331_v20 = vpop.f32.mrb[219].mxu1  ;;  %v10314_v52 = vadd.f32 %v7435_v43, %v5237_v58 }
 0x479   : > { %v5245_v33 = vadd.f32 %v7329_v49, %v10229_v5  ;;  %v7332_v34 = vadd.f32 %v7331_v20, %v7330_v39 }
 0x47a   : > { %v10317_v54 = vadd.f32 %v7438_v8, %v5240_v11 }
 0x47b   : > { %v5248_v2 = vadd.f32 %v7332_v34, %v10231_v6 }
 0x47c   : > { %v7439_v10 = vpop.f32.mrb[248].mxu0 }
 0x47d   : > { %v7440_v14 = vpop.f32.mrb[249].mxu0  ;;  %v7333_v45 = vpop.f32.mrb[220].mxu1 }
 0x47e   : > { %v7441_v37 = vadd.f32 %v7440_v14, %v7439_v10  ;;  %v7442_v18 = vpop.f32.mrb[250].mxu0  ;;  %v7334_v35 = vpop.f32.mrb[221].mxu1 }
 0x47f   : > { %v7443_v53 = vpop.f32.mrb[251].mxu0  ;;  %v7335_v15 = vadd.f32 %v7334_v35, %v7333_v45  ;;  %v7336_v42 = vpop.f32.mrb[222].mxu1 }
 0x480   : > { %v7444_v38 = vadd.f32 %v7443_v53, %v7442_v18  ;;  %v7337_v50 = vpop.f32.mrb[223].mxu1  ;;  %v10320_v31 = vadd.f32 %v7441_v37, %v5245_v33 }
 0x481   : > { %v5253_v5 = vadd.f32 %v7335_v15, %v10235_v63  ;;  %v7338_v47 = vadd.f32 %v7337_v50, %v7336_v42 }
 0x482   : > { %v10323_v3 = vadd.f32 %v7444_v38, %v5248_v2 }
 0x483   : > { %v5256_v6 = vadd.f32 %v7338_v47, %v10237_v16 }
 0x484   : > { %v7445_v25 = vpop.f32.mrb[252].mxu0 }
 0x485   : > { %v7446_v58 = vpop.f32.mrb[253].mxu0  ;;  %v7339_v0 = vpop.f32.mrb[224].mxu1 }
 0x486   : > { %v7447_v11 = vadd.f32 %v7446_v58, %v7445_v25  ;;  %v7448_v41 = vpop.f32.mrb[254].mxu0  ;;  %v7340_v27 = vpop.f32.mrb[225].mxu1 }
 0x487   : > { %v7449_v23 = vpop.f32.mrb[255].mxu0  ;;  %v7341_v43 = vadd.f32 %v7340_v27, %v7339_v0  ;;  %v7342_v51 = vpop.f32.mrb[226].mxu1 }
 0x488   : > { %v7450_v40 = vadd.f32 %v7449_v23, %v7448_v41  ;;  %v7343_v12 = vpop.f32.mrb[227].mxu1  ;;  %v10326_v49 = vadd.f32 %v7447_v11, %v5253_v5 }
 0x489   : > { %v5261_v63 = vadd.f32 %v7341_v43, %v10241_v21  ;;  %v7344_v39 = vadd.f32 %v7343_v12, %v7342_v51 }
 0x48a   : > { %v10329_v8 = vadd.f32 %v7450_v40, %v5256_v6 }
 0x48b   : > { %v5264_v16 = vadd.f32 %v7344_v39, %v10243_v17 }
 0x48c   : > { %v7451_v20 = vpop.f32.mrb[0].mxu0 }
 0x48d   : > { %v7452_v33 = vpop.f32.mrb[1].mxu0  ;;  %v7345_v34 = vpop.f32.mrb[228].mxu1 }
 0x48e   : > { %v7453_v2 = vadd.f32 %v7452_v33, %v7451_v20  ;;  %v7454_v10 = vpop.f32.mrb[2].mxu0  ;;  %v7346_v14 = vpop.f32.mrb[229].mxu1 }
 0x48f   : > { %v7455_v45 = vpop.f32.mrb[3].mxu0  ;;  %v7347_v37 = vadd.f32 %v7346_v14, %v7345_v34  ;;  %v7348_v18 = vpop.f32.mrb[230].mxu1 }
 0x490   : > { %v7456_v35 = vadd.f32 %v7455_v45, %v7454_v10  ;;  %v7349_v53 = vpop.f32.mrb[231].mxu1  ;;  %v10332_v15 = vadd.f32 %v7453_v2, %v5261_v63 }
 0x491   : > { %v5269_v21 = vadd.f32 %v7347_v37, %v10247_v24  ;;  %v7350_v42 = vadd.f32 %v7349_v53, %v7348_v18 }
 0x492   : > { %v10335_v38 = vadd.f32 %v7456_v35, %v5264_v16 }
 0x493   : > { %v5272_v17 = vadd.f32 %v7350_v42, %v10249_v46 }
 0x494   : > { %v7457_v50 = vpop.f32.mrb[4].mxu0 }
 0x495   : > { %v7458_v5 = vpop.f32.mrb[5].mxu0  ;;  %v7351_v47 = vpop.f32.mrb[232].mxu1 }
 0x496   : > { %v7459_v6 = vadd.f32 %v7458_v5, %v7457_v50  ;;  %v7460_v25 = vpop.f32.mrb[6].mxu0  ;;  %v7352_v58 = vpop.f32.mrb[233].mxu1 }
 0x497   : > { %v7461_v0 = vpop.f32.mrb[7].mxu0  ;;  %v7353_v11 = vadd.f32 %v7352_v58, %v7351_v47  ;;  %v7354_v41 = vpop.f32.mrb[234].mxu1 }
 0x498   : > { %v7462_v27 = vadd.f32 %v7461_v0, %v7460_v25  ;;  %v7355_v23 = vpop.f32.mrb[235].mxu1  ;;  %v10338_v43 = vadd.f32 %v7459_v6, %v5269_v21 }
 0x499   : > { %v5277_v24 = vadd.f32 %v7353_v11, %v10253_v28  ;;  %v7356_v51 = vadd.f32 %v7355_v23, %v7354_v41 }
 0x49a   : > { %v10341_v40 = vadd.f32 %v7462_v27, %v5272_v17 }
 0x49b   : > { %v5280_v46 = vadd.f32 %v7356_v51, %v10255_v62 }
 0x49c   : > { %v7463_v12 = vpop.f32.mrb[8].mxu0 }
 0x49d   : > { %v7464_v63 = vpop.f32.mrb[9].mxu0  ;;  %v7357_v39 = vpop.f32.mrb[236].mxu1 }
 0x49e   : > { %v7465_v16 = vadd.f32 %v7464_v63, %v7463_v12  ;;  %v7466_v20 = vpop.f32.mrb[10].mxu0  ;;  %v7358_v33 = vpop.f32.mrb[237].mxu1 }
 0x49f   : > { %v7467_v34 = vpop.f32.mrb[11].mxu0  ;;  %v7359_v2 = vadd.f32 %v7358_v33, %v7357_v39  ;;  %v7360_v10 = vpop.f32.mrb[238].mxu1 }
 0x4a0   : > { %v7468_v14 = vadd.f32 %v7467_v34, %v7466_v20  ;;  %v7361_v45 = vpop.f32.mrb[239].mxu1  ;;  %v10344_v37 = vadd.f32 %v7465_v16, %v5277_v24 }
 0x4a1   : > { %v5285_v28 = vadd.f32 %v7359_v2, %v10262_v48  ;;  %v7362_v18 = vadd.f32 %v7361_v45, %v7360_v10 }
 0x4a2   : > { %v10347_v35 = vadd.f32 %v7468_v14, %v5280_v46 }
 0x4a3   : > { %v5288_v62 = vadd.f32 %v7362_v18, %v10264_v7 }
 0x4a4   : > { %v7469_v53 = vpop.f32.mrb[12].mxu0 }
 0x4a5   : > { %v7470_v21 = vpop.f32.mrb[13].mxu0  ;;  %v7363_v42 = vpop.f32.mrb[240].mxu1 }
 0x4a6   : > { %v7471_v17 = vadd.f32 %v7470_v21, %v7469_v53  ;;  %v7472_v50 = vpop.f32.mrb[14].mxu0  ;;  %v7364_v5 = vpop.f32.mrb[241].mxu1 }
 0x4a7   : > { %v7473_v47 = vpop.f32.mrb[15].mxu0  ;;  %v7365_v6 = vadd.f32 %v7364_v5, %v7363_v42  ;;  %v7366_v25 = vpop.f32.mrb[242].mxu1 }
 0x4a8   : > { %v7474_v58 = vadd.f32 %v7473_v47, %v7472_v50  ;;  %v7367_v0 = vpop.f32.mrb[243].mxu1  ;;  %v10350_v11 = vadd.f32 %v7471_v17, %v5285_v28 }
 0x4a9   : > { %v5293_v48 = vadd.f32 %v7365_v6, %v10266_v57  ;;  %v7368_v41 = vadd.f32 %v7367_v0, %v7366_v25 }
 0x4aa   : > { %v10353_v27 = vadd.f32 %v7474_v58, %v5288_v62 }
 0x4ab   : > { %v5296_v7 = vadd.f32 %v7368_v41, %v10268_v13 }
 0x4ac   : > { %v7475_v23 = vpop.f32.mrb[16].mxu0 }
 0x4ad   : > { %v7476_v24 = vpop.f32.mrb[17].mxu0  ;;  %v7369_v51 = vpop.f32.mrb[244].mxu1 }
 0x4ae   : > { %v7477_v46 = vadd.f32 %v7476_v24, %v7475_v23  ;;  %v7478_v12 = vpop.f32.mrb[18].mxu0  ;;  %v7370_v63 = vpop.f32.mrb[245].mxu1 }
 0x4af   : > { %v7479_v39 = vpop.f32.mrb[19].mxu0  ;;  %v7371_v16 = vadd.f32 %v7370_v63, %v7369_v51  ;;  %v7372_v20 = vpop.f32.mrb[246].mxu1 }
 0x4b0   : > { %v7480_v33 = vadd.f32 %v7479_v39, %v7478_v12  ;;  %v7373_v34 = vpop.f32.mrb[247].mxu1  ;;  %v10356_v2 = vadd.f32 %v7477_v46, %v5293_v48 }
 0x4b1   : > { %v5301_v57 = vadd.f32 %v7371_v16, %v10270_v36  ;;  %v7374_v10 = vadd.f32 %v7373_v34, %v7372_v20 }
 0x4b2   : > { %v10359_v14 = vadd.f32 %v7480_v33, %v5296_v7 }
 0x4b3   : > { %v5304_v13 = vadd.f32 %v7374_v10, %v10272_v19  ;;  %v10377_v10 = vld [vmem:[%s10736_s5] ss:$0 sm:$0xff] }
 0x4b4   : > { %v7481_v45 = vpop.f32.mrb[20].mxu0 }
 0x4b5   : > { %v7482_v28 = vpop.f32.mrb[21].mxu0  ;;  %v7375_v18 = vpop.f32.mrb[248].mxu1 }
 0x4b6   : > { %v7483_v62 = vadd.f32 %v7482_v28, %v7481_v45  ;;  %v7484_v53 = vpop.f32.mrb[22].mxu0  ;;  %v7376_v21 = vpop.f32.mrb[249].mxu1 }
 0x4b7   : > { %v7485_v42 = vpop.f32.mrb[23].mxu0  ;;  %v7377_v17 = vadd.f32 %v7376_v21, %v7375_v18  ;;  %v7378_v50 = vpop.f32.mrb[250].mxu1 }
 0x4b8   : > { %v7486_v5 = vadd.f32 %v7485_v42, %v7484_v53  ;;  %v7379_v47 = vpop.f32.mrb[251].mxu1  ;;  %v10362_v6 = vadd.f32 %v7483_v62, %v5301_v57 }
 0x4b9   : > { %v5309_v36 = vadd.f32 %v7377_v17, %v10274_v60  ;;  %v7380_v25 = vadd.f32 %v7379_v47, %v7378_v50 }
 0x4ba   : > { %v10365_v58 = vadd.f32 %v7486_v5, %v5304_v13 }
 0x4bb   : > { %v5312_v19 = vadd.f32 %v7380_v25, %v10276_v56 }
 0x4bc   : > { %v7487_v0 = vpop.f32.mrb[24].mxu0 }
 0x4bd   : > { %v7488_v48 = vpop.f32.mrb[25].mxu0  ;;  %v7381_v41 = vpop.f32.mrb[252].mxu1 }
 0x4be   : > { %v7489_v7 = vadd.f32 %v7488_v48, %v7487_v0  ;;  %v7490_v23 = vpop.f32.mrb[26].mxu0  ;;  %v7382_v24 = vpop.f32.mrb[253].mxu1 }
 0x4bf   : > { %v7491_v51 = vpop.f32.mrb[27].mxu0  ;;  %v7383_v46 = vadd.f32 %v7382_v24, %v7381_v41  ;;  %v7384_v12 = vpop.f32.mrb[254].mxu1 }
 0x4c0   : > { %v7492_v63 = vadd.f32 %v7491_v51, %v7490_v23  ;;  %v7385_v39 = vpop.f32.mrb[255].mxu1  ;;  %v10368_v16 = vadd.f32 %v7489_v7, %v5309_v36 }
 0x4c1   : > { %v5317_v60 = vadd.f32 %v7383_v46, %v10278_v1  ;;  %v7386_v20 = vadd.f32 %v7385_v39, %v7384_v12  ;;  %v10383_v1 = vld [vmem:[%s10737_s6] ss:$0 sm:$0xff] }
 0x4c2   : > { %v10371_v33 = vadd.f32 %v7492_v63, %v5312_v19 }
 0x4c3   : > { %v5320_v56 = vadd.f32 %v7386_v20, %v10281_v44 }
 0x4c4   : > { %v7493_v34 = vpop.f32.mrb[28].mxu0 }
 0x4c5   : > { %v7494_v57 = vpop.f32.mrb[29].mxu0  ;;  %v7589_v13 = vpop.f32.mrb[0].mxu1 }
 0x4c6   : > { %v7495_v45 = vadd.f32 %v7494_v57, %v7493_v34  ;;  %v7496_v28 = vpop.f32.mrb[30].mxu0  ;;  %v5527_v18 = vadd.f32 %v7589_v13, %v10290_v30  ;;  %v5518_v62 = vpop.f32.mrb[1].mxu1 }
 0x4c7   : > { %v7497_v53 = vpop.f32.mrb[31].mxu0  ;;  %v5519_v44 = vadd.f32 %v5518_v62, %v10284_v29  ;;  %v7590_v21 = vpop.f32.mrb[2].mxu1 }
 0x4c8   : > { %v7498_v42 = vadd.f32 %v7497_v53, %v7496_v28  ;;  %v5653_v17 = vmul.f32 %v10377_v10, %v5527_v18  ;;  %v5530_v50 = vadd.f32 %v7590_v21, %v10293_v22  ;;  %v5521_v5 = vpop.f32.mrb[3].mxu1  ;;  %v10388_v47 = vadd.f32 %v7495_v45, %v5317_v60 }
 0x4c9   : > { %v5651_v30 = vmul.f32 %v10377_v10, %v5519_v44  ;;  %v5522_v36 = vadd.f32 %v5521_v5, %v10287_v9 }
 0x4ca   : > { %v10393_v25 = vadd.f32 %v10383_v1, %v5653_v17  ;;  %v5654_v19 = vmul.f32 %v10377_v10, %v5530_v50  ;;  %v10396_v0 = vadd.f32 %v7498_v42, %v5320_v56 }
 0x4cb   : > { %v10399_v29 = vadd.f32 %v10383_v1, %v5651_v30  ;;  %v5652_v48 = vmul.f32 %v10377_v10, %v5522_v36 }
 0x4cc   : > { %v6478_v22 = vmul.f32 -1.442695, %v10393_v25  ;;  %v10404_v41 = vadd.f32 %v10383_v1, %v5654_v19 }
 0x4cd   : > { %v6476_v7 = vmul.f32 -1.442695, %v10399_v29  ;;  %v10408_v9 = vadd.f32 %v10383_v1, %v5652_v48  ;;  %v7593_v23 = vpop.f32.mrb[4].mxu1 }
 0x4ce   : > { %8037 = vpow2.f32 %v6478_v22  ;;  %v6479_v24 = vmul.f32 -1.442695, %v10404_v41  ;;  %v5543_v51 = vadd.f32 %v7593_v23, %v10302_v26  ;;  %v5534_v46 = vpop.f32.mrb[5].mxu1 }
 0x4cf   : > { %8039 = vpow2.f32 %v6476_v7  ;;  %v6477_v12 = vmul.f32 -1.442695, %v10408_v9  ;;  %v5535_v63 = vadd.f32 %v5534_v46, %v10296_v32  ;;  %v7594_v39 = vpop.f32.mrb[6].mxu1 }
 0x4d0   : > { %8041 = vpow2.f32 %v6479_v24  ;;  %v5657_v60 = vmul.f32 %v10377_v10, %v5543_v51  ;;  %v5546_v20 = vadd.f32 %v7594_v39, %v10305_v59  ;;  %v5537_v56 = vpop.f32.mrb[7].mxu1 }
 0x4d1   : > { %8043 = vpow2.f32 %v6477_v12  ;;  %v5655_v34 = vmul.f32 %v10377_v10, %v5535_v63  ;;  %v5538_v57 = vadd.f32 %v5537_v56, %v10299_v4 }
 0x4d2   : > { %v10419_v26 = vadd.f32 %v10383_v1, %v5657_v60  ;;  %v5658_v13 = vmul.f32 %v10377_v10, %v5546_v20 }
 0x4d3   : > { %v10423_v45 = vadd.f32 %v10383_v1, %v5655_v34  ;;  %v5656_v32 = vmul.f32 %v10377_v10, %v5538_v57 }
 0x4d4   : > { %v6482_v28 = vmul.f32 -1.442695, %v10419_v26  ;;  %v10428_v59 = vadd.f32 %v10383_v1, %v5658_v13 }
 0x4d5   : > { %v6480_v18 = vmul.f32 -1.442695, %v10423_v45  ;;  %v10432_v62 = vadd.f32 %v10383_v1, %v5656_v32  ;;  %v7597_v4 = vpop.f32.mrb[8].mxu1 }
 0x4d6   : > { %8045 = vpow2.f32 %v6482_v28  ;;  %v6483_v53 = vmul.f32 -1.442695, %v10428_v59  ;;  %v5559_v44 = vadd.f32 %v7597_v4, %v10314_v52  ;;  %v5550_v21 = vpop.f32.mrb[9].mxu1 }
 0x4d7   : > { %8047 = vpow2.f32 %v6480_v18  ;;  %v6481_v42 = vmul.f32 -1.442695, %v10432_v62  ;;  %v5551_v17 = vadd.f32 %v5550_v21, %v10308_v55  ;;  %v7598_v50 = vpop.f32.mrb[10].mxu1 }
 0x4d8   : > { %v8038_v5 = vpop.eup %8037  ;;  %8049 = vpow2.f32 %v6483_v53  ;;  %v5661_v30 = vmul.f32 %v10377_v10, %v5559_v44  ;;  %v5562_v36 = vadd.f32 %v7598_v50, %v10317_v54  ;;  %v5553_v19 = vpop.f32.mrb[11].mxu1 }
 0x4d9   : > { %v8040_v48 = vpop.eup %8039  ;;  %v5819_v22 = vadd.f32 1.0, %v8038_v5  ;;  %8051 = vpow2.f32 %v6481_v42  ;;  %v5659_v7 = vmul.f32 %v10377_v10, %v5551_v17  ;;  %v5554_v52 = vadd.f32 %v5553_v19, %v10311_v61 }
 0x4da   : > { %v8042_v23 = vpop.eup %8041  ;;  %v5817_v24 = vadd.f32 1.0, %v8040_v48  ;;  %v10443_v51 = vadd.f32 %v10383_v1, %v5661_v30  ;;  %v5662_v55 = vmul.f32 %v10377_v10, %v5562_v36 }
 0x4db   : > { %v8044_v46 = vpop.eup %8043  ;;  %8053 = vrcp.f32 %v5819_v22  ;;  %v5820_v12 = vadd.f32 1.0, %v8042_v23  ;;  %v10447_v54 = vadd.f32 %v10383_v1, %v5659_v7  ;;  %v5660_v63 = vmul.f32 %v10377_v10, %v5554_v52 }
 0x4dc   : > { %8055 = vrcp.f32 %v5817_v24  ;;  %v5818_v39 = vadd.f32 1.0, %v8044_v46  ;;  %v6486_v60 = vmul.f32 -1.442695, %v10443_v51  ;;  %v10452_v61 = vadd.f32 %v10383_v1, %v5662_v55  ;;  %v5947_v55 = vld [vmem:[%s8564_s21 + $0x10] sm:$0xff] }
 0x4dd   : > { %8057 = vrcp.f32 %v5820_v12  ;;  %v6484_v20 = vmul.f32 -1.442695, %v10447_v54  ;;  %v10456_v56 = vadd.f32 %v10383_v1, %v5660_v63  ;;  %v7601_v34 = vpop.f32.mrb[12].mxu1 }
 0x4de   : > { %8059 = vrcp.f32 %v5818_v39  ;;  %v6487_v57 = vmul.f32 -1.442695, %v10452_v61  ;;  %v5575_v13 = vadd.f32 %v7601_v34, %v10326_v49  ;;  %v5566_v32 = vpop.f32.mrb[13].mxu1 }
 0x4df   : > { %8061 = vpow2.f32 %v6486_v60  ;;  %v6485_v28 = vmul.f32 -1.442695, %v10456_v56  ;;  %v5567_v18 = vadd.f32 %v5566_v32, %v10320_v31  ;;  %v7602_v4 = vpop.f32.mrb[14].mxu1 }
 0x4e0   : > { %v8046_v53 = vpop.eup %8045  ;;  %8063 = vpow2.f32 %v6484_v20  ;;  %v5665_v44 = vmul.f32 %v10377_v10, %v5575_v13  ;;  %v5578_v21 = vadd.f32 %v7602_v4, %v10329_v8  ;;  %v5569_v42 = vpop.f32.mrb[15].mxu1  ;;  %v5945_v20 = vld [vmem:[%s8564_s21] sm:$0xff] }
 0x4e1   : > { %v8048_v17 = vpop.eup %8047  ;;  %v5823_v50 = vadd.f32 1.0, %v8046_v53  ;;  %8065 = vpow2.f32 %v6487_v57  ;;  %v5663_v5 = vmul.f32 %v10377_v10, %v5567_v18  ;;  %v5570_v49 = vadd.f32 %v5569_v42, %v10323_v3  ;;  %v5948_v18 = vld [vmem:[%s8564_s21 + $0x18] sm:$0xff] }
 0x4e2   : > { %v8050_v30 = vpop.eup %8049  ;;  %v5821_v36 = vadd.f32 1.0, %v8048_v17  ;;  %8067 = vpow2.f32 %v6485_v28  ;;  %v10467_v31 = vadd.f32 %v10383_v1, %v5665_v44  ;;  %v5666_v19 = vmul.f32 %v10377_v10, %v5578_v21  ;;  %v5946_v17 = vld [vmem:[%s8564_s21 + $0x8] sm:$0xff] }
 0x4e3   : > { %v8052_v48 = vpop.eup %8051  ;;  %8069 = vrcp.f32 %v5823_v50  ;;  %v5824_v8 = vadd.f32 1.0, %v8050_v30  ;;  %v10471_v22 = vadd.f32 %v10383_v1, %v5663_v5  ;;  %v5664_v7 = vmul.f32 %v10377_v10, %v5570_v49 }
 0x4e4   : > { %8071 = vrcp.f32 %v5821_v36  ;;  %v5822_v3 = vadd.f32 1.0, %v8052_v48  ;;  %v6490_v52 = vmul.f32 -1.442695, %v10467_v31  ;;  %v10476_v23 = vadd.f32 %v10383_v1, %v5666_v19 }
 0x4e5   : > { %v8054_v24 = vpop.eup %8053  ;;  %8073 = vrcp.f32 %v5824_v8  ;;  %v6488_v46 = vmul.f32 -1.442695, %v10471_v22  ;;  %v10481_v12 = vadd.f32 %v10383_v1, %v5664_v7  ;;  %v7605_v63 = vpop.f32.mrb[16].mxu1 }
 0x4e6   : > { %v8056_v39 = vpop.eup %8055  ;;  %v5915_v60 = vmul.f32 %v8054_v24, %v10393_v25  ;;  %8075 = vrcp.f32 %v5822_v3  ;;  %v6491_v34 = vmul.f32 -1.442695, %v10476_v23  ;;  %v5591_v57 = vadd.f32 %v7605_v63, %v10338_v43  ;;  %v5582_v13 = vpop.f32.mrb[17].mxu1 }
 0x4e7   : > { %v8058_v32 = vpop.eup %8057  ;;  %v5913_v28 = vmul.f32 %v8056_v39, %v10399_v29  ;;  %8077 = vpow2.f32 %v6490_v52  ;;  %v6489_v4 = vmul.f32 -1.442695, %v10481_v12  ;;  %v5583_v53 = vadd.f32 %v5582_v13, %v10332_v15  ;;  %v7606_v44 = vpop.f32.mrb[18].mxu1  ;;  %v5951_v39 = vld [vmem:[%s8564_s21 + $0x30] sm:$0xff] }
 0x4e8   : > { %v8060_v25 = vpop.eup %8059  ;;  %v5979_v21 = vadd.f32 %v5947_v55, %v5915_v60  ;;  %v5916_v42 = vmul.f32 %v8058_v32, %v10404_v41  ;;  %8079 = vpow2.f32 %v6488_v46  ;;  %v5669_v43 = vmul.f32 %v10377_v10, %v5591_v57  ;;  %v5585_v50 = vpop.f32.mrb[19].mxu1  ;;  %v5949_v32 = vld [vmem:[%s8564_s21 + $0x20] sm:$0xff] }
 0x4e9   : > { %v8062_v5 = vpop.eup %8061  ;;  %v5977_v49 = vadd.f32 %v5945_v20, %v5913_v28  ;;  %v5914_v29 = vmul.f32 %v8060_v25, %v10408_v9  ;;  %8081 = vpow2.f32 %v6491_v34  ;;  %v5667_v30 = vmul.f32 %v10377_v10, %v5583_v53 }
 0x4ea   : > { %v8064_v36 = vpop.eup %8063  ;;  %6011 = vst [vmem:[%s10498_s9 + $0x10] sm:$0xff] %v5979_v21  ;;  %v5980_v15 = vadd.f32 %v5948_v18, %v5916_v42  ;;  %v5827_v41 = vadd.f32 1.0, %v8062_v5  ;;  %8083 = vpow2.f32 %v6489_v4  ;;  %v10502_v19 = vadd.f32 %v10383_v1, %v5669_v43 }
 0x4eb   : > { %v8066_v9 = vpop.eup %8065  ;;  %6009 = vst [vmem:[%s10498_s9] sm:$0xff] %v5977_v49  ;;  %v5978_v48 = vadd.f32 %v5946_v17, %v5914_v29  ;;  %v5825_v8 = vadd.f32 1.0, %v8064_v36  ;;  %v10506_v7 = vadd.f32 %v10383_v1, %v5667_v30  ;;  %v5594_v3 = vadd.f32 %v7606_v44, %v10341_v40  ;;  %v5952_v44 = vld [vmem:[%s8564_s21 + $0x38] sm:$0xff] }
 0x4ec   : > { %v8068_v52 = vpop.eup %8067  ;;  %6012 = vst [vmem:[%s10498_s9 + $0x18] sm:$0xff] %v5980_v15  ;;  %8085 = vrcp.f32 %v5827_v41  ;;  %v5828_v24 = vadd.f32 1.0, %v8066_v9  ;;  %v6494_v55 = vmul.f32 -1.442695, %v10502_v19  ;;  %v5586_v46 = vadd.f32 %v5585_v50, %v10335_v38  ;;  %v5950_v50 = vld [vmem:[%s8564_s21 + $0x28] sm:$0xff] }
 0x4ed   : > { %v8070_v63 = vpop.eup %8069  ;;  %6010 = vst [vmem:[%s10498_s9 + $0x8] sm:$0xff] %v5978_v48  ;;  %8087 = vrcp.f32 %v5825_v8  ;;  %v5826_v60 = vadd.f32 1.0, %v8068_v52  ;;  %v6492_v20 = vmul.f32 -1.442695, %v10506_v7  ;;  %v5670_v34 = vmul.f32 %v10377_v10, %v5594_v3  ;;  %v7609_v40 = vpop.f32.mrb[20].mxu1 }
 0x4ee   : > { %v8072_v57 = vpop.eup %8071  ;;  %v5919_v13 = vmul.f32 %v8070_v63, %v10419_v26  ;;  %8089 = vrcp.f32 %v5828_v24  ;;  %v5668_v28 = vmul.f32 %v10377_v10, %v5586_v46  ;;  %v5607_v38 = vadd.f32 %v7609_v40, %v10350_v11  ;;  %v5598_v18 = vpop.f32.mrb[21].mxu1 }
 0x4ef   : > { %v8074_v4 = vpop.eup %8073  ;;  %v5917_v53 = vmul.f32 %v8072_v57, %v10423_v45  ;;  %8091 = vrcp.f32 %v5826_v60  ;;  %v10523_v25 = vadd.f32 %v10383_v1, %v5670_v34  ;;  %v5599_v21 = vadd.f32 %v5598_v18, %v10344_v37  ;;  %v7610_v26 = vpop.f32.mrb[22].mxu1  ;;  %v5955_v34 = vld [vmem:[%s8564_s21 + $0x50] sm:$0xff] }
 0x4f0   : > { %v8076_v42 = vpop.eup %8075  ;;  %v5983_v17 = vadd.f32 %v5951_v39, %v5919_v13  ;;  %v5920_v43 = vmul.f32 %v8074_v4, %v10428_v59  ;;  %8093 = vpow2.f32 %v6494_v55  ;;  %v10529_v11 = vadd.f32 %v10383_v1, %v5668_v28  ;;  %v5601_v45 = vpop.f32.mrb[23].mxu1 }
 0x4f1   : > { %v8078_v5 = vpop.eup %8077  ;;  %v5981_v49 = vadd.f32 %v5949_v32, %v5917_v53  ;;  %v5918_v29 = vmul.f32 %v8076_v42, %v10432_v62  ;;  %8095 = vpow2.f32 %v6492_v20  ;;  %v6495_v37 = vmul.f32 -1.442695, %v10523_v25 }
 0x4f2   : > { %v8080_v30 = vpop.eup %8079  ;;  %6015 = vst [vmem:[%s10498_s9 + $0x30] sm:$0xff] %v5983_v17  ;;  %v5984_v36 = vadd.f32 %v5952_v44, %v5920_v43  ;;  %v5831_v59 = vadd.f32 1.0, %v8078_v5  ;;  %v6493_v15 = vmul.f32 -1.442695, %v10529_v11  ;;  %v5673_v41 = vmul.f32 %v10377_v10, %v5607_v38  ;;  %v5953_v38 = vld [vmem:[%s8564_s21 + $0x40] sm:$0xff] }
 0x4f3   : > { %v8082_v9 = vpop.eup %8081  ;;  %6013 = vst [vmem:[%s10498_s9 + $0x20] sm:$0xff] %v5981_v49  ;;  %v5982_v48 = vadd.f32 %v5950_v50, %v5918_v29  ;;  %v5829_v8 = vadd.f32 1.0, %v8080_v30  ;;  %8097 = vpow2.f32 %v6495_v37  ;;  %v5671_v62 = vmul.f32 %v10377_v10, %v5599_v21  ;;  %v5956_v21 = vld [vmem:[%s8564_s21 + $0x58] sm:$0xff]  ;;  %v5954_v50 = vld [vmem:[%s8564_s21 + $0x48] sm:$0xff] }
 0x4f4   : > { %v8084_v3 = vpop.eup %8083  ;;  %6016 = vst [vmem:[%s10498_s9 + $0x38] sm:$0xff] %v5984_v36  ;;  %8099 = vrcp.f32 %v5831_v59  ;;  %v5832_v52 = vadd.f32 1.0, %v8082_v9  ;;  %v10540_v24 = vadd.f32 %v10383_v1, %v5673_v41  ;;  %v5610_v55 = vadd.f32 %v7610_v26, %v10353_v27 }
 0x4f5   : > { %6014 = vst [vmem:[%s10498_s9 + $0x28] sm:$0xff] %v5982_v48  ;;  %8101 = vrcp.f32 %v5829_v8  ;;  %v5830_v46 = vadd.f32 1.0, %v8084_v3  ;;  %v10545_v63 = vadd.f32 %v10383_v1, %v5671_v62  ;;  %v5602_v39 = vadd.f32 %v5601_v45, %v10347_v35  ;;  %v7613_v60 = vpop.f32.mrb[24].mxu1 }
 0x4f6   : > { %v8086_v20 = vpop.eup %8085  ;;  %8103 = vrcp.f32 %v5832_v52  ;;  %v6498_v40 = vmul.f32 -1.442695, %v10540_v24  ;;  %v5674_v57 = vmul.f32 %v10377_v10, %v5610_v55  ;;  %v5623_v27 = vadd.f32 %v7613_v60, %v10362_v6  ;;  %v5614_v13 = vpop.f32.mrb[25].mxu1  ;;  %v5959_v55 = vld [vmem:[%s8564_s21 + $0x70] sm:$0xff] }
 0x4f7   : > { %v8088_v32 = vpop.eup %8087  ;;  %v5923_v28 = vmul.f32 %v8086_v20, %v10443_v51  ;;  %8105 = vrcp.f32 %v5830_v46  ;;  %v6496_v35 = vmul.f32 -1.442695, %v10545_v63  ;;  %v5672_v18 = vmul.f32 %v10377_v10, %v5602_v39  ;;  %v7614_v4 = vpop.f32.mrb[26].mxu1 }
 0x4f8   : > { %v8090_v53 = vpop.eup %8089  ;;  %v5921_v44 = vmul.f32 %v8088_v32, %v10447_v54  ;;  %8107 = vpow2.f32 %v6493_v15  ;;  %v10559_v6 = vadd.f32 %v10383_v1, %v5674_v57  ;;  %v5677_v26 = vmul.f32 %v10377_v10, %v5623_v27  ;;  %v5617_v51 = vpop.f32.mrb[27].mxu1  ;;  %v5960_v32 = vld [vmem:[%s8564_s21 + $0x78] sm:$0xff] }
 0x4f9   : > { %v8092_v42 = vpop.eup %8091  ;;  %v5987_v17 = vadd.f32 %v5955_v34, %v5923_v28  ;;  %v5924_v43 = vmul.f32 %v8090_v53, %v10452_v61  ;;  %8109 = vpow2.f32 %v6498_v40  ;;  %v10565_v45 = vadd.f32 %v10383_v1, %v5672_v18  ;;  %v5957_v40 = vld [vmem:[%s8564_s21 + $0x60] sm:$0xff] }
 0x4fa   : > { %v8094_v54 = vpop.eup %8093  ;;  %v5985_v5 = vadd.f32 %v5953_v38, %v5921_v44  ;;  %v5922_v49 = vmul.f32 %v8092_v42, %v10456_v56  ;;  %8111 = vpow2.f32 %v6496_v35  ;;  %v6499_v29 = vmul.f32 -1.442695, %v10559_v6 }
 0x4fb   : > { %v8096_v37 = vpop.eup %8095  ;;  %6019 = vst [vmem:[%s10498_s9 + $0x50] sm:$0xff] %v5987_v17  ;;  %v5988_v30 = vadd.f32 %v5956_v21, %v5924_v43  ;;  %v5835_v36 = vadd.f32 1.0, %v8094_v54  ;;  %v6497_v61 = vmul.f32 -1.442695, %v10565_v45  ;;  %v10572_v59 = vadd.f32 %v10383_v1, %v5677_v26 }
 0x4fc   : > { %6017 = vst [vmem:[%s10498_s9 + $0x40] sm:$0xff] %v5985_v5  ;;  %v5986_v15 = vadd.f32 %v5954_v50, %v5922_v49  ;;  %v5833_v41 = vadd.f32 1.0, %v8096_v37  ;;  %8113 = vpow2.f32 %v6499_v29  ;;  %v5615_v56 = vadd.f32 %v5614_v13, %v10356_v2 }
 0x4fd   : > { %v8098_v9 = vpop.eup %8097  ;;  %6020 = vst [vmem:[%s10498_s9 + $0x58] sm:$0xff] %v5988_v30  ;;  %8115 = vrcp.f32 %v5835_v36  ;;  %v6502_v48 = vmul.f32 -1.442695, %v10572_v59  ;;  %v5626_v8 = vadd.f32 %v7614_v4, %v10365_v58  ;;  %v5618_v62 = vadd.f32 %v5617_v51, %v10359_v14  ;;  %v7617_v3 = vpop.f32.mrb[28].mxu1  ;;  %v5958_v4 = vld [vmem:[%s8564_s21 + $0x68] sm:$0xff] }
 0x4fe   : > { %v8100_v52 = vpop.eup %8099  ;;  %6018 = vst [vmem:[%s10498_s9 + $0x48] sm:$0xff] %v5986_v15  ;;  %8117 = vrcp.f32 %v5833_v41  ;;  %v5836_v46 = vadd.f32 1.0, %v8098_v9  ;;  %v5675_v39 = vmul.f32 %v10377_v10, %v5615_v56  ;;  %v5639_v2 = vadd.f32 %v7617_v3, %v10388_v47  ;;  %v5630_v60 = vpop.f32.mrb[29].mxu1  ;;  %v5963_v41 = vld [vmem:[%s8564_s21 + $0x90] sm:$0xff] }
 0x4ff   : > { %v8102_v20 = vpop.eup %8101  ;;  %v5927_v34 = vmul.f32 %v8100_v52, %v10467_v31  ;;  %8119 = vpow2.f32 %v6497_v61  ;;  %v5678_v14 = vmul.f32 %v10377_v10, %v5626_v8  ;;  %v5676_v58 = vmul.f32 %v10377_v10, %v5618_v62  ;;  %v7618_v57 = vpop.f32.mrb[30].mxu1  ;;  %v5961_v62 = vld [vmem:[%s8564_s21 + $0x80] sm:$0xff] }
 0x500   : > { %v8104_v27 = vpop.eup %8103  ;;  %v5925_v13 = vmul.f32 %v8102_v20, %v10471_v22  ;;  %8121 = vrcp.f32 %v5836_v46  ;;  %v10591_v47 = vadd.f32 %v10383_v1, %v5675_v39  ;;  %v5681_v28 = vmul.f32 %v10377_v10, %v5639_v2  ;;  %v5633_v31 = vpop.f32.mrb[31].mxu1  ;;  %v5964_v2 = vld [vmem:[%s8564_s21 + $0x98] sm:$0xff] }
 0x501   : > { %v8106_v38 = vpop.eup %8105  ;;  %v5991_v35 = vadd.f32 %v5959_v55, %v5927_v34  ;;  %v5928_v18 = vmul.f32 %v8104_v27, %v10476_v23  ;;  %8123 = vpow2.f32 %v6502_v48  ;;  %v10597_v53 = vadd.f32 %v10383_v1, %v5678_v14 }
 0x502   : > { %v8108_v22 = vpop.eup %8107  ;;  %v5989_v44 = vadd.f32 %v5957_v40, %v5925_v13  ;;  %v5926_v21 = vmul.f32 %v8106_v38, %v10481_v12  ;;  %v6500_v26 = vmul.f32 -1.442695, %v10591_v47  ;;  %v10602_v51 = vadd.f32 %v10383_v1, %v5676_v58 }
 0x503   : > { %v8110_v42 = vpop.eup %8109  ;;  %6023 = vst [vmem:[%s10498_s9 + $0x70] sm:$0xff] %v5991_v35  ;;  %v5992_v17 = vadd.f32 %v5960_v32, %v5928_v18  ;;  %v5834_v23 = vadd.f32 1.0, %v8108_v22  ;;  %v10606_v43 = vadd.f32 %v10383_v1, %v5681_v28  ;;  %v6503_v12 = vmul.f32 -1.442695, %v10597_v53  ;;  %v5962_v32 = vld [vmem:[%s8564_s21 + $0x88] sm:$0xff] }
 0x504   : > { %v8112_v50 = vpop.eup %8111  ;;  %6021 = vst [vmem:[%s10498_s9 + $0x60] sm:$0xff] %v5989_v44  ;;  %v5990_v54 = vadd.f32 %v5958_v4, %v5926_v21  ;;  %v5839_v5 = vadd.f32 1.0, %v8110_v42  ;;  %8125 = vpow2.f32 %v6500_v26  ;;  %v5631_v29 = vadd.f32 %v5630_v60, %v10368_v16  ;;  %v5965_v4 = vld [vmem:[%s8564_s21 + $0xa0] sm:$0xff] }
 0x505   : > { %6024 = vst [vmem:[%s10498_s9 + $0x78] sm:$0xff] %v5992_v17  ;;  %8127 = vrcp.f32 %v5834_v23  ;;  %v5837_v49 = vadd.f32 1.0, %v8112_v50  ;;  %v6501_v30 = vmul.f32 -1.442695, %v10602_v51  ;;  %v5642_v36 = vadd.f32 %v7618_v57, %v10396_v0  ;;  %v5968_v17 = vld [vmem:[%s8564_s21 + $0xb8] sm:$0xff] }
 0x506   : > { %v8114_v37 = vpop.eup %8113  ;;  %6022 = vst [vmem:[%s10498_s9 + $0x68] sm:$0xff] %v5990_v54  ;;  %8129 = vrcp.f32 %v5839_v5  ;;  %v5634_v61 = vadd.f32 %v5633_v31, %v10371_v33  ;;  %v6506_v9 = vmul.f32 -1.442695, %v10606_v43  ;;  %v5679_v48 = vmul.f32 %v10377_v10, %v5631_v29 }
 0x507   : > { %v8116_v15 = vpop.eup %8115  ;;  %8131 = vrcp.f32 %v5837_v49  ;;  %v5840_v56 = vadd.f32 1.0, %v8114_v37  ;;  %v5682_v3 = vmul.f32 %v10377_v10, %v5642_v36 }
 0x508   : > { %v8118_v8 = vpop.eup %8117  ;;  %v5931_v16 = vmul.f32 %v8116_v15, %v10502_v19  ;;  %8133 = vpow2.f32 %v6503_v12  ;;  %v5680_v0 = vmul.f32 %v10377_v10, %v5634_v61  ;;  %v10625_v55 = vadd.f32 %v10383_v1, %v5679_v48  ;;  %v5971_v61 = vld [vmem:[%s8564_s21 + $0xd0] sm:$0xff] }
 0x509   : > { %v8120_v33 = vpop.eup %8119  ;;  %v5929_v52 = vmul.f32 %v8118_v8, %v10506_v7  ;;  %8135 = vrcp.f32 %v5840_v56  ;;  %v10629_v19 = vadd.f32 %v10383_v1, %v5682_v3 }
 0x50a   : > { %v8122_v46 = vpop.eup %8121  ;;  %v5995_v39 = vadd.f32 %v5963_v41, %v5931_v16  ;;  %v5838_v60 = vadd.f32 1.0, %v8120_v33  ;;  %8137 = vpow2.f32 %v6501_v30  ;;  %v6504_v7 = vmul.f32 -1.442695, %v10625_v55  ;;  %v5969_v16 = vld [vmem:[%s8564_s21 + $0xc0] sm:$0xff]  ;;  %v5972_v33 = vld [vmem:[%s8564_s21 + $0xd8] sm:$0xff] }
 0x50b   : > { %v8124_v20 = vpop.eup %8123  ;;  %v5993_v34 = vadd.f32 %v5961_v62, %v5929_v52  ;;  %v5932_v10 = vmul.f32 %v8122_v46, %v10523_v25  ;;  %8139 = vpow2.f32 %v6506_v9  ;;  %v6507_v14 = vmul.f32 -1.442695, %v10629_v19 }
 0x50c   : > { %6027 = vst [vmem:[%s10498_s9 + $0x90] sm:$0xff] %v5995_v39  ;;  %8141 = vrcp.f32 %v5838_v60  ;;  %v5843_v40 = vadd.f32 1.0, %v8124_v20  ;;  %v10636_v58 = vadd.f32 %v10383_v1, %v5680_v0  ;;  %v5967_v1 = vld [vmem:[%s8564_s21 + $0xb0] sm:$0xff]  ;;  %v5970_v39 = vld [vmem:[%s8564_s21 + $0xc8] sm:$0xff] }
 0x50d   : > { %6025 = vst [vmem:[%s10498_s9 + $0x80] sm:$0xff] %v5993_v34  ;;  %v5996_v57 = vadd.f32 %v5964_v2, %v5932_v10  ;;  %8143 = vpow2.f32 %v6504_v7  ;;  %v5975_v20 = vld [vmem:[%s8564_s21 + $0xf0] sm:$0xff] }
 0x50e   : > { %v8126_v27 = vpop.eup %8125  ;;  %8145 = vrcp.f32 %v5843_v40  ;;  %v6505_v25 = vmul.f32 -1.442695, %v10636_v58  ;;  %v5973_v40 = vld [vmem:[%s8564_s21 + $0xe0] sm:$0xff] }
 0x50f   : > { %v8128_v13 = vpop.eup %8127  ;;  %6028 = vst [vmem:[%s10498_s9 + $0x98] sm:$0xff] %v5996_v57  ;;  %v5841_v28 = vadd.f32 1.0, %v8126_v27  ;;  %8147 = vpow2.f32 %v6507_v14  ;;  %v5976_v27 = vld [vmem:[%s8564_s21 + $0xf8] sm:$0xff] }
 0x510   : > { %v8130_v31 = vpop.eup %8129  ;;  %v5930_v38 = vmul.f32 %v8128_v13, %v10529_v11  ;;  %8149 = vpow2.f32 %v6505_v25  ;;  %v5974_v13 = vld [vmem:[%s8564_s21 + $0xe8] sm:$0xff] }
 0x511   : > { %v8132_v35 = vpop.eup %8131  ;;  %v5935_v18 = vmul.f32 %v8130_v31, %v10540_v24  ;;  %8151 = vrcp.f32 %v5841_v28 }
 0x512   : > { %v8134_v22 = vpop.eup %8133  ;;  %v5994_v44 = vadd.f32 %v5962_v32, %v5930_v38  ;;  %v5933_v21 = vmul.f32 %v8132_v35, %v10545_v63  ;;  %v5966_v63 = vld [vmem:[%s8564_s21 + $0xa8] sm:$0xff]  ;;  %s8343_s21 = smov [#allocation10]  }
 0x513   : > { %v8136_v26 = vpop.eup %8135  ;;  %v5999_v42 = vadd.f32 %v5967_v1, %v5935_v18  ;;  %v5844_v23 = vadd.f32 1.0, %v8134_v22  ;;  %s8267_s19 = sshll.u32 %s8343_s21, 4  ;;  %s8268_s19 = int_to_ptr.vmem [resolvable:$false] %s8267_s19 }
 0x514   : > { %v8138_v50 = vpop.eup %8137  ;;  %6026 = vst [vmem:[%s10498_s9 + $0x88] sm:$0xff] %v5994_v44  ;;  %v5997_v11 = vadd.f32 %v5965_v4, %v5933_v21  ;;  %v5936_v54 = vmul.f32 %v8136_v26, %v10559_v6  ;;  %s8269_s12 = scalar_lea.vmem %s8268_s19, 8192  ;;  %p8270_p7 = scmp.lt.s32.totalorder %s10685_s20, %s8268_s19 }
 0x515   : > { %v8140_v24 = vpop.eup %8139  ;;  %6031 = vst [vmem:[%s10498_s9 + $0xb0] sm:$0xff] %v5999_v42  ;;  %8153 = vrcp.f32 %v5844_v23  ;;  %v5842_v5 = vadd.f32 1.0, %v8138_v50  ;;  %p8271_p9 = scmp.lt.s32.totalorder %s8269_s12, %s8263_s15 }
 0x516   : > { %v8142_v12 = vpop.eup %8141  ;;  %6029 = vst [vmem:[%s10498_s9 + $0xa0] sm:$0xff] %v5997_v11  ;;  %v6000_v49 = vadd.f32 %v5968_v17, %v5936_v54  ;;  %v5847_v29 = vadd.f32 1.0, %v8140_v24 }
 0x517   : > { %v8144_v37 = vpop.eup %8143  ;;  %v5934_v30 = vmul.f32 %v8142_v12, %v10565_v45  ;;  %8155 = vrcp.f32 %v5842_v5  ;;  %p8272_p12 = por %p8271_p9, %p8270_p7 }
 0x518   : > { %v8146_v36 = vpop.eup %8145  ;;  %6032 = vst [vmem:[%s10498_s9 + $0xb8] sm:$0xff] %v6000_v49  ;;  %8157 = vrcp.f32 %v5847_v29  ;;  %v5845_v6 = vadd.f32 1.0, %v8144_v37 }
 0x519   : > { %v8148_v15 = vpop.eup %8147  ;;  %v5998_v41 = vadd.f32 %v5966_v63, %v5934_v30  ;;  %v5939_v56 = vmul.f32 %v8146_v36, %v10572_v59  ;;  %p8273_p2 = pnand %p8272_p12, %p8266_p3 }
 0x51a   : > { %v8150_v9 = vpop.eup %8149  ;;  %8159 = vrcp.f32 %v5845_v6  ;;  %v5848_v48 = vadd.f32 1.0, %v8148_v15 }
 0x51b   : > { %v8152_v8 = vpop.eup %8151  ;;  %6030 = vst [vmem:[%s10498_s9 + $0xa8] sm:$0xff] %v5998_v41  ;;  %v6003_v45 = vadd.f32 %v5971_v61, %v5939_v56  ;;  %v5846_v62 = vadd.f32 1.0, %v8150_v9 }
 0x51c   : > { %v5937_v3 = vmul.f32 %v8152_v8, %v10591_v47  ;;  %8161 = vrcp.f32 %v5848_v48 }
 0x51d   : > { %6035 = vst [vmem:[%s10498_s9 + $0xd0] sm:$0xff] %v6003_v45  ;;  %8163 = vrcp.f32 %v5846_v62 }
 0x51e   : > { %v6001_v0 = vadd.f32 %v5969_v16, %v5937_v3 }
 0x51f   : > { %v8154_v59 = vpop.eup %8153 }
 0x520   : > { %6033 = vst [vmem:[%s10498_s9 + $0xc0] sm:$0xff] %v6001_v0  ;;  %v5940_v52 = vmul.f32 %v8154_v59, %v10597_v53 }
 0x521   : > { %v8156_v46 = vpop.eup %8155 }
 0x522   : > { %v8158_v2 = vpop.eup %8157  ;;  %v6004_v60 = vadd.f32 %v5972_v33, %v5940_v52  ;;  %v5938_v47 = vmul.f32 %v8156_v46, %v10602_v51 }
 0x523   : > { %v5943_v34 = vmul.f32 %v8158_v2, %v10606_v43 }
 0x524   : > { %v8160_v10 = vpop.eup %8159  ;;  %6036 = vst [vmem:[%s10498_s9 + $0xd8] sm:$0xff] %v6004_v60  ;;  %v6002_v7 = vadd.f32 %v5970_v39, %v5938_v47 }
 0x525   : > { %v6007_v53 = vadd.f32 %v5975_v20, %v5943_v34  ;;  %v5941_v14 = vmul.f32 %v8160_v10, %v10625_v55 }
 0x526   : > { %v8162_v57 = vpop.eup %8161  ;;  %6034 = vst [vmem:[%s10498_s9 + $0xc8] sm:$0xff] %v6002_v7 }
 0x527   : > { %v8164_v51 = vpop.eup %8163  ;;  %6039 = vst [vmem:[%s10498_s9 + $0xf0] sm:$0xff] %v6007_v53  ;;  %v6005_v43 = vadd.f32 %v5973_v40, %v5941_v14  ;;  %v5944_v25 = vmul.f32 %v8162_v57, %v10629_v19 }
 0x528   : > { %v5942_v32 = vmul.f32 %v8164_v51, %v10636_v58 }
 0x529   : > { %6037 = vst [vmem:[%s10498_s9 + $0xe0] sm:$0xff] %v6005_v43  ;;  %v6008_v28 = vadd.f32 %v5976_v27, %v5944_v25 }
 0x52a   : > { %v6006_v55 = vadd.f32 %v5974_v13, %v5942_v32 }
 0x52b   : > { %6040 = vst [vmem:[%s10498_s9 + $0xf8] sm:$0xff] %v6008_v28 }
 0x52c   : > { %6038 = vst [vmem:[%s10498_s9 + $0xe8] sm:$0xff] %v6006_v55 }
 0x52d   : > { %8276 = shalt.err (!%p8273_p2)
}
 0x52e   : > { %s8277_s14 = scalar_lea.hbm %s10683_s10, 4096  ;;  %s8281_s9 = scalar_lea.hbm %s10738_s7, 8192 }
 0x52f   : > { %p8278_p13 = scmp.ne.s32.totalorder %s10683_s10, %s8277_s14  ;;  %p8282_p4 = scmp.lt.u32.totalorder %s10683_s10, %s10738_s7 }
 0x530   : > { %p8283_p5 = scmp.lt.u32.totalorder %s8281_s9, %s8277_s14  ;;  %p8285_p11 = scmp.lt.u32.totalorder %s8277_s14, %s10683_s10 }
 0x531   : > { %p8279_p6 = pnand %p8278_p13, %p10771_p0 }
 0x532   : > { %p8284_p8 = por %p8283_p5, %p8282_p4 }
 0x533   : > { %p8280_p10 = pneg %p8279_p6 }
 0x534   : > { %p8286_p1 = por %p8285_p11, %p8284_p8 }
 0x536   : > { %p8287_p3 = pnand %p8286_p1, %p8280_p10 }
 0x538   : > { %8290 = shalt.err (!%p8287_p3)
}
 0x539   : > { %s8344_s22 = smov 128   ;;  %s8345_s15 = smov 8  }
 0x53a   : > { %7629 = dma.vmem_to_hbm [thread:$0]  (%p10771_p0), %s10685_s20, 4096, %s10683_s10, %s6042_s28, %s8344_s22, %s8344_s22, %s8345_s15  }
 0x53b PF: > { %s6070_s21 = sand.u32 1, %s8321_s24   ;;  %p10772_p7 = scmp.ne.s32.totalorder %s10744_s8, 0 }
 0x53c   : > { %p10773_p9 = scmp.ge.s32.totalorder %s8333_s27, 2  ;;  %s6071_s19 = scalar_lea.sflag [#allocation6], %s6070_s21 }
 0x53e   : > { %p7643_p12 = pnand %p10773_p9, %p10772_p7 }
 0x540   : > { %8316 = dma.done.wait (!%p7643_p12), %s6071_s19, 4096  }
 0x541   : > { %8318 = vsyncadd (!%p7643_p12), %s6071_s19, 4294963200  ;;  %p21_p2 = scmp.ge.s32.totalorder %s8496_s13, 4   ;;  %s10774_s24 = smov %s8325_s25 }
 0x542   : > { %s10775_s25 = smov %s8329_s26  ;;  %s10776_s26 = smov %s8512_s17 }
 0x543   : > { %s10777_s27 = smov %s8496_s13  ;;  %23 = sbr.rel (!%p21_p2) target bundleno = 6 (0x6), region = 103 }
 0x54a   :  { %6076 = vsyncpa [#allocation5], 1 }
 0x54b   :  { %6078 = vsyncpa [#allocation5 + $0x1], 1 }
 0x54c   :  { %6079 = vsyncpa [#allocation8], 1 }
 0x54d   :  { %6080 = vsyncpa [#allocation6], 1 }
 0x54e   :  { %6082 = vsyncpa [#allocation6 + $0x1], 1 }

</bundles_post_ra>
